<compile_context>
chip_gen: v6e
topology: v6e:2x2x1
jax: 0.10.0
libtpu: 0.0.40
codegen_flags: <defaults>
</compile_context>

<pallas_src>
import functools

import jax
import jax.numpy as jnp
import numpy as np
from jax.experimental import pallas as pl
from jax.experimental.pallas import tpu as pltpu


# ----------------------------------------------------------------------------- kernel

def _gelu_tanh(x):
    # TODO(synk): PyTorch nn.GELU() default is the exact erf GELU; Mosaic does not
    # guarantee an erf lowering, so the tanh approximation is used (max abs err ~3e-3).
    c = 0.7978845608028654  # sqrt(2/pi)
    return 0.5 * x * (1.0 + jnp.tanh(c * (x + 0.044715 * x * x * x)))


def _layernorm(x, gamma, beta, eps):
    mean = jnp.mean(x, axis=-1, keepdims=True)
    cen = x - mean
    var = jnp.mean(cen * cen, axis=-1, keepdims=True)
    return cen * jax.lax.rsqrt(var + eps) * gamma + beta


def _block_kernel(x_ref, g1_ref, b1_ref, wqkv_ref, wproj_ref, bproj_ref,
                  g2_ref, b2_ref, w1_ref, bfc1_ref, wdw_ref, bdw_ref, dwm_ref,
                  w2_ref, bfc2_ref, o_ref, pad_ref,
                  *, num_heads, scale, eps, H, W, pad_lo):
    """Whole Block for one batch element: both residual branches fused."""
    x = x_ref[...].astype(jnp.float32)                        # (N, C)
    n, c = x.shape
    d = c // num_heads

    # ------------- branch 1: x = x + proj(softmax(q k^T * scale) v) ----------------
    h = _layernorm(x, g1_ref[...], b1_ref[...], eps)
    qkv = jnp.dot(h.astype(jnp.bfloat16), wqkv_ref[...],
                  preferred_element_type=jnp.float32)         # (N, 3C)
    q, k, v = qkv[:, :c], qkv[:, c:2 * c], qkv[:, 2 * c:]

    attn_out = jnp.zeros((n, c), jnp.float32)
    for hd in range(num_heads):
        s0 = hd * d
        qh = q[:, s0:s0 + d].astype(jnp.bfloat16)             # (N, d)
        kh = k[:, s0:s0 + d].astype(jnp.bfloat16)
        vh = v[:, s0:s0 + d].astype(jnp.bfloat16)
        # scores = qh @ kh^T (contract head dim) -> (N, N)
        s = jax.lax.dot_general(qh, kh, (((1,), (1,)), ((), ())),
                                preferred_element_type=jnp.float32) * scale
        s = s - jnp.max(s, axis=-1, keepdims=True)
        p = jnp.exp(s)
        p = p * pl.reciprocal(jnp.sum(p, axis=-1, keepdims=True), approx=True)
        oh = jnp.dot(p.astype(jnp.bfloat16), vh,
                     preferred_element_type=jnp.float32)      # (N, d)
        # fold head output directly through its slice of the projection weight:
        attn_out = attn_out + jnp.dot(oh.astype(jnp.bfloat16), wproj_ref[hd],
                                      preferred_element_type=jnp.float32)
    x = x + attn_out + bproj_ref[...]

    # ------------- branch 2: x = x + fc2(GELU(dwconv3x3(fc1(norm2(x))))) -----------
    h2 = _layernorm(x, g2_ref[...], b2_ref[...], eps)
    h1 = jnp.dot(h2.astype(jnp.bfloat16), w1_ref[...],
                 preferred_element_type=jnp.float32) + bfc1_ref[...]     # (N, hid)

    # 3x3 depthwise conv (padding=1) as 9 shifted reads of a zero-padded VMEM buffer
    # over the row-flattened (h*W + w) token axis.  Row (dh) boundaries are handled
    # by the zero pad; column (dw) boundaries by the precomputed per-row masks.
    @pl.when(pl.program_id(0) == 0)
    def _zero_pad():                                          # pads stay zero forever
        pad_ref[...] = jnp.zeros_like(pad_ref)

    pad_ref[pad_lo:pad_lo + n, :] = h1                        # aligned store

    acc = jnp.zeros_like(h1)
    for dh in (-1, 0, 1):
        for dw in (-1, 0, 1):
            kk = (dh + 1) * 3 + (dw + 1)
            start = pad_lo + dh * W + dw
            tap = pad_ref[start:start + n, :]                 # shifted read
            acc = acc + tap * (dwm_ref[kk] * wdw_ref[kk])
    acc = acc + bdw_ref[...]

    g = _gelu_tanh(acc)
    out = jnp.dot(g.astype(jnp.bfloat16), w2_ref[...],
                  preferred_element_type=jnp.float32) + bfc2_ref[...]    # (N, C)
    o_ref[...] = (x + out).astype(o_ref.dtype)


# ----------------------------------------------------------------------------- wrapper

def _dw_col_masks(H, W):
    """(9, N, 1) 0/1 masks: tap k=(dh+1)*3+(dw+1) is valid iff 0 <= w+dw < W."""
    N = H * W
    m = np.ones((9, N, 1), np.float32)
    w = np.arange(N) % W
    for dh in (-1, 0, 1):
        for dw in (-1, 0, 1):
            k = (dh + 1) * 3 + (dw + 1)
            m[k, :, 0] = ((w + dw >= 0) & (w + dw < W)).astype(np.float32)
    return jnp.asarray(m)


def _bcast_spec(shape):
    nd = len(shape)
    return pl.BlockSpec(shape, lambda b, nd=nd: (0,) * nd)


def block_forward(x, params, *, H, W, num_heads, eps=1e-5):
    """x: (B, N=H*W, C) float32.  Returns (B, N, C) float32."""
    B, N, C = x.shape
    assert N == H * W and C % num_heads == 0
    d = C // num_heads
    scale = float(d) ** -0.5
    hid = params["w1"].shape[1]

    f32, bf16 = jnp.float32, jnp.bfloat16
    row_spec = pl.BlockSpec((None, N, C), lambda b: (b, 0, 0))

    # padding for the flattened-token depthwise-conv buffer (>= W+1, multiple of 8)
    pad_lo = ((W + 1 + 7) // 8) * 8

    g1 = params["ln1_g"].reshape(1, C).astype(f32)
    b1 = params["ln1_b"].reshape(1, C).astype(f32)
    wqkv = jnp.concatenate([params["wq"], params["wkv"]], axis=1).astype(bf16)  # (C, 3C)
    wproj = params["wproj"].reshape(num_heads, d, C).astype(bf16)
    bproj = params["bproj"].reshape(1, C).astype(f32)
    g2 = params["ln2_g"].reshape(1, C).astype(f32)
    b2 = params["ln2_b"].reshape(1, C).astype(f32)
    w1 = params["w1"].astype(bf16)                                   # (C, hid)
    bfc1 = params["b_fc1"].reshape(1, hid).astype(f32)
    wdw = params["wdw"].reshape(hid, 9).T.reshape(9, 1, hid).astype(f32)
    bdw = params["bdw"].reshape(1, hid).astype(f32)
    dwm = _dw_col_masks(H, W)                                        # (9, N, 1)
    w2 = params["w2"].astype(bf16)                                   # (hid, C)
    bfc2 = params["b_fc2"].reshape(1, C).astype(f32)

    cost = pl.CostEstimate(
        flops=int(B * (2 * N * C * 3 * C + 4 * N * N * C + 2 * N * C * C
                       + 2 * N * C * hid + 18 * N * hid + 2 * N * hid * C)),
        transcendentals=int(B * (num_heads * N * N + N * hid)),
        bytes_accessed=int(8 * B * N * C
                           + 2 * (wqkv.size + wproj.size + w1.size + w2.size)
                           + 4 * (dwm.size + wdw.size) + 32 * C + 8 * hid))

    kernel = functools.partial(_block_kernel, num_heads=num_heads, scale=scale,
                               eps=eps, H=H, W=W, pad_lo=pad_lo)

    y = pl.pallas_call(
        kernel,
        out_shape=jax.ShapeDtypeStruct((B, N, C), f32),
        grid=(B,),
        in_specs=[row_spec,
                  _bcast_spec((1, C)), _bcast_spec((1, C)),
                  _bcast_spec((C, 3 * C)),
                  _bcast_spec((num_heads, d, C)), _bcast_spec((1, C)),
                  _bcast_spec((1, C)), _bcast_spec((1, C)),
                  _bcast_spec((C, hid)), _bcast_spec((1, hid)),
                  _bcast_spec((9, 1, hid)), _bcast_spec((1, hid)),
                  _bcast_spec((9, N, 1)),
                  _bcast_spec((hid, C)), _bcast_spec((1, C))],
        out_specs=row_spec,
        scratch_shapes=[pltpu.VMEM((N + 2 * pad_lo, hid), f32)],
        compiler_params=pltpu.CompilerParams(
            dimension_semantics=("parallel",),
            vmem_limit_bytes=32 * 1024 * 1024),
        cost_estimate=cost,
    )(x.astype(f32), g1, b1, wqkv, wproj, bproj,
      g2, b2, w1, bfc1, wdw, bdw, dwm, w2, bfc2)

    # TODO(synk): sr_ratio > 1 branch (strided Conv2d + LayerNorm on kv) not implemented;
    # this kernel covers the module's default sr_ratio=1 path.
    return y


# ----------------------------------------------------------------------------- reference

def _block_reference(x, P, *, H, W, num_heads, eps=1e-5):
    B, N, C = x.shape
    d = C // num_heads
    scale = float(d) ** -0.5
    hp = jax.lax.Precision.HIGHEST

    def ln(t, g, b):
        m = jnp.mean(t, axis=-1, keepdims=True)
        v = jnp.mean((t - m) ** 2, axis=-1, keepdims=True)
        return (t - m) * jax.lax.rsqrt(v + eps) * g + b

    h = ln(x, P["ln1_g"], P["ln1_b"])
    q = jnp.einsum("bnc,cd->bnd", h, P["wq"], precision=hp)
    kv = jnp.einsum("bnc,cd->bnd", h, P["wkv"], precision=hp)
    k, v = kv[..., :C], kv[..., C:]
    qh = q.reshape(B, N, num_heads, d).transpose(0, 2, 1, 3)
    kh = k.reshape(B, N, num_heads, d).transpose(0, 2, 1, 3)
    vh = v.reshape(B, N, num_heads, d).transpose(0, 2, 1, 3)
    attn = jnp.einsum("bhnd,bhmd->bhnm", qh, kh, precision=hp) * scale
    attn = jax.nn.softmax(attn, axis=-1)
    o = jnp.einsum("bhnm,bhmd->bhnd", attn, vh, precision=hp)
    o = o.transpose(0, 2, 1, 3).reshape(B, N, C)
    o = jnp.einsum("bnc,cd->bnd", o, P["wproj"], precision=hp) + P["bproj"]
    x = x + o

    h2 = ln(x, P["ln2_g"], P["ln2_b"])
    h1 = jnp.einsum("bnc,ch->bnh", h2, P["w1"], precision=hp) + P["b_fc1"]
    hid = h1.shape[-1]
    t = h1.reshape(B, H, W, hid).transpose(0, 3, 1, 2)               # (B, hid, H, W)
    dw = jax.lax.conv_general_dilated(
        t, P["wdw"], window_strides=(1, 1), padding=[(1, 1), (1, 1)],
        feature_group_count=hid, dimension_numbers=("NCHW", "OIHW", "NCHW"),
        precision=hp)
    dw = dw + P["bdw"].reshape(1, hid, 1, 1)
    dw = dw.transpose(0, 2, 3, 1).reshape(B, N, hid)
    g = jax.nn.gelu(dw, approximate=False)                           # exact erf GELU
    out = jnp.einsum("bnh,hc->bnc", g, P["w2"], precision=hp) + P["b_fc2"]
    return x + out


# ----------------------------------------------------------------------------- main

if __name__ == "__main__":
    B, H, W = 2, 8, 8
    dim, num_heads, mlp_ratio = 32, 4, 4.0
    N = H * W
    hid = int(dim * mlp_ratio)

    key = jax.random.PRNGKey(0)
    ks = jax.random.split(key, 15)

    def nrm(k, shape, std):
        return std * jax.random.normal(k, shape, jnp.float32)

    x = jax.random.normal(ks[0], (B, N, dim), jnp.float32)
    params = dict(
        ln1_g=1.0 + nrm(ks[1], (dim,), 0.1),
        ln1_b=nrm(ks[2], (dim,), 0.1),
        wq=nrm(ks[3], (dim, dim), 0.1),
        wkv=nrm(ks[4], (dim, 2 * dim), 0.1),
        wproj=nrm(ks[5], (dim, dim), 0.1),
        bproj=nrm(ks[6], (dim,), 0.1),
        ln2_g=1.0 + nrm(ks[7], (dim,), 0.1),
        ln2_b=nrm(ks[8], (dim,), 0.1),
        w1=nrm(ks[9], (dim, hid), 0.1),
        b_fc1=nrm(ks[10], (hid,), 0.1),
        wdw=nrm(ks[11], (hid, 1, 3, 3), 0.3),
        bdw=nrm(ks[12], (hid,), 0.1),
        w2=nrm(ks[13], (hid, dim), 0.1),
        b_fc2=nrm(ks[14], (dim,), 0.1),
    )

    out = block_forward(x, params, H=H, W=W, num_heads=num_heads)
    out = jax.block_until_ready(out)

    ref = _block_reference(x, params, H=H, W=W, num_heads=num_heads)
    np.testing.assert_allclose(np.asarray(out), np.asarray(ref), rtol=2e-2, atol=2e-2)

    print("KERNEL_OK")
</pallas_src>

<mosaic_0001>
module attributes {stable_mosaic.version = 11 : i64} {
  func.func @_block_kernel(%arg0: i32, %arg1: memref<1x64x32xf32, #tpu.memory_space<vmem>>, %arg2: memref<1x32xf32, #tpu.memory_space<vmem>>, %arg3: memref<1x32xf32, #tpu.memory_space<vmem>>, %arg4: memref<32x96xbf16, #tpu.memory_space<vmem>>, %arg5: memref<4x8x32xbf16, #tpu.memory_space<vmem>>, %arg6: memref<1x32xf32, #tpu.memory_space<vmem>>, %arg7: memref<1x32xf32, #tpu.memory_space<vmem>>, %arg8: memref<1x32xf32, #tpu.memory_space<vmem>>, %arg9: memref<32x128xbf16, #tpu.memory_space<vmem>>, %arg10: memref<1x128xf32, #tpu.memory_space<vmem>>, %arg11: memref<9x1x128xf32, #tpu.memory_space<vmem>>, %arg12: memref<1x128xf32, #tpu.memory_space<vmem>>, %arg13: memref<9x64x1xf32, #tpu.memory_space<vmem>>, %arg14: memref<128x32xbf16, #tpu.memory_space<vmem>>, %arg15: memref<1x32xf32, #tpu.memory_space<vmem>>, %arg16: memref<1x64x32xf32, #tpu.memory_space<vmem>>, %arg17: memref<96x128xf32, #tpu.memory_space<vmem>>) attributes {dimension_semantics = [#tpu.dimension_semantics<parallel>], iteration_bounds = array<i64: 2>, scalar_prefetch = 0 : i64, scratch_operands = 1 : i64, tpu.core_type = #tpu.core_type<tc>, window_params = [{transform_indices = @transform_0, window_bounds = array<i64: 1, 64, 32>}, {pipeline_mode = #tpu.pipeline_mode<synchronous>, transform_indices = @transform_1, window_bounds = array<i64: 1, 32>}, {pipeline_mode = #tpu.pipeline_mode<synchronous>, transform_indices = @transform_2, window_bounds = array<i64: 1, 32>}, {pipeline_mode = #tpu.pipeline_mode<synchronous>, transform_indices = @transform_3, window_bounds = array<i64: 32, 96>}, {pipeline_mode = #tpu.pipeline_mode<synchronous>, transform_indices = @transform_4, window_bounds = array<i64: 4, 8, 32>}, {pipeline_mode = #tpu.pipeline_mode<synchronous>, transform_indices = @transform_5, window_bounds = array<i64: 1, 32>}, {pipeline_mode = #tpu.pipeline_mode<synchronous>, transform_indices = @transform_6, window_bounds = array<i64: 1, 32>}, {pipeline_mode = #tpu.pipeline_mode<synchronous>, transform_indices = @transform_7, window_bounds = array<i64: 1, 32>}, {pipeline_mode = #tpu.pipeline_mode<synchronous>, transform_indices = @transform_8, window_bounds = array<i64: 32, 128>}, {pipeline_mode = #tpu.pipeline_mode<synchronous>, transform_indices = @transform_9, window_bounds = array<i64: 1, 128>}, {pipeline_mode = #tpu.pipeline_mode<synchronous>, transform_indices = @transform_10, window_bounds = array<i64: 9, 1, 128>}, {pipeline_mode = #tpu.pipeline_mode<synchronous>, transform_indices = @transform_11, window_bounds = array<i64: 1, 128>}, {pipeline_mode = #tpu.pipeline_mode<synchronous>, transform_indices = @transform_12, window_bounds = array<i64: 9, 64, 1>}, {pipeline_mode = #tpu.pipeline_mode<synchronous>, transform_indices = @transform_13, window_bounds = array<i64: 128, 32>}, {pipeline_mode = #tpu.pipeline_mode<synchronous>, transform_indices = @transform_14, window_bounds = array<i64: 1, 32>}, {transform_indices = @transform_15, window_bounds = array<i64: 1, 64, 32>}]} {
    %c0 = arith.constant 0 : index
    %c0_0 = arith.constant 0 : index
    %c0_1 = arith.constant 0 : index
    %0 = vector.load %arg1[%c0, %c0_0, %c0_1] : memref<1x64x32xf32, #tpu.memory_space<vmem>>, vector<1x64x32xf32>
    %1 = vector.shape_cast %0 : vector<1x64x32xf32> to vector<64x32xf32>
    %c0_2 = arith.constant 0 : index
    %c0_3 = arith.constant 0 : index
    %2 = vector.load %arg2[%c0_2, %c0_3] : memref<1x32xf32, #tpu.memory_space<vmem>>, vector<1x32xf32>
    %c0_4 = arith.constant 0 : index
    %c0_5 = arith.constant 0 : index
    %3 = vector.load %arg3[%c0_4, %c0_5] : memref<1x32xf32, #tpu.memory_space<vmem>>, vector<1x32xf32>
    %cst = arith.constant dense<0.000000e+00> : vector<64xf32>
    %4 = vector.multi_reduction <add>, %1, %cst [1] : vector<64x32xf32> to vector<64xf32>
    %5 = vector.shape_cast %4 : vector<64xf32> to vector<64x1xf32>
    %cst_6 = arith.constant 3.200000e+01 : f32
    %6 = vector.broadcast %cst_6 : f32 to vector<64x1xf32>
    %7 = arith.divf %5, %6 : vector<64x1xf32>
    %8 = vector.broadcast %7 : vector<64x1xf32> to vector<64x32xf32>
    %9 = arith.subf %1, %8 : vector<64x32xf32>
    %10 = arith.mulf %9, %9 : vector<64x32xf32>
    %cst_7 = arith.constant dense<0.000000e+00> : vector<64xf32>
    %11 = vector.multi_reduction <add>, %10, %cst_7 [1] : vector<64x32xf32> to vector<64xf32>
    %12 = vector.shape_cast %11 : vector<64xf32> to vector<64x1xf32>
    %cst_8 = arith.constant 3.200000e+01 : f32
    %13 = vector.broadcast %cst_8 : f32 to vector<64x1xf32>
    %14 = arith.divf %12, %13 : vector<64x1xf32>
    %cst_9 = arith.constant 9.99999974E-6 : f32
    %15 = vector.broadcast %cst_9 : f32 to vector<64x1xf32>
    %16 = arith.addf %14, %15 : vector<64x1xf32>
    %17 = math.rsqrt %16 : vector<64x1xf32>
    %18 = vector.broadcast %17 : vector<64x1xf32> to vector<64x32xf32>
    %19 = arith.mulf %9, %18 : vector<64x32xf32>
    %20 = vector.broadcast %2 : vector<1x32xf32> to vector<64x32xf32>
    %21 = arith.mulf %19, %20 : vector<64x32xf32>
    %22 = vector.broadcast %3 : vector<1x32xf32> to vector<64x32xf32>
    %23 = arith.addf %21, %22 : vector<64x32xf32>
    %24 = arith.truncf %23 : vector<64x32xf32> to vector<64x32xbf16>
    %c0_10 = arith.constant 0 : index
    %c0_11 = arith.constant 0 : index
    %25 = vector.load %arg4[%c0_10, %c0_11] : memref<32x96xbf16, #tpu.memory_space<vmem>>, vector<32x96xbf16>
    %cst_12 = arith.constant dense<0.000000e+00> : vector<64x96xf32>
    %26 = tpu.matmul %24, %25, %cst_12 {dimension_numbers = #tpu.dot_dimension_numbers<[1], [0], [0], [1], [0, 0, 1, 1], [], []>} : vector<64x32xbf16>, vector<32x96xbf16>, vector<64x96xf32> -> vector<64x96xf32>
    %27 = vector.extract_strided_slice %26 {offsets = [0, 0], sizes = [64, 32], strides = [1, 1]} : vector<64x96xf32> to vector<64x32xf32>
    %28 = vector.extract_strided_slice %26 {offsets = [0, 32], sizes = [64, 32], strides = [1, 1]} : vector<64x96xf32> to vector<64x32xf32>
    %29 = vector.extract_strided_slice %26 {offsets = [0, 64], sizes = [64, 32], strides = [1, 1]} : vector<64x96xf32> to vector<64x32xf32>
    %cst_13 = arith.constant 0.000000e+00 : f32
    %30 = vector.broadcast %cst_13 : f32 to vector<64x32xf32>
    %31 = vector.extract_strided_slice %27 {offsets = [0, 0], sizes = [64, 8], strides = [1, 1]} : vector<64x32xf32> to vector<64x8xf32>
    %32 = arith.truncf %31 : vector<64x8xf32> to vector<64x8xbf16>
    %33 = vector.extract_strided_slice %28 {offsets = [0, 0], sizes = [64, 8], strides = [1, 1]} : vector<64x32xf32> to vector<64x8xf32>
    %34 = arith.truncf %33 : vector<64x8xf32> to vector<64x8xbf16>
    %35 = vector.extract_strided_slice %29 {offsets = [0, 0], sizes = [64, 8], strides = [1, 1]} : vector<64x32xf32> to vector<64x8xf32>
    %36 = arith.truncf %35 : vector<64x8xf32> to vector<64x8xbf16>
    %cst_14 = arith.constant dense<0.000000e+00> : vector<64x64xf32>
    %37 = tpu.matmul %32, %34, %cst_14 {dimension_numbers = #tpu.dot_dimension_numbers<[1], [1], [0], [0], [0, 0, 1, 0], [], []>} : vector<64x8xbf16>, vector<64x8xbf16>, vector<64x64xf32> -> vector<64x64xf32>
    %cst_15 = arith.constant 0.353553385 : f32
    %38 = vector.broadcast %cst_15 : f32 to vector<64x64xf32>
    %39 = arith.mulf %37, %38 : vector<64x64xf32>
    %cst_16 = arith.constant dense<0xFF800000> : vector<64xf32>
    %40 = vector.multi_reduction <maximumf>, %39, %cst_16 [1] : vector<64x64xf32> to vector<64xf32>
    %41 = vector.shape_cast %40 : vector<64xf32> to vector<64x1xf32>
    %42 = vector.broadcast %41 : vector<64x1xf32> to vector<64x64xf32>
    %43 = arith.subf %39, %42 : vector<64x64xf32>
    %44 = math.exp %43 : vector<64x64xf32>
    %cst_17 = arith.constant dense<0.000000e+00> : vector<64xf32>
    %45 = vector.multi_reduction <add>, %44, %cst_17 [1] : vector<64x64xf32> to vector<64xf32>
    %46 = vector.shape_cast %45 : vector<64xf32> to vector<64x1xf32>
    %47 = tpu.reciprocal %46 {approx = true} : vector<64x1xf32> -> vector<64x1xf32>
    %48 = vector.broadcast %47 : vector<64x1xf32> to vector<64x64xf32>
    %49 = arith.mulf %44, %48 : vector<64x64xf32>
    %50 = arith.truncf %49 : vector<64x64xf32> to vector<64x64xbf16>
    %cst_18 = arith.constant dense<0.000000e+00> : vector<64x8xf32>
    %51 = tpu.matmul %50, %36, %cst_18 {dimension_numbers = #tpu.dot_dimension_numbers<[1], [0], [0], [1], [0, 0, 1, 1], [], []>} : vector<64x64xbf16>, vector<64x8xbf16>, vector<64x8xf32> -> vector<64x8xf32>
    %52 = arith.truncf %51 : vector<64x8xf32> to vector<64x8xbf16>
    %c0_19 = arith.constant 0 : index
    %c0_20 = arith.constant 0 : index
    %c0_21 = arith.constant 0 : index
    %53 = vector.load %arg5[%c0_19, %c0_20, %c0_21] : memref<4x8x32xbf16, #tpu.memory_space<vmem>>, vector<1x8x32xbf16>
    %54 = vector.shape_cast %53 : vector<1x8x32xbf16> to vector<8x32xbf16>
    %cst_22 = arith.constant dense<0.000000e+00> : vector<64x32xf32>
    %55 = tpu.matmul %52, %54, %cst_22 {dimension_numbers = #tpu.dot_dimension_numbers<[1], [0], [0], [1], [0, 0, 1, 1], [], []>} : vector<64x8xbf16>, vector<8x32xbf16>, vector<64x32xf32> -> vector<64x32xf32>
    %56 = arith.addf %30, %55 : vector<64x32xf32>
    %57 = vector.extract_strided_slice %27 {offsets = [0, 8], sizes = [64, 8], strides = [1, 1]} : vector<64x32xf32> to vector<64x8xf32>
    %58 = arith.truncf %57 : vector<64x8xf32> to vector<64x8xbf16>
    %59 = vector.extract_strided_slice %28 {offsets = [0, 8], sizes = [64, 8], strides = [1, 1]} : vector<64x32xf32> to vector<64x8xf32>
    %60 = arith.truncf %59 : vector<64x8xf32> to vector<64x8xbf16>
    %61 = vector.extract_strided_slice %29 {offsets = [0, 8], sizes = [64, 8], strides = [1, 1]} : vector<64x32xf32> to vector<64x8xf32>
    %62 = arith.truncf %61 : vector<64x8xf32> to vector<64x8xbf16>
    %cst_23 = arith.constant dense<0.000000e+00> : vector<64x64xf32>
    %63 = tpu.matmul %58, %60, %cst_23 {dimension_numbers = #tpu.dot_dimension_numbers<[1], [1], [0], [0], [0, 0, 1, 0], [], []>} : vector<64x8xbf16>, vector<64x8xbf16>, vector<64x64xf32> -> vector<64x64xf32>
    %cst_24 = arith.constant 0.353553385 : f32
    %64 = vector.broadcast %cst_24 : f32 to vector<64x64xf32>
    %65 = arith.mulf %63, %64 : vector<64x64xf32>
    %cst_25 = arith.constant dense<0xFF800000> : vector<64xf32>
    %66 = vector.multi_reduction <maximumf>, %65, %cst_25 [1] : vector<64x64xf32> to vector<64xf32>
    %67 = vector.shape_cast %66 : vector<64xf32> to vector<64x1xf32>
    %68 = vector.broadcast %67 : vector<64x1xf32> to vector<64x64xf32>
    %69 = arith.subf %65, %68 : vector<64x64xf32>
    %70 = math.exp %69 : vector<64x64xf32>
    %cst_26 = arith.constant dense<0.000000e+00> : vector<64xf32>
    %71 = vector.multi_reduction <add>, %70, %cst_26 [1] : vector<64x64xf32> to vector<64xf32>
    %72 = vector.shape_cast %71 : vector<64xf32> to vector<64x1xf32>
    %73 = tpu.reciprocal %72 {approx = true} : vector<64x1xf32> -> vector<64x1xf32>
    %74 = vector.broadcast %73 : vector<64x1xf32> to vector<64x64xf32>
    %75 = arith.mulf %70, %74 : vector<64x64xf32>
    %76 = arith.truncf %75 : vector<64x64xf32> to vector<64x64xbf16>
    %cst_27 = arith.constant dense<0.000000e+00> : vector<64x8xf32>
    %77 = tpu.matmul %76, %62, %cst_27 {dimension_numbers = #tpu.dot_dimension_numbers<[1], [0], [0], [1], [0, 0, 1, 1], [], []>} : vector<64x64xbf16>, vector<64x8xbf16>, vector<64x8xf32> -> vector<64x8xf32>
    %78 = arith.truncf %77 : vector<64x8xf32> to vector<64x8xbf16>
    %c1 = arith.constant 1 : index
    %c0_28 = arith.constant 0 : index
    %c0_29 = arith.constant 0 : index
    %79 = vector.load %arg5[%c1, %c0_28, %c0_29] : memref<4x8x32xbf16, #tpu.memory_space<vmem>>, vector<1x8x32xbf16>
    %80 = vector.shape_cast %79 : vector<1x8x32xbf16> to vector<8x32xbf16>
    %cst_30 = arith.constant dense<0.000000e+00> : vector<64x32xf32>
    %81 = tpu.matmul %78, %80, %cst_30 {dimension_numbers = #tpu.dot_dimension_numbers<[1], [0], [0], [1], [0, 0, 1, 1], [], []>} : vector<64x8xbf16>, vector<8x32xbf16>, vector<64x32xf32> -> vector<64x32xf32>
    %82 = arith.addf %56, %81 : vector<64x32xf32>
    %83 = vector.extract_strided_slice %27 {offsets = [0, 16], sizes = [64, 8], strides = [1, 1]} : vector<64x32xf32> to vector<64x8xf32>
    %84 = arith.truncf %83 : vector<64x8xf32> to vector<64x8xbf16>
    %85 = vector.extract_strided_slice %28 {offsets = [0, 16], sizes = [64, 8], strides = [1, 1]} : vector<64x32xf32> to vector<64x8xf32>
    %86 = arith.truncf %85 : vector<64x8xf32> to vector<64x8xbf16>
    %87 = vector.extract_strided_slice %29 {offsets = [0, 16], sizes = [64, 8], strides = [1, 1]} : vector<64x32xf32> to vector<64x8xf32>
    %88 = arith.truncf %87 : vector<64x8xf32> to vector<64x8xbf16>
    %cst_31 = arith.constant dense<0.000000e+00> : vector<64x64xf32>
    %89 = tpu.matmul %84, %86, %cst_31 {dimension_numbers = #tpu.dot_dimension_numbers<[1], [1], [0], [0], [0, 0, 1, 0], [], []>} : vector<64x8xbf16>, vector<64x8xbf16>, vector<64x64xf32> -> vector<64x64xf32>
    %cst_32 = arith.constant 0.353553385 : f32
    %90 = vector.broadcast %cst_32 : f32 to vector<64x64xf32>
    %91 = arith.mulf %89, %90 : vector<64x64xf32>
    %cst_33 = arith.constant dense<0xFF800000> : vector<64xf32>
    %92 = vector.multi_reduction <maximumf>, %91, %cst_33 [1] : vector<64x64xf32> to vector<64xf32>
    %93 = vector.shape_cast %92 : vector<64xf32> to vector<64x1xf32>
    %94 = vector.broadcast %93 : vector<64x1xf32> to vector<64x64xf32>
    %95 = arith.subf %91, %94 : vector<64x64xf32>
    %96 = math.exp %95 : vector<64x64xf32>
    %cst_34 = arith.constant dense<0.000000e+00> : vector<64xf32>
    %97 = vector.multi_reduction <add>, %96, %cst_34 [1] : vector<64x64xf32> to vector<64xf32>
    %98 = vector.shape_cast %97 : vector<64xf32> to vector<64x1xf32>
    %99 = tpu.reciprocal %98 {approx = true} : vector<64x1xf32> -> vector<64x1xf32>
    %100 = vector.broadcast %99 : vector<64x1xf32> to vector<64x64xf32>
    %101 = arith.mulf %96, %100 : vector<64x64xf32>
    %102 = arith.truncf %101 : vector<64x64xf32> to vector<64x64xbf16>
    %cst_35 = arith.constant dense<0.000000e+00> : vector<64x8xf32>
    %103 = tpu.matmul %102, %88, %cst_35 {dimension_numbers = #tpu.dot_dimension_numbers<[1], [0], [0], [1], [0, 0, 1, 1], [], []>} : vector<64x64xbf16>, vector<64x8xbf16>, vector<64x8xf32> -> vector<64x8xf32>
    %104 = arith.truncf %103 : vector<64x8xf32> to vector<64x8xbf16>
    %c2 = arith.constant 2 : index
    %c0_36 = arith.constant 0 : index
    %c0_37 = arith.constant 0 : index
    %105 = vector.load %arg5[%c2, %c0_36, %c0_37] : memref<4x8x32xbf16, #tpu.memory_space<vmem>>, vector<1x8x32xbf16>
    %106 = vector.shape_cast %105 : vector<1x8x32xbf16> to vector<8x32xbf16>
    %cst_38 = arith.constant dense<0.000000e+00> : vector<64x32xf32>
    %107 = tpu.matmul %104, %106, %cst_38 {dimension_numbers = #tpu.dot_dimension_numbers<[1], [0], [0], [1], [0, 0, 1, 1], [], []>} : vector<64x8xbf16>, vector<8x32xbf16>, vector<64x32xf32> -> vector<64x32xf32>
    %108 = arith.addf %82, %107 : vector<64x32xf32>
    %109 = vector.extract_strided_slice %27 {offsets = [0, 24], sizes = [64, 8], strides = [1, 1]} : vector<64x32xf32> to vector<64x8xf32>
    %110 = arith.truncf %109 : vector<64x8xf32> to vector<64x8xbf16>
    %111 = vector.extract_strided_slice %28 {offsets = [0, 24], sizes = [64, 8], strides = [1, 1]} : vector<64x32xf32> to vector<64x8xf32>
    %112 = arith.truncf %111 : vector<64x8xf32> to vector<64x8xbf16>
    %113 = vector.extract_strided_slice %29 {offsets = [0, 24], sizes = [64, 8], strides = [1, 1]} : vector<64x32xf32> to vector<64x8xf32>
    %114 = arith.truncf %113 : vector<64x8xf32> to vector<64x8xbf16>
    %cst_39 = arith.constant dense<0.000000e+00> : vector<64x64xf32>
    %115 = tpu.matmul %110, %112, %cst_39 {dimension_numbers = #tpu.dot_dimension_numbers<[1], [1], [0], [0], [0, 0, 1, 0], [], []>} : vector<64x8xbf16>, vector<64x8xbf16>, vector<64x64xf32> -> vector<64x64xf32>
    %cst_40 = arith.constant 0.353553385 : f32
    %116 = vector.broadcast %cst_40 : f32 to vector<64x64xf32>
    %117 = arith.mulf %115, %116 : vector<64x64xf32>
    %cst_41 = arith.constant dense<0xFF800000> : vector<64xf32>
    %118 = vector.multi_reduction <maximumf>, %117, %cst_41 [1] : vector<64x64xf32> to vector<64xf32>
    %119 = vector.shape_cast %118 : vector<64xf32> to vector<64x1xf32>
    %120 = vector.broadcast %119 : vector<64x1xf32> to vector<64x64xf32>
    %121 = arith.subf %117, %120 : vector<64x64xf32>
    %122 = math.exp %121 : vector<64x64xf32>
    %cst_42 = arith.constant dense<0.000000e+00> : vector<64xf32>
    %123 = vector.multi_reduction <add>, %122, %cst_42 [1] : vector<64x64xf32> to vector<64xf32>
    %124 = vector.shape_cast %123 : vector<64xf32> to vector<64x1xf32>
    %125 = tpu.reciprocal %124 {approx = true} : vector<64x1xf32> -> vector<64x1xf32>
    %126 = vector.broadcast %125 : vector<64x1xf32> to vector<64x64xf32>
    %127 = arith.mulf %122, %126 : vector<64x64xf32>
    %128 = arith.truncf %127 : vector<64x64xf32> to vector<64x64xbf16>
    %cst_43 = arith.constant dense<0.000000e+00> : vector<64x8xf32>
    %129 = tpu.matmul %128, %114, %cst_43 {dimension_numbers = #tpu.dot_dimension_numbers<[1], [0], [0], [1], [0, 0, 1, 1], [], []>} : vector<64x64xbf16>, vector<64x8xbf16>, vector<64x8xf32> -> vector<64x8xf32>
    %130 = arith.truncf %129 : vector<64x8xf32> to vector<64x8xbf16>
    %c3 = arith.constant 3 : index
    %c0_44 = arith.constant 0 : index
    %c0_45 = arith.constant 0 : index
    %131 = vector.load %arg5[%c3, %c0_44, %c0_45] : memref<4x8x32xbf16, #tpu.memory_space<vmem>>, vector<1x8x32xbf16>
    %132 = vector.shape_cast %131 : vector<1x8x32xbf16> to vector<8x32xbf16>
    %cst_46 = arith.constant dense<0.000000e+00> : vector<64x32xf32>
    %133 = tpu.matmul %130, %132, %cst_46 {dimension_numbers = #tpu.dot_dimension_numbers<[1], [0], [0], [1], [0, 0, 1, 1], [], []>} : vector<64x8xbf16>, vector<8x32xbf16>, vector<64x32xf32> -> vector<64x32xf32>
    %134 = arith.addf %108, %133 : vector<64x32xf32>
    %135 = arith.addf %1, %134 : vector<64x32xf32>
    %c0_47 = arith.constant 0 : index
    %c0_48 = arith.constant 0 : index
    %136 = vector.load %arg6[%c0_47, %c0_48] : memref<1x32xf32, #tpu.memory_space<vmem>>, vector<1x32xf32>
    %137 = vector.broadcast %136 : vector<1x32xf32> to vector<64x32xf32>
    %138 = arith.addf %135, %137 : vector<64x32xf32>
    %c0_49 = arith.constant 0 : index
    %c0_50 = arith.constant 0 : index
    %139 = vector.load %arg7[%c0_49, %c0_50] : memref<1x32xf32, #tpu.memory_space<vmem>>, vector<1x32xf32>
    %c0_51 = arith.constant 0 : index
    %c0_52 = arith.constant 0 : index
    %140 = vector.load %arg8[%c0_51, %c0_52] : memref<1x32xf32, #tpu.memory_space<vmem>>, vector<1x32xf32>
    %cst_53 = arith.constant dense<0.000000e+00> : vector<64xf32>
    %141 = vector.multi_reduction <add>, %138, %cst_53 [1] : vector<64x32xf32> to vector<64xf32>
    %142 = vector.shape_cast %141 : vector<64xf32> to vector<64x1xf32>
    %cst_54 = arith.constant 3.200000e+01 : f32
    %143 = vector.broadcast %cst_54 : f32 to vector<64x1xf32>
    %144 = arith.divf %142, %143 : vector<64x1xf32>
    %145 = vector.broadcast %144 : vector<64x1xf32> to vector<64x32xf32>
    %146 = arith.subf %138, %145 : vector<64x32xf32>
    %147 = arith.mulf %146, %146 : vector<64x32xf32>
    %cst_55 = arith.constant dense<0.000000e+00> : vector<64xf32>
    %148 = vector.multi_reduction <add>, %147, %cst_55 [1] : vector<64x32xf32> to vector<64xf32>
    %149 = vector.shape_cast %148 : vector<64xf32> to vector<64x1xf32>
    %cst_56 = arith.constant 3.200000e+01 : f32
    %150 = vector.broadcast %cst_56 : f32 to vector<64x1xf32>
    %151 = arith.divf %149, %150 : vector<64x1xf32>
    %cst_57 = arith.constant 9.99999974E-6 : f32
    %152 = vector.broadcast %cst_57 : f32 to vector<64x1xf32>
    %153 = arith.addf %151, %152 : vector<64x1xf32>
    %154 = math.rsqrt %153 : vector<64x1xf32>
    %155 = vector.broadcast %154 : vector<64x1xf32> to vector<64x32xf32>
    %156 = arith.mulf %146, %155 : vector<64x32xf32>
    %157 = vector.broadcast %139 : vector<1x32xf32> to vector<64x32xf32>
    %158 = arith.mulf %156, %157 : vector<64x32xf32>
    %159 = vector.broadcast %140 : vector<1x32xf32> to vector<64x32xf32>
    %160 = arith.addf %158, %159 : vector<64x32xf32>
    %161 = arith.truncf %160 : vector<64x32xf32> to vector<64x32xbf16>
    %c0_58 = arith.constant 0 : index
    %c0_59 = arith.constant 0 : index
    %162 = vector.load %arg9[%c0_58, %c0_59] : memref<32x128xbf16, #tpu.memory_space<vmem>>, vector<32x128xbf16>
    %cst_60 = arith.constant dense<0.000000e+00> : vector<64x128xf32>
    %163 = tpu.matmul %161, %162, %cst_60 {dimension_numbers = #tpu.dot_dimension_numbers<[1], [0], [0], [1], [0, 0, 1, 1], [], []>} : vector<64x32xbf16>, vector<32x128xbf16>, vector<64x128xf32> -> vector<64x128xf32>
    %c0_61 = arith.constant 0 : index
    %c0_62 = arith.constant 0 : index
    %164 = vector.load %arg10[%c0_61, %c0_62] : memref<1x128xf32, #tpu.memory_space<vmem>>, vector<1x128xf32>
    %165 = vector.broadcast %164 : vector<1x128xf32> to vector<64x128xf32>
    %166 = arith.addf %163, %165 : vector<64x128xf32>
    %c0_i32 = arith.constant 0 : i32
    %167 = arith.cmpi eq, %arg0, %c0_i32 : i32
    %168 = arith.extui %167 : i1 to i32
    %c0_i32_63 = arith.constant 0 : i32
    %169 = arith.cmpi ne, %168, %c0_i32_63 : i32
    scf.if %169 {
      %cst_141 = arith.constant 0.000000e+00 : f32
      %288 = vector.broadcast %cst_141 : f32 to vector<96x128xf32>
      %c0_142 = arith.constant 0 : index
      %c0_143 = arith.constant 0 : index
      %289 = vector.load %arg17[%c0_142, %c0_143] : memref<96x128xf32, #tpu.memory_space<vmem>>, vector<96x128xf32>
      tpu.vector_store %arg17[%c0_142, %c0_143], %288 {strides = array<i32>} : memref<96x128xf32, #tpu.memory_space<vmem>>, vector<96x128xf32>,
    } else {
    }
    %c16 = arith.constant 16 : index
    %c0_64 = arith.constant 0 : index
    %170 = vector.load %arg17[%c16, %c0_64] : memref<96x128xf32, #tpu.memory_space<vmem>>, vector<64x128xf32>
    tpu.vector_store %arg17[%c16, %c0_64], %166 {strides = array<i32>} : memref<96x128xf32, #tpu.memory_space<vmem>>, vector<64x128xf32>,
    %cst_65 = arith.constant 0.000000e+00 : f32
    %171 = vector.broadcast %cst_65 : f32 to vector<64x128xf32>
    %c7 = arith.constant 7 : index
    %c0_66 = arith.constant 0 : index
    %172 = vector.load %arg17[%c7, %c0_66] : memref<96x128xf32, #tpu.memory_space<vmem>>, vector<64x128xf32>
    %c0_67 = arith.constant 0 : index
    %c0_68 = arith.constant 0 : index
    %c0_69 = arith.constant 0 : index
    %173 = vector.load %arg13[%c0_67, %c0_68, %c0_69] : memref<9x64x1xf32, #tpu.memory_space<vmem>>, vector<1x64x1xf32>
    %174 = vector.shape_cast %173 : vector<1x64x1xf32> to vector<64x1xf32>
    %c0_70 = arith.constant 0 : index
    %c0_71 = arith.constant 0 : index
    %c0_72 = arith.constant 0 : index
    %175 = vector.load %arg11[%c0_70, %c0_71, %c0_72] : memref<9x1x128xf32, #tpu.memory_space<vmem>>, vector<1x1x128xf32>
    %176 = vector.shape_cast %175 : vector<1x1x128xf32> to vector<1x128xf32>
    %177 = vector.broadcast %174 : vector<64x1xf32> to vector<64x128xf32>
    %178 = vector.broadcast %176 : vector<1x128xf32> to vector<64x128xf32>
    %179 = arith.mulf %177, %178 : vector<64x128xf32>
    %180 = arith.mulf %172, %179 : vector<64x128xf32>
    %181 = arith.addf %171, %180 : vector<64x128xf32>
    %c8 = arith.constant 8 : index
    %c0_73 = arith.constant 0 : index
    %182 = vector.load %arg17[%c8, %c0_73] : memref<96x128xf32, #tpu.memory_space<vmem>>, vector<64x128xf32>
    %c1_74 = arith.constant 1 : index
    %c0_75 = arith.constant 0 : index
    %c0_76 = arith.constant 0 : index
    %183 = vector.load %arg13[%c1_74, %c0_75, %c0_76] : memref<9x64x1xf32, #tpu.memory_space<vmem>>, vector<1x64x1xf32>
    %184 = vector.shape_cast %183 : vector<1x64x1xf32> to vector<64x1xf32>
    %c1_77 = arith.constant 1 : index
    %c0_78 = arith.constant 0 : index
    %c0_79 = arith.constant 0 : index
    %185 = vector.load %arg11[%c1_77, %c0_78, %c0_79] : memref<9x1x128xf32, #tpu.memory_space<vmem>>, vector<1x1x128xf32>
    %186 = vector.shape_cast %185 : vector<1x1x128xf32> to vector<1x128xf32>
    %187 = vector.broadcast %184 : vector<64x1xf32> to vector<64x128xf32>
    %188 = vector.broadcast %186 : vector<1x128xf32> to vector<64x128xf32>
    %189 = arith.mulf %187, %188 : vector<64x128xf32>
    %190 = arith.mulf %182, %189 : vector<64x128xf32>
    %191 = arith.addf %181, %190 : vector<64x128xf32>
    %c9 = arith.constant 9 : index
    %c0_80 = arith.constant 0 : index
    %192 = vector.load %arg17[%c9, %c0_80] : memref<96x128xf32, #tpu.memory_space<vmem>>, vector<64x128xf32>
    %c2_81 = arith.constant 2 : index
    %c0_82 = arith.constant 0 : index
    %c0_83 = arith.constant 0 : index
    %193 = vector.load %arg13[%c2_81, %c0_82, %c0_83] : memref<9x64x1xf32, #tpu.memory_space<vmem>>, vector<1x64x1xf32>
    %194 = vector.shape_cast %193 : vector<1x64x1xf32> to vector<64x1xf32>
    %c2_84 = arith.constant 2 : index
    %c0_85 = arith.constant 0 : index
    %c0_86 = arith.constant 0 : index
    %195 = vector.load %arg11[%c2_84, %c0_85, %c0_86] : memref<9x1x128xf32, #tpu.memory_space<vmem>>, vector<1x1x128xf32>
    %196 = vector.shape_cast %195 : vector<1x1x128xf32> to vector<1x128xf32>
    %197 = vector.broadcast %194 : vector<64x1xf32> to vector<64x128xf32>
    %198 = vector.broadcast %196 : vector<1x128xf32> to vector<64x128xf32>
    %199 = arith.mulf %197, %198 : vector<64x128xf32>
    %200 = arith.mulf %192, %199 : vector<64x128xf32>
    %201 = arith.addf %191, %200 : vector<64x128xf32>
    %c15 = arith.constant 15 : index
    %c0_87 = arith.constant 0 : index
    %202 = vector.load %arg17[%c15, %c0_87] : memref<96x128xf32, #tpu.memory_space<vmem>>, vector<64x128xf32>
    %c3_88 = arith.constant 3 : index
    %c0_89 = arith.constant 0 : index
    %c0_90 = arith.constant 0 : index
    %203 = vector.load %arg13[%c3_88, %c0_89, %c0_90] : memref<9x64x1xf32, #tpu.memory_space<vmem>>, vector<1x64x1xf32>
    %204 = vector.shape_cast %203 : vector<1x64x1xf32> to vector<64x1xf32>
    %c3_91 = arith.constant 3 : index
    %c0_92 = arith.constant 0 : index
    %c0_93 = arith.constant 0 : index
    %205 = vector.load %arg11[%c3_91, %c0_92, %c0_93] : memref<9x1x128xf32, #tpu.memory_space<vmem>>, vector<1x1x128xf32>
    %206 = vector.shape_cast %205 : vector<1x1x128xf32> to vector<1x128xf32>
    %207 = vector.broadcast %204 : vector<64x1xf32> to vector<64x128xf32>
    %208 = vector.broadcast %206 : vector<1x128xf32> to vector<64x128xf32>
    %209 = arith.mulf %207, %208 : vector<64x128xf32>
    %210 = arith.mulf %202, %209 : vector<64x128xf32>
    %211 = arith.addf %201, %210 : vector<64x128xf32>
    %c16_94 = arith.constant 16 : index
    %c0_95 = arith.constant 0 : index
    %212 = vector.load %arg17[%c16_94, %c0_95] : memref<96x128xf32, #tpu.memory_space<vmem>>, vector<64x128xf32>
    %c4 = arith.constant 4 : index
    %c0_96 = arith.constant 0 : index
    %c0_97 = arith.constant 0 : index
    %213 = vector.load %arg13[%c4, %c0_96, %c0_97] : memref<9x64x1xf32, #tpu.memory_space<vmem>>, vector<1x64x1xf32>
    %214 = vector.shape_cast %213 : vector<1x64x1xf32> to vector<64x1xf32>
    %c4_98 = arith.constant 4 : index
    %c0_99 = arith.constant 0 : index
    %c0_100 = arith.constant 0 : index
    %215 = vector.load %arg11[%c4_98, %c0_99, %c0_100] : memref<9x1x128xf32, #tpu.memory_space<vmem>>, vector<1x1x128xf32>
    %216 = vector.shape_cast %215 : vector<1x1x128xf32> to vector<1x128xf32>
    %217 = vector.broadcast %214 : vector<64x1xf32> to vector<64x128xf32>
    %218 = vector.broadcast %216 : vector<1x128xf32> to vector<64x128xf32>
    %219 = arith.mulf %217, %218 : vector<64x128xf32>
    %220 = arith.mulf %212, %219 : vector<64x128xf32>
    %221 = arith.addf %211, %220 : vector<64x128xf32>
    %c17 = arith.constant 17 : index
    %c0_101 = arith.constant 0 : index
    %222 = vector.load %arg17[%c17, %c0_101] : memref<96x128xf32, #tpu.memory_space<vmem>>, vector<64x128xf32>
    %c5 = arith.constant 5 : index
    %c0_102 = arith.constant 0 : index
    %c0_103 = arith.constant 0 : index
    %223 = vector.load %arg13[%c5, %c0_102, %c0_103] : memref<9x64x1xf32, #tpu.memory_space<vmem>>, vector<1x64x1xf32>
    %224 = vector.shape_cast %223 : vector<1x64x1xf32> to vector<64x1xf32>
    %c5_104 = arith.constant 5 : index
    %c0_105 = arith.constant 0 : index
    %c0_106 = arith.constant 0 : index
    %225 = vector.load %arg11[%c5_104, %c0_105, %c0_106] : memref<9x1x128xf32, #tpu.memory_space<vmem>>, vector<1x1x128xf32>
    %226 = vector.shape_cast %225 : vector<1x1x128xf32> to vector<1x128xf32>
    %227 = vector.broadcast %224 : vector<64x1xf32> to vector<64x128xf32>
    %228 = vector.broadcast %226 : vector<1x128xf32> to vector<64x128xf32>
    %229 = arith.mulf %227, %228 : vector<64x128xf32>
    %230 = arith.mulf %222, %229 : vector<64x128xf32>
    %231 = arith.addf %221, %230 : vector<64x128xf32>
    %c23 = arith.constant 23 : index
    %c0_107 = arith.constant 0 : index
    %232 = vector.load %arg17[%c23, %c0_107] : memref<96x128xf32, #tpu.memory_space<vmem>>, vector<64x128xf32>
    %c6 = arith.constant 6 : index
    %c0_108 = arith.constant 0 : index
    %c0_109 = arith.constant 0 : index
    %233 = vector.load %arg13[%c6, %c0_108, %c0_109] : memref<9x64x1xf32, #tpu.memory_space<vmem>>, vector<1x64x1xf32>
    %234 = vector.shape_cast %233 : vector<1x64x1xf32> to vector<64x1xf32>
    %c6_110 = arith.constant 6 : index
    %c0_111 = arith.constant 0 : index
    %c0_112 = arith.constant 0 : index
    %235 = vector.load %arg11[%c6_110, %c0_111, %c0_112] : memref<9x1x128xf32, #tpu.memory_space<vmem>>, vector<1x1x128xf32>
    %236 = vector.shape_cast %235 : vector<1x1x128xf32> to vector<1x128xf32>
    %237 = vector.broadcast %234 : vector<64x1xf32> to vector<64x128xf32>
    %238 = vector.broadcast %236 : vector<1x128xf32> to vector<64x128xf32>
    %239 = arith.mulf %237, %238 : vector<64x128xf32>
    %240 = arith.mulf %232, %239 : vector<64x128xf32>
    %241 = arith.addf %231, %240 : vector<64x128xf32>
    %c24 = arith.constant 24 : index
    %c0_113 = arith.constant 0 : index
    %242 = vector.load %arg17[%c24, %c0_113] : memref<96x128xf32, #tpu.memory_space<vmem>>, vector<64x128xf32>
    %c7_114 = arith.constant 7 : index
    %c0_115 = arith.constant 0 : index
    %c0_116 = arith.constant 0 : index
    %243 = vector.load %arg13[%c7_114, %c0_115, %c0_116] : memref<9x64x1xf32, #tpu.memory_space<vmem>>, vector<1x64x1xf32>
    %244 = vector.shape_cast %243 : vector<1x64x1xf32> to vector<64x1xf32>
    %c7_117 = arith.constant 7 : index
    %c0_118 = arith.constant 0 : index
    %c0_119 = arith.constant 0 : index
    %245 = vector.load %arg11[%c7_117, %c0_118, %c0_119] : memref<9x1x128xf32, #tpu.memory_space<vmem>>, vector<1x1x128xf32>
    %246 = vector.shape_cast %245 : vector<1x1x128xf32> to vector<1x128xf32>
    %247 = vector.broadcast %244 : vector<64x1xf32> to vector<64x128xf32>
    %248 = vector.broadcast %246 : vector<1x128xf32> to vector<64x128xf32>
    %249 = arith.mulf %247, %248 : vector<64x128xf32>
    %250 = arith.mulf %242, %249 : vector<64x128xf32>
    %251 = arith.addf %241, %250 : vector<64x128xf32>
    %c25 = arith.constant 25 : index
    %c0_120 = arith.constant 0 : index
    %252 = vector.load %arg17[%c25, %c0_120] : memref<96x128xf32, #tpu.memory_space<vmem>>, vector<64x128xf32>
    %c8_121 = arith.constant 8 : index
    %c0_122 = arith.constant 0 : index
    %c0_123 = arith.constant 0 : index
    %253 = vector.load %arg13[%c8_121, %c0_122, %c0_123] : memref<9x64x1xf32, #tpu.memory_space<vmem>>, vector<1x64x1xf32>
    %254 = vector.shape_cast %253 : vector<1x64x1xf32> to vector<64x1xf32>
    %c8_124 = arith.constant 8 : index
    %c0_125 = arith.constant 0 : index
    %c0_126 = arith.constant 0 : index
    %255 = vector.load %arg11[%c8_124, %c0_125, %c0_126] : memref<9x1x128xf32, #tpu.memory_space<vmem>>, vector<1x1x128xf32>
    %256 = vector.shape_cast %255 : vector<1x1x128xf32> to vector<1x128xf32>
    %257 = vector.broadcast %254 : vector<64x1xf32> to vector<64x128xf32>
    %258 = vector.broadcast %256 : vector<1x128xf32> to vector<64x128xf32>
    %259 = arith.mulf %257, %258 : vector<64x128xf32>
    %260 = arith.mulf %252, %259 : vector<64x128xf32>
    %261 = arith.addf %251, %260 : vector<64x128xf32>
    %c0_127 = arith.constant 0 : index
    %c0_128 = arith.constant 0 : index
    %262 = vector.load %arg12[%c0_127, %c0_128] : memref<1x128xf32, #tpu.memory_space<vmem>>, vector<1x128xf32>
    %263 = vector.broadcast %262 : vector<1x128xf32> to vector<64x128xf32>
    %264 = arith.addf %261, %263 : vector<64x128xf32>
    %cst_129 = arith.constant 5.000000e-01 : f32
    %265 = vector.broadcast %cst_129 : f32 to vector<64x128xf32>
    %266 = arith.mulf %265, %264 : vector<64x128xf32>
    %cst_130 = arith.constant 4.471500e-02 : f32
    %267 = vector.broadcast %cst_130 : f32 to vector<64x128xf32>
    %268 = arith.mulf %267, %264 : vector<64x128xf32>
    %269 = arith.mulf %268, %264 : vector<64x128xf32>
    %270 = arith.mulf %269, %264 : vector<64x128xf32>
    %271 = arith.addf %264, %270 : vector<64x128xf32>
    %cst_131 = arith.constant 0.797884583 : f32
    %272 = vector.broadcast %cst_131 : f32 to vector<64x128xf32>
    %273 = arith.mulf %272, %271 : vector<64x128xf32>
    %274 = math.tanh %273 : vector<64x128xf32>
    %cst_132 = arith.constant 1.000000e+00 : f32
    %275 = vector.broadcast %cst_132 : f32 to vector<64x128xf32>
    %276 = arith.addf %275, %274 : vector<64x128xf32>
    %277 = arith.mulf %266, %276 : vector<64x128xf32>
    %278 = arith.truncf %277 : vector<64x128xf32> to vector<64x128xbf16>
    %c0_133 = arith.constant 0 : index
    %c0_134 = arith.constant 0 : index
    %279 = vector.load %arg14[%c0_133, %c0_134] : memref<128x32xbf16, #tpu.memory_space<vmem>>, vector<128x32xbf16>
    %cst_135 = arith.constant dense<0.000000e+00> : vector<64x32xf32>
    %280 = tpu.matmul %278, %279, %cst_135 {dimension_numbers = #tpu.dot_dimension_numbers<[1], [0], [0], [1], [0, 0, 1, 1], [], []>} : vector<64x128xbf16>, vector<128x32xbf16>, vector<64x32xf32> -> vector<64x32xf32>
    %c0_136 = arith.constant 0 : index
    %c0_137 = arith.constant 0 : index
    %281 = vector.load %arg15[%c0_136, %c0_137] : memref<1x32xf32, #tpu.memory_space<vmem>>, vector<1x32xf32>
    %282 = vector.broadcast %281 : vector<1x32xf32> to vector<64x32xf32>
    %283 = arith.addf %280, %282 : vector<64x32xf32>
    %284 = arith.addf %138, %283 : vector<64x32xf32>
    %c0_138 = arith.constant 0 : index
    %c0_139 = arith.constant 0 : index
    %c0_140 = arith.constant 0 : index
    %285 = vector.load %arg16[%c0_138, %c0_139, %c0_140] : memref<1x64x32xf32, #tpu.memory_space<vmem>>, vector<1x64x32xf32>
    %286 = vector.shape_cast %285 : vector<1x64x32xf32> to vector<64x32xf32>
    %287 = vector.shape_cast %284 : vector<64x32xf32> to vector<1x64x32xf32>
    tpu.vector_store %arg16[%c0_138, %c0_139, %c0_140], %287 {strides = array<i32>} : memref<1x64x32xf32, #tpu.memory_space<vmem>>, vector<1x64x32xf32>,
    return
  }
  func.func @transform_0(%arg0: i32) -> (i32, i32, i32) {
    %c0_i32 = arith.constant 0 : i32
    %c0_i32_0 = arith.constant 0 : i32
    %c0_i32_1 = arith.constant 0 : i32
    return %arg0, %c0_i32, %c0_i32_0 : i32, i32, i32
  }
  func.func @transform_1(%arg0: i32) -> (i32, i32) {
    %c0_i32 = arith.constant 0 : i32
    %c0_i32_0 = arith.constant 0 : i32
    %c0_i32_1 = arith.constant 0 : i32
    return %c0_i32, %c0_i32_0 : i32, i32
  }
  func.func @transform_2(%arg0: i32) -> (i32, i32) {
    %c0_i32 = arith.constant 0 : i32
    %c0_i32_0 = arith.constant 0 : i32
    %c0_i32_1 = arith.constant 0 : i32
    return %c0_i32, %c0_i32_0 : i32, i32
  }
  func.func @transform_3(%arg0: i32) -> (i32, i32) {
    %c0_i32 = arith.constant 0 : i32
    %c0_i32_0 = arith.constant 0 : i32
    %c0_i32_1 = arith.constant 0 : i32
    return %c0_i32, %c0_i32_0 : i32, i32
  }
  func.func @transform_4(%arg0: i32) -> (i32, i32, i32) {
    %c0_i32 = arith.constant 0 : i32
    %c0_i32_0 = arith.constant 0 : i32
    %c0_i32_1 = arith.constant 0 : i32
    %c0_i32_2 = arith.constant 0 : i32
    return %c0_i32, %c0_i32_0, %c0_i32_1 : i32, i32, i32
  }
  func.func @transform_5(%arg0: i32) -> (i32, i32) {
    %c0_i32 = arith.constant 0 : i32
    %c0_i32_0 = arith.constant 0 : i32
    %c0_i32_1 = arith.constant 0 : i32
    return %c0_i32, %c0_i32_0 : i32, i32
  }
  func.func @transform_6(%arg0: i32) -> (i32, i32) {
    %c0_i32 = arith.constant 0 : i32
    %c0_i32_0 = arith.constant 0 : i32
    %c0_i32_1 = arith.constant 0 : i32
    return %c0_i32, %c0_i32_0 : i32, i32
  }
  func.func @transform_7(%arg0: i32) -> (i32, i32) {
    %c0_i32 = arith.constant 0 : i32
    %c0_i32_0 = arith.constant 0 : i32
    %c0_i32_1 = arith.constant 0 : i32
    return %c0_i32, %c0_i32_0 : i32, i32
  }
  func.func @transform_8(%arg0: i32) -> (i32, i32) {
    %c0_i32 = arith.constant 0 : i32
    %c0_i32_0 = arith.constant 0 : i32
    %c0_i32_1 = arith.constant 0 : i32
    return %c0_i32, %c0_i32_0 : i32, i32
  }
  func.func @transform_9(%arg0: i32) -> (i32, i32) {
    %c0_i32 = arith.constant 0 : i32
    %c0_i32_0 = arith.constant 0 : i32
    %c0_i32_1 = arith.constant 0 : i32
    return %c0_i32, %c0_i32_0 : i32, i32
  }
  func.func @transform_10(%arg0: i32) -> (i32, i32, i32) {
    %c0_i32 = arith.constant 0 : i32
    %c0_i32_0 = arith.constant 0 : i32
    %c0_i32_1 = arith.constant 0 : i32
    %c0_i32_2 = arith.constant 0 : i32
    return %c0_i32, %c0_i32_0, %c0_i32_1 : i32, i32, i32
  }
  func.func @transform_11(%arg0: i32) -> (i32, i32) {
    %c0_i32 = arith.constant 0 : i32
    %c0_i32_0 = arith.constant 0 : i32
    %c0_i32_1 = arith.constant 0 : i32
    return %c0_i32, %c0_i32_0 : i32, i32
  }
  func.func @transform_12(%arg0: i32) -> (i32, i32, i32) {
    %c0_i32 = arith.constant 0 : i32
    %c0_i32_0 = arith.constant 0 : i32
    %c0_i32_1 = arith.constant 0 : i32
    %c0_i32_2 = arith.constant 0 : i32
    return %c0_i32, %c0_i32_0, %c0_i32_1 : i32, i32, i32
  }
  func.func @transform_13(%arg0: i32) -> (i32, i32) {
    %c0_i32 = arith.constant 0 : i32
    %c0_i32_0 = arith.constant 0 : i32
    %c0_i32_1 = arith.constant 0 : i32
    return %c0_i32, %c0_i32_0 : i32, i32
  }
  func.func @transform_14(%arg0: i32) -> (i32, i32) {
    %c0_i32 = arith.constant 0 : i32
    %c0_i32_0 = arith.constant 0 : i32
    %c0_i32_1 = arith.constant 0 : i32
    return %c0_i32, %c0_i32_0 : i32, i32
  }
  func.func @transform_15(%arg0: i32) -> (i32, i32, i32) {
    %c0_i32 = arith.constant 0 : i32
    %c0_i32_0 = arith.constant 0 : i32
    %c0_i32_1 = arith.constant 0 : i32
    return %arg0, %c0_i32, %c0_i32_0 : i32, i32, i32
  }
}

</mosaic_0001>

<bundles_post_ra>
// kernel: tpu_custom_call.1
= control target key start
LH: loop header
LB: loop body
LE: loop exit
PB: predicated region body
PF: predicated region fallthrough
CT: control target
= control target key end

     0   :  { %s4496_s18 = smov 0   ;;  %s5741_s0 = inlined_call_operand.vmem [shape: f32[2,64,32], index: 0, kind: input, shape index: {}]   ;;  %s5742_s1 = inlined_call_operand.vmem [shape: f32[1,32], index: 1, kind: input, shape index: {}]   ;;  %s5743_s2 = inlined_call_operand.vmem [shape: f32[1,32], index: 2, kind: input, shape index: {}]   ;;  %s5744_s3 = inlined_call_operand.vmem [shape: bf16[32,96], index: 3, kind: input, shape index: {}]   ;;  %s5745_s4 = inlined_call_operand.vmem [shape: bf16[4,8,32], index: 4, kind: input, shape index: {}]   ;;  %s5746_s5 = inlined_call_operand.vmem [shape: f32[1,32], index: 5, kind: input, shape index: {}]   ;;  %s5747_s6 = inlined_call_operand.vmem [shape: f32[1,32], index: 6, kind: input, shape index: {}]   ;;  %s5748_s7 = inlined_call_operand.vmem [shape: f32[1,32], index: 7, kind: input, shape index: {}]   ;;  %s5749_s8 = inlined_call_operand.vmem [shape: bf16[32,128], index: 8, kind: input, shape index: {}]   ;;  %s5750_s9 = inlined_call_operand.vmem [shape: f32[1,128], index: 9, kind: input, shape index: {}]   ;;  %s5751_s10 = inlined_call_operand.vmem [shape: f32[9,1,128], index: 10, kind: input, shape index: {}]   ;;  %s5752_s11 = inlined_call_operand.vmem [shape: f32[1,128], index: 11, kind: input, shape index: {}]   ;;  %s5753_s12 = inlined_call_operand.vmem [shape: f32[9,64,1], index: 12, kind: input, shape index: {}]   ;;  %s5754_s13 = inlined_call_operand.vmem [shape: bf16[128,32], index: 13, kind: input, shape index: {}]   ;;  %s5755_s14 = inlined_call_operand.vmem [shape: f32[1,32], index: 14, kind: input, shape index: {}]   ;;  %s5756_s15 = inlined_call_operand.vmem [shape: f32[2,64,32], index: 15, kind: output, shape index: {}]  }
   0x1 LB: > { %s4502_s19 = sadd.s32 4294967295, %s4401_s18   ;;  %p3661_p0 = scmp.ge.s32.totalorder %s4401_s18, 1  ;;  %s4401_s18 = sphi %s4496_s18, %s25_s18  }
   0x2   : > { %p437_p1 = scmp.lt.s32.totalorder %s4401_s18, 3 }
   0x4   : > { %p438_p2 = pnand %p3661_p0, %p437_p1 }
   0x6   : > { %441 = sbr.rel (%p438_p2) target bundleno = 4298 (0x10ca), region = 80 }
   0xb   : > { %p485_p3 = scmp.lt.s32.totalorder %s4502_s19, 1  ;;  %vm506_vm0 = vcmask 261120   ;;  %v4196_v56 = vld [vmem:[%s5744_s3 + $0x8] sm:$0xff]   ;;  %v4197_v57 = vld [vmem:[%s5744_s3] sm:$0xff]   ;;  %vm753_vm1 = vcmask 64512   ;;  %s4403_s23 = smov 96  }
   0xc   : > { %3939 = vmatprep.subr.bf16.mxu1 %v4196_v56  ;;  %vm851_vm2 = vcmask 523264   ;;  %s4404_s25 = smov 64   ;;  %s4405_s26 = smov 88   ;;  %vm1350_vm3 = vcmask 1043456  }
   0xd   : > { %s486_s20 = scalar_select %p485_p3, %s4502_s19, 1  ;;  %3940 = vmatpush3.bf16.msra.mxu1 %v4196_v56 }
   0xe   : > { %3941 = vmatprep.subr.bf16.mxu1 %v4197_v57  ;;  %s4406_s28 = smov 120   ;;  %s4407_s16 = smov 56  }
   0xf   : > { %s3829_s21 = sshll.u32 %s486_s20, 6  ;;  %s4408_s17 = smov 80  }
  0x10   : > { %s4511_s24 = scalar_lea.vmem %s5741_s0, %s3829_s21  ;;  %s4516_s27 = scalar_lea.vmem %s5756_s15, %s3829_s21 }
  0x11   : > { %v496_v0 = vld [vmem:[%s4511_s24] sm:$0xff]  ;;  %v498_v1 = vld [vmem:[%s4511_s24 + $0x10] sm:$0xff]  ;;  %v497_v2 = vld [vmem:[%s4511_s24 + $0x8] sm:$0xff]  ;;  %3942 = vmatpush3.bf16.msra.mxu1 %v4197_v57  ;;  %s4409_s20 = smov 112   ;;  %s4410_s21 = smov 72  }
  0x12   : > { %v507_v3 = vsel %vm506_vm0, %v496_v0, 0.0  ;;  %v513_v4 = vsel %vm506_vm0, %v498_v1, 0.0  ;;  %v499_v5 = vld [vmem:[%s4511_s24 + $0x18] sm:$0xff]  ;;  %v510_v6 = vsel %vm506_vm0, %v497_v2, 0.0  ;;  %v500_v8 = vld [vmem:[%s4511_s24 + $0x20] sm:$0xff]  ;;  %v501_v9 = vld [vmem:[%s4511_s24 + $0x28] sm:$0xff] }
  0x13   : > { %508 = vadd.xlane.f32.xlu0 %v507_v3  ;;  %514 = vadd.xlane.f32.xlu1 %v513_v4  ;;  %v516_v7 = vsel %vm506_vm0, %v499_v5, 0.0  ;;  %v519_v10 = vsel %vm506_vm0, %v500_v8, 0.0  ;;  %v522_v11 = vsel %vm506_vm0, %v501_v9, 0.0  ;;  %v502_v12 = vld [vmem:[%s4511_s24 + $0x30] sm:$0xff]  ;;  %v503_v13 = vld [vmem:[%s4511_s24 + $0x38] sm:$0xff]  ;;  %s4411_s22 = smov 104  }
  0x14   : > { %v525_v14 = vsel %vm506_vm0, %v502_v12, 0.0  ;;  %v528_v15 = vsel %vm506_vm0, %v503_v13, 0.0  ;;  %s4413_s30 = smov 40   ;;  %p3735_p4 = scmp.ne.s32.totalorder %s4502_s19, 0 }
  0x17   : > { %511 = vadd.xlane.f32.xlu0 %v510_v6  ;;  %517 = vadd.xlane.f32.xlu1 %v516_v7 }
  0x1b   : > { %520 = vadd.xlane.f32.xlu0 %v519_v10  ;;  %523 = vadd.xlane.f32.xlu1 %v522_v11 }
  0x1f   : > { %526 = vadd.xlane.f32.xlu0 %v525_v14  ;;  %529 = vadd.xlane.f32.xlu1 %v528_v15 }
  0x9c   : > { %v509_v16 = vpop.xlane.xlu0 %508  ;;  %v515_v17 = vpop.xlane.xlu1 %514 }
  0x9d   : > { %v532_v18 = vmul.f32 0.03125, %v509_v16  ;;  %v534_v19 = vmul.f32 0.03125, %v515_v17 }
  0x9f   : > { %v4534_v20 = vsub.f32 %v496_v0, %v532_v18  ;;  %v4536_v21 = vsub.f32 %v498_v1, %v534_v19 }
  0xa0   : > { %v512_v22 = vpop.xlane.xlu0 %511  ;;  %v518_v23 = vpop.xlane.xlu1 %517 }
  0xa1   : > { %v533_v24 = vmul.f32 0.03125, %v512_v22  ;;  %v535_v25 = vmul.f32 0.03125, %v518_v23  ;;  %v548_v26 = vmul.f32 %v4534_v20, %v4534_v20  ;;  %v550_v27 = vmul.f32 %v4536_v21, %v4536_v21  ;;  %v3666_v22 = vld [vmem:[%s5742_s1] ss:$0 sm:$0xff] }
  0xa3   : > { %v4542_v28 = vsub.f32 %v497_v2, %v533_v24  ;;  %v4544_v29 = vsub.f32 %v499_v5, %v535_v25  ;;  %v556_v30 = vsel %vm506_vm0, %v548_v26, 0.0  ;;  %v562_v33 = vsel %vm506_vm0, %v550_v27, 0.0  ;;  %v3667_v27 = vld [vmem:[%s5743_s2] ss:$0 sm:$0xff] }
  0xa4   : > { %557 = vadd.xlane.f32.xlu0 %v556_v30  ;;  %v521_v31 = vpop.xlane.xlu0 %520  ;;  %v524_v32 = vpop.xlane.xlu1 %523 }
  0xa5   : > { %v536_v34 = vmul.f32 0.03125, %v521_v31  ;;  %v537_v35 = vmul.f32 0.03125, %v524_v32  ;;  %v549_v36 = vmul.f32 %v4542_v28, %v4542_v28  ;;  %v551_v37 = vmul.f32 %v4544_v29, %v4544_v29 }
  0xa7   : > { %v4552_v38 = vsub.f32 %v500_v8, %v536_v34  ;;  %v4554_v39 = vsub.f32 %v501_v9, %v537_v35  ;;  %v559_v40 = vsel %vm506_vm0, %v549_v36, 0.0  ;;  %v565_v43 = vsel %vm506_vm0, %v551_v37, 0.0 }
  0xa8   : > { %563 = vadd.xlane.f32.xlu0 %v562_v33  ;;  %560 = vadd.xlane.f32.xlu1 %v559_v40  ;;  %v527_v41 = vpop.xlane.xlu0 %526  ;;  %v530_v42 = vpop.xlane.xlu1 %529 }
  0xa9   : > { %v538_v44 = vmul.f32 0.03125, %v527_v41  ;;  %v539_v45 = vmul.f32 0.03125, %v530_v42  ;;  %v552_v46 = vmul.f32 %v4552_v38, %v4552_v38  ;;  %v553_v47 = vmul.f32 %v4554_v39, %v4554_v39 }
  0xab   : > { %v4562_v48 = vsub.f32 %v502_v12, %v538_v44  ;;  %v4564_v49 = vsub.f32 %v503_v13, %v539_v45  ;;  %v568_v50 = vsel %vm506_vm0, %v552_v46, 0.0  ;;  %v571_v51 = vsel %vm506_vm0, %v553_v47, 0.0 }
  0xac   : > { %566 = vadd.xlane.f32.xlu1 %v565_v43  ;;  %569 = vadd.xlane.f32.xlu0 %v568_v50 }
  0xad   : > { %v554_v52 = vmul.f32 %v4562_v48, %v4562_v48  ;;  %v555_v53 = vmul.f32 %v4564_v49, %v4564_v49 }
  0xaf   : > { %v574_v54 = vsel %vm506_vm0, %v554_v52, 0.0  ;;  %v577_v55 = vsel %vm506_vm0, %v555_v53, 0.0 }
  0xb0   : > { %572 = vadd.xlane.f32.xlu1 %v571_v51  ;;  %575 = vadd.xlane.f32.xlu0 %v574_v54 }
  0xb4   : > { %578 = vadd.xlane.f32.xlu1 %v577_v55 }
 0x12d   : > { %v558_v58 = vpop.xlane.xlu0 %557 }
 0x12e   : > { %v580_v59 = vmul.f32 0.03125, %v558_v58 }
 0x130   : > { %v588_v60 = vadd.f32 1e-05, %v580_v59 }
 0x131   : > { %v561_v61 = vpop.xlane.xlu1 %560  ;;  %v564_v62 = vpop.xlane.xlu0 %563 }
 0x132   : > { %4200 = vrsqrt.f32 %v588_v60  ;;  %v581_v63 = vmul.f32 0.03125, %v561_v61  ;;  %v582_v0 = vmul.f32 0.03125, %v564_v62 }
 0x134   : > { %v589_v1 = vadd.f32 1e-05, %v581_v63  ;;  %v590_v2 = vadd.f32 1e-05, %v582_v0 }
 0x135   : > { %v567_v3 = vpop.xlane.xlu1 %566  ;;  %v570_v4 = vpop.xlane.xlu0 %569 }
 0x136   : > { %4202 = vrsqrt.f32 %v589_v1  ;;  %v583_v5 = vmul.f32 0.03125, %v567_v3  ;;  %v584_v6 = vmul.f32 0.03125, %v570_v4 }
 0x137   : > { %4204 = vrsqrt.f32 %v590_v2 }
 0x138   : > { %v591_v7 = vadd.f32 1e-05, %v583_v5  ;;  %v592_v8 = vadd.f32 1e-05, %v584_v6 }
 0x139   : > { %v573_v9 = vpop.xlane.xlu1 %572  ;;  %v576_v10 = vpop.xlane.xlu0 %575 }
 0x13a   : > { %4206 = vrsqrt.f32 %v591_v7  ;;  %v585_v11 = vmul.f32 0.03125, %v573_v9  ;;  %v586_v12 = vmul.f32 0.03125, %v576_v10 }
 0x13b   : > { %4208 = vrsqrt.f32 %v592_v8 }
 0x13c   : > { %v593_v13 = vadd.f32 1e-05, %v585_v11  ;;  %v594_v14 = vadd.f32 1e-05, %v586_v12 }
 0x13d   : > { %v579_v15 = vpop.xlane.xlu1 %578 }
 0x13e   : > { %4210 = vrsqrt.f32 %v593_v13  ;;  %v587_v16 = vmul.f32 0.03125, %v579_v15 }
 0x13f   : > { %v4201_v17 = vpop.eup %4200  ;;  %4212 = vrsqrt.f32 %v594_v14 }
 0x140   : > { %v595_v18 = vadd.f32 1e-05, %v587_v16  ;;  %v604_v19 = vmul.f32 %v4201_v17, %v4534_v20 }
 0x142   : > { %4214 = vrsqrt.f32 %v595_v18  ;;  %v618_v26 = vmul.f32 %v3666_v22, %v604_v19 }
 0x143   : > { %v4203_v23 = vpop.eup %4202 }
 0x144   : > { %v4205_v24 = vpop.eup %4204  ;;  %v605_v25 = vmul.f32 %v4203_v23, %v4542_v28  ;;  %v632_v20 = vadd.f32 %v3667_v27, %v618_v26 }
 0x145   : > { %v606_v30 = vmul.f32 %v4205_v24, %v4536_v21 }
 0x146   : > { %v619_v31 = vmul.f32 %v3666_v22, %v605_v25 }
 0x147   : > { %v4207_v32 = vpop.eup %4206  ;;  %v620_v36 = vmul.f32 %v3666_v22, %v606_v30 }
 0x148   : > { %v4209_v33 = vpop.eup %4208  ;;  %v633_v34 = vadd.f32 %v3667_v27, %v619_v31  ;;  %v607_v35 = vmul.f32 %v4207_v32, %v4544_v29 }
 0x149   : > { %v608_v37 = vmul.f32 %v4209_v33, %v4552_v38  ;;  %v634_v43 = vadd.f32 %v3667_v27, %v620_v36 }
 0x14a   : > { %v640_v40 = vpack.c.bf16 %v633_v34, %v632_v20  ;;  %v621_v41 = vmul.f32 %v3666_v22, %v607_v35 }
 0x14b   : > { %v4211_v28 = vpop.eup %4210  ;;  %v622_v45 = vmul.f32 %v3666_v22, %v608_v37 }
 0x14c   : > { %v4213_v42 = vpop.eup %4212  ;;  %3943 = vmatprep.mubr.msk.bf16.mxu1 %vm506_vm0, %v640_v40  ;;  %v635_v44 = vadd.f32 %v3667_v27, %v621_v41  ;;  %v609_v21 = vmul.f32 %v4211_v28, %v4554_v39 }
 0x14d   : > { %v610_v46 = vmul.f32 %v4213_v42, %v4562_v48  ;;  %v636_v29 = vadd.f32 %v3667_v27, %v622_v45 }
 0x14e   : > { %v641_v47 = vpack.c.bf16 %v635_v44, %v634_v43  ;;  %v623_v50 = vmul.f32 %v3666_v22, %v609_v21 }
 0x14f   : > { %v4215_v51 = vpop.eup %4214  ;;  %v624_v53 = vmul.f32 %v3666_v22, %v610_v46 }
 0x150   : > { %3944 = vmatmul.mubr.msk.bf16.vlgmr.msra.gmra.mxu1 %vm506_vm0, %v641_v47  ;;  %v637_v38 = vadd.f32 %v3667_v27, %v623_v50  ;;  %v611_v52 = vmul.f32 %v4215_v51, %v4564_v49 }
 0x151   : > { %v638_v56 = vadd.f32 %v3667_v27, %v624_v53 }
 0x152   : > { %v642_v54 = vpack.c.bf16 %v637_v38, %v636_v29  ;;  %v625_v55 = vmul.f32 %v3666_v22, %v611_v52 }
 0x154   : > { %3947 = vmatprep.mubr.msk.bf16.mxu1 %vm506_vm0, %v642_v54  ;;  %v639_v57 = vadd.f32 %v3667_v27, %v625_v55 }
 0x156   : > { %v643_v39 = vpack.c.bf16 %v639_v57, %v638_v56 }
 0x158   : > { %3948 = vmatmul.mubr.msk.bf16.gmra.mxu1 %vm506_vm0, %v643_v39 }
 0x210   : > { %v3945_v48 = vpop.f32.mrf.mxu1 }
 0x212   : > { %v706_v58 = vpop.f32.mrf.mxu1 }
 0x214   : > { %v3946_v59 = vpop.f32.mrf.mxu1 }
 0x215   : > { %v4608_v3 = vpack.c.bf16 %v3946_v59, %v3945_v48 }
 0x216   : > { %v709_v60 = vpop.f32.mrf.mxu1 }
 0x217   : > { %v4598_v61 = vpack.c.bf16 %v709_v60, %v706_v58 }
 0x218   : > { %v3949_v62 = vpop.f32.mrf.mxu1 }
 0x219   : > { %3959 = vmatprep.mubr.msk.bf16.mxu1 %vm753_vm1, %v4598_v61 }
 0x21a   : > { %v722_v49 = vpop.f32.mrf.mxu1 }
 0x21c   : > { %v3950_v63 = vpop.f32.mrf.mxu1 }
 0x21d   : > { %v4602_v0 = vpack.c.bf16 %v3950_v63, %v3949_v62 }
 0x21e   : > { %v725_v1 = vpop.f32.mrf.mxu1 }
 0x21f   : > { %v4604_v2 = vpack.c.bf16 %v725_v1, %v722_v49  ;;  %751 = vrot.lane.b32.xlu0 %v4602_v0, %s4403_s23 }
 0x221   : > { %749 = vrot.lane.b32.xlu1 %v4604_v2, %s4403_s23 }
 0x225   : > { %747 = vrot.lane.b32.xlu1 %v4608_v3, %s4403_s23 }
 0x229   : > { %745 = vrot.lane.b32.xlu1 %v4598_v61, %s4403_s23 }
 0x291   : > { %v752_v4 = vpop.permute.xlu0 %751 }
 0x292   : > { %4155 = vmatprep.subr.msk.bf16.mxu1 %vm753_vm1, %v752_v4  ;;  %v776_v5 = vsel %vm753_vm1, %v752_v4, 0 }
 0x293   : > { %3952 = vmatpush3.bf16.xpose.msra.mxu1 %v776_v5  ;;  %v750_v6 = vpop.permute.xlu1 %749 }
 0x294   : > { %4156 = vmatprep.subr.msk.bf16.mxu1 %vm753_vm1, %v750_v6  ;;  %v773_v7 = vsel %vm753_vm1, %v750_v6, 0 }
 0x297   : > { %v748_v8 = vpop.permute.xlu1 %747 }
 0x298   : > { %v770_v9 = vsel %vm753_vm1, %v748_v8, 0 }
 0x29b   : > { %3954 = vmatpush3.bf16.xpose.msra.mxu1 %v773_v7  ;;  %v746_v10 = vpop.permute.xlu1 %745 }
 0x29c   : > { %4157 = vmatprep.subr.msk.bf16.mxu1 %vm753_vm1, %v748_v8  ;;  %v767_v11 = vsel %vm753_vm1, %v746_v10, 0 }
 0x2a3   : > { %3956 = vmatpush3.bf16.xpose.msra.mxu1 %v770_v9 }
 0x2a4   : > { %4158 = vmatprep.subr.msk.bf16.mxu1 %vm753_vm1, %v746_v10 }
 0x2ab   : > { %3958 = vmatpush3.bf16.xpose.msra.mxu1 %v767_v11 }
 0x2b2   : > { %3960 = vmatmul.mubr.msk.bf16.vlgmr.msra.gmra.mxu1 %vm753_vm1, %v4608_v3 }
 0x2b3   : > { %3963 = vmatprep.mubr.msk.bf16.mxu1 %vm753_vm1, %v4604_v2 }
 0x2ba   : > { %3964 = vmatmul.mubr.msk.bf16.gmra.mxu1 %vm753_vm1, %v4602_v0 }
 0x372   : > { %v3961_v12 = vpop.f32.mrf.mxu1 }
 0x373   : > { %v845_v16 = vmul.f32 0.35355338, %v3961_v12 }
 0x374   : > { %v812_v13 = vpop.f32.mrf.mxu1 }
 0x375   : > { %v843_v14 = vmul.f32 0.35355338, %v812_v13  ;;  %v858_v24 = vsel %vm851_vm2, %v845_v16, -inf }
 0x376   : > { %v3962_v15 = vpop.f32.mrf.mxu1 }
 0x377   : > { %v852_v17 = vsel %vm851_vm2, %v843_v14, -inf  ;;  %v846_v23 = vmul.f32 0.35355338, %v3962_v15 }
 0x378   : > { %853 = vmax.xlane.f32.xlu0 %v852_v17  ;;  %v815_v18 = vpop.f32.mrf.mxu1 }
 0x379   : > { %v844_v19 = vmul.f32 0.35355338, %v815_v18  ;;  %v861_v32 = vsel %vm851_vm2, %v846_v23, -inf }
 0x37a   : > { %v3965_v22 = vpop.f32.mrf.mxu1 }
 0x37b   : > { %v855_v25 = vsel %vm851_vm2, %v844_v19, -inf  ;;  %v849_v30 = vmul.f32 0.35355338, %v3965_v22 }
 0x37c   : > { %859 = vmax.xlane.f32.xlu0 %v858_v24  ;;  %856 = vmax.xlane.f32.xlu1 %v855_v25  ;;  %v828_v26 = vpop.f32.mrf.mxu1 }
 0x37d   : > { %v847_v35 = vmul.f32 0.35355338, %v828_v26  ;;  %v870_v36 = vsel %vm851_vm2, %v849_v30, -inf }
 0x37e   : > { %v3966_v27 = vpop.f32.mrf.mxu1 }
 0x37f   : > { %v850_v31 = vmul.f32 0.35355338, %v3966_v27  ;;  %v864_v40 = vsel %vm851_vm2, %v847_v35, -inf }
 0x380   : > { %862 = vmax.xlane.f32.xlu0 %v861_v32  ;;  %v831_v33 = vpop.f32.mrf.mxu1 }
 0x381   : > { %v848_v20 = vmul.f32 0.35355338, %v831_v33  ;;  %v873_v34 = vsel %vm851_vm2, %v850_v31, -inf }
 0x382   : > { %874 = vmax.xlane.f32.xlu1 %v873_v34 }
 0x383   : > { %v867_v37 = vsel %vm851_vm2, %v848_v20, -inf }
 0x384   : > { %871 = vmax.xlane.f32.xlu0 %v870_v36 }
 0x386   : > { %868 = vmax.xlane.f32.xlu1 %v867_v37 }
 0x388   : > { %865 = vmax.xlane.f32.xlu0 %v864_v40 }
 0x397   : > { %948 = vrot.lane.b32.xlu1 %v4604_v2, %s4404_s25 }
 0x39b   : > { %946 = vrot.lane.b32.xlu1 %v4608_v3, %s4404_s25 }
 0x39e   : > { %950 = vrot.lane.b32.xlu0 %v4602_v0, %s4404_s25 }
 0x39f   : > { %944 = vrot.lane.b32.xlu1 %v4598_v61, %s4404_s25 }
 0x401   : > { %v854_v41 = vpop.xlane.xlu0 %853 }
 0x402   : > { %v876_v28 = vsub.f32 %v843_v14, %v854_v41 }
 0x404   : > { %v884_v21 = vmul.f32 1.442695, %v876_v28 }
 0x405   : > { %v860_v42 = vpop.xlane.xlu0 %859  ;;  %v857_v43 = vpop.xlane.xlu1 %856 }
 0x406   : > { %v878_v44 = vsub.f32 %v845_v16, %v860_v42  ;;  %v877_v46 = vsub.f32 %v844_v19, %v857_v43 }
 0x408   : > { %v888_v45 = vmul.f32 1.442695, %v878_v44  ;;  %v886_v29 = vmul.f32 1.442695, %v877_v46 }
 0x409   : > { %v863_v47 = vpop.xlane.xlu0 %862 }
 0x40a   : > { %4216 = vpow2.f32 %v888_v45  ;;  %v879_v50 = vsub.f32 %v846_v23, %v863_v47 }
 0x40b   : > { %v875_v51 = vpop.xlane.xlu1 %874  ;;  %4218 = vpow2.f32 %v884_v21 }
 0x40c   : > { %v890_v38 = vmul.f32 1.442695, %v879_v50  ;;  %v883_v52 = vsub.f32 %v850_v31, %v875_v51 }
 0x40d   : > { %v872_v53 = vpop.xlane.xlu0 %871 }
 0x40e   : > { %4220 = vpow2.f32 %v890_v38  ;;  %v882_v54 = vsub.f32 %v849_v30, %v872_v53  ;;  %v898_v56 = vmul.f32 1.442695, %v883_v52 }
 0x40f   : > { %v869_v55 = vpop.xlane.xlu1 %868  ;;  %4222 = vpow2.f32 %v886_v29 }
 0x410   : > { %v896_v57 = vmul.f32 1.442695, %v882_v54  ;;  %v881_v39 = vsub.f32 %v848_v20, %v869_v55 }
 0x411   : > { %v866_v48 = vpop.xlane.xlu0 %865 }
 0x412   : > { %4224 = vpow2.f32 %v896_v57  ;;  %v880_v58 = vsub.f32 %v847_v35, %v866_v48  ;;  %v894_v60 = vmul.f32 1.442695, %v881_v39 }
 0x413   : > { %v949_v59 = vpop.permute.xlu1 %948  ;;  %4226 = vpow2.f32 %v898_v56 }
 0x414   : > { %v892_v62 = vmul.f32 1.442695, %v880_v58 }
 0x415   : > { %v951_v49 = vpop.permute.xlu0 %950 }
 0x416   : > { %4228 = vpow2.f32 %v892_v62  ;;  %3967 = vmatprep.subr.bf16.mxu0 %v951_v49  ;;  %v1037_v62 = vld [vmem:[%s5745_s4] sm:$0xf] }
 0x417   : > { %v4638_v63 = vpop.eup %4216  ;;  %3968 = vmatpush3.bf16.msra.mxu0 %v951_v49  ;;  %4230 = vpow2.f32 %v894_v60  ;;  %v947_v5 = vpop.permute.xlu1 %946  ;;  %v1432_v49 = vsel %vm1350_vm3, %v1037_v62, 0 }
 0x418   : > { %3969 = vmatprep.subr.bf16.mxu0 %v949_v59  ;;  %v906_v1 = vsel %vm851_vm2, %v4638_v63, 0.0  ;;  %v4219_v4 = vpop.eup %4218 }
 0x419   : > { %907 = vadd.xlane.f32.xlu0 %v906_v1  ;;  %v900_v7 = vsel %vm851_vm2, %v4219_v4, 0.0 }
 0x41b   : > { %v4221_v6 = vpop.eup %4220  ;;  %3970 = vmatpush3.bf16.msra.mxu0 %v949_v59  ;;  %v945_v11 = vpop.permute.xlu1 %944 }
 0x41c   : > { %3971 = vmatprep.subr.bf16.mxu0 %v947_v5  ;;  %v909_v8 = vsel %vm851_vm2, %v4221_v6, 0.0  ;;  %v4223_v9 = vpop.eup %4222 }
 0x41d   : > { %901 = vadd.xlane.f32.xlu0 %v900_v7  ;;  %910 = vadd.xlane.f32.xlu1 %v909_v8  ;;  %v903_v13 = vsel %vm851_vm2, %v4223_v9, 0.0 }
 0x41f   : > { %v4644_v10 = vpop.eup %4224  ;;  %3972 = vmatpush3.bf16.msra.mxu0 %v947_v5 }
 0x420   : > { %3973 = vmatprep.subr.bf16.mxu0 %v945_v11  ;;  %v918_v12 = vsel %vm851_vm2, %v4644_v10, 0.0  ;;  %v4227_v14 = vpop.eup %4226 }
 0x421   : > { %919 = vadd.xlane.f32.xlu0 %v918_v12  ;;  %904 = vadd.xlane.f32.xlu1 %v903_v13  ;;  %v921_v16 = vsel %vm851_vm2, %v4227_v14, 0.0 }
 0x423   : > { %v4229_v15 = vpop.eup %4228  ;;  %3974 = vmatpush3.bf16.msra.mxu0 %v945_v11 }
 0x424   : > { %v912_v17 = vsel %vm851_vm2, %v4229_v15, 0.0  ;;  %v4231_v18 = vpop.eup %4230 }
 0x425   : > { %922 = vadd.xlane.f32.xlu0 %v921_v16  ;;  %913 = vadd.xlane.f32.xlu1 %v912_v17  ;;  %v915_v19 = vsel %vm851_vm2, %v4231_v18, 0.0 }
 0x429   : > { %916 = vadd.xlane.f32.xlu0 %v915_v19 }
 0x436   : > { %1050 = vrot.lane.b32.xlu1 %v4604_v2, %s4405_s26 }
 0x43a   : > { %1048 = vrot.lane.b32.xlu1 %v4608_v3, %s4405_s26 }
 0x43e   : > { %1046 = vrot.lane.b32.xlu1 %v4598_v61, %s4405_s26 }
 0x43f   : > { %1052 = vrot.lane.b32.xlu0 %v4602_v0, %s4405_s26  ;;  %s4412_s26 = smov 48  }
 0x442   : > { %1040 = vrot.lane.b32.xlu1 %v4608_v3, %s4406_s28 }
 0x443   : > { %1038 = vrot.lane.b32.xlu0 %v4598_v61, %s4406_s28 }
 0x446   : > { %1044 = vrot.lane.b32.xlu1 %v4602_v0, %s4406_s28 }
 0x447   : > { %1042 = vrot.lane.b32.xlu0 %v4604_v2, %s4406_s28 }
 0x4a2   : > { %v908_v22 = vpop.xlane.xlu0 %907 }
 0x4a6   : > { %v902_v23 = vpop.xlane.xlu0 %901  ;;  %v911_v24 = vpop.xlane.xlu1 %910 }
 0x4a7   : > { %4232 = vrcp.f32 %v911_v24 }
 0x4a8   : > { %4234 = vrcp.f32 %v902_v23 }
 0x4a9   : > { %4236 = vrcp.f32 %v908_v22 }
 0x4aa   : > { %v920_v25 = vpop.xlane.xlu0 %919  ;;  %v905_v26 = vpop.xlane.xlu1 %904 }
 0x4ab   : > { %4238 = vrcp.f32 %v905_v26 }
 0x4ae   : > { %v923_v27 = vpop.xlane.xlu0 %922  ;;  %v914_v30 = vpop.xlane.xlu1 %913 }
 0x4af   : > { %4240 = vrcp.f32 %v923_v27 }
 0x4b0   : > { %4242 = vrcp.f32 %v914_v30 }
 0x4b1   : > { %4244 = vrcp.f32 %v920_v25 }
 0x4b2   : > { %v917_v31 = vpop.xlane.xlu0 %916  ;;  %v1051_v47 = vpop.permute.xlu1 %1050 }
 0x4b3   : > { %4246 = vrcp.f32 %v917_v31  ;;  %v1073_v55 = vsel %vm753_vm1, %v1051_v47, 0 }
 0x4b4   : > { %v4233_v32 = vpop.eup %4232 }
 0x4b5   : > { %v4235_v20 = vpop.eup %4234  ;;  %v935_v36 = vmul.f32 %v4233_v32, %v4221_v6 }
 0x4b6   : > { %v1053_v33 = vpop.permute.xlu0 %1052  ;;  %v4237_v34 = vpop.eup %4236  ;;  %v932_v37 = vmul.f32 %v4235_v20, %v4219_v4 }
 0x4b7   : > { %4159 = vmatprep.subr.msk.bf16.mxu0 %vm753_vm1, %v1053_v33  ;;  %v934_v41 = vmul.f32 %v4237_v34, %v4638_v63  ;;  %v1076_v45 = vsel %vm753_vm1, %v1053_v33, 0  ;;  %v1049_v56 = vpop.permute.xlu1 %1048 }
 0x4b8   : > { %v4239_v35 = vpop.eup %4238  ;;  %v1070_v57 = vsel %vm753_vm1, %v1049_v56, 0 }
 0x4b9   : > { %v933_v40 = vmul.f32 %v4239_v35, %v4223_v9  ;;  %v941_v43 = vpack.c.bf16 %v935_v36, %v934_v41 }
 0x4ba   : > { %v1039_v54 = vpop.permute.xlu0 %1038 }
 0x4bb   : > { %v940_v28 = vpack.c.bf16 %v933_v40, %v932_v37  ;;  %v1047_v39 = vpop.permute.xlu1 %1046 }
 0x4bc   : > { %v4241_v42 = vpop.eup %4240  ;;  %v1067_v48 = vsel %vm753_vm1, %v1047_v39, 0 }
 0x4bd   : > { %v4243_v44 = vpop.eup %4242  ;;  %3975 = vmatprep.mubr.msk.bf16.mxu0 %vm851_vm2, %v940_v28  ;;  %v939_v29 = vmul.f32 %v4241_v42, %v4227_v14 }
 0x4be   : > { %v4245_v21 = vpop.eup %4244  ;;  %3976 = vmatmul.mubr.msk.bf16.vlgmr.msra.gmra.mxu0 %vm851_vm2, %v941_v43  ;;  %v936_v50 = vmul.f32 %v4243_v44, %v4229_v15  ;;  %v1043_v59 = vpop.permute.xlu0 %1042 }
 0x4bf   : > { %3984 = vmatpush3.bf16.xpose.msra.mxu0 %v1076_v45  ;;  %v938_v52 = vmul.f32 %v4245_v21, %v4644_v10  ;;  %v1041_v58 = vpop.permute.xlu1 %1040 }
 0x4c0   : > { %v4247_v46 = vpop.eup %4246  ;;  %4160 = vmatprep.subr.msk.bf16.mxu0 %vm753_vm1, %v1051_v47 }
 0x4c1   : > { %v937_v51 = vmul.f32 %v4247_v46, %v4231_v18  ;;  %v943_v53 = vpack.c.bf16 %v939_v29, %v938_v52 }
 0x4c3   : > { %v942_v38 = vpack.c.bf16 %v937_v51, %v936_v50  ;;  %v1045_v60 = vpop.permute.xlu1 %1044 }
 0x4c5   : > { %3979 = vmatprep.mubr.msk.bf16.mxu0 %vm851_vm2, %v942_v38 }
 0x4c6   : > { %3980 = vmatmul.mubr.msk.bf16.gmra.mxu0 %vm851_vm2, %v943_v53 }
 0x4c7   : > { %3986 = vmatpush3.bf16.xpose.msra.mxu0 %v1073_v55  ;;  %3991 = vmatprep.mubr.msk.bf16.mxu0 %vm753_vm1, %v1039_v54 }
 0x4c8   : > { %4161 = vmatprep.subr.msk.bf16.mxu0 %vm753_vm1, %v1049_v56 }
 0x4cf   : > { %3988 = vmatpush3.bf16.xpose.msra.mxu0 %v1070_v57 }
 0x4d0   : > { %4162 = vmatprep.subr.msk.bf16.mxu0 %vm753_vm1, %v1047_v39 }
 0x4d7   : > { %3990 = vmatpush3.bf16.xpose.msra.mxu0 %v1067_v48 }
 0x4d8   : > { %4164 = vmatprep.subr.msk.bf16.mxu0 %vm1350_vm3, %v1037_v62 }
 0x4de   : > { %3992 = vmatmul.mubr.msk.bf16.vlgmr.msra.gmra.mxu0 %vm753_vm1, %v1041_v58 }
 0x4df   : > { %3995 = vmatprep.mubr.msk.bf16.mxu0 %vm753_vm1, %v1043_v59  ;;  %4026 = vmatpush3.bf16.msra.mxu0 %v1432_v49 }
 0x4e6   : > { %3996 = vmatmul.mubr.msk.bf16.gmra.mxu0 %vm753_vm1, %v1045_v60 }
 0x57e   : > { %v3977_v63 = vpop.f32.mrf.mxu0 }
 0x580   : > { %v1002_v1 = vpop.f32.mrf.mxu0 }
 0x582   : > { %v3978_v4 = vpop.f32.mrf.mxu0 }
 0x583   : > { %v1034_v7 = vpack.c.bf16 %v3978_v4, %v3977_v63 }
 0x584   : > { %v1005_v5 = vpop.f32.mrf.mxu0 }
 0x585   : > { %v1033_v6 = vpack.c.bf16 %v1005_v5, %v1002_v1 }
 0x586   : > { %v3981_v8 = vpop.f32.mrf.mxu0 }
 0x587   : > { %4027 = vmatprep.mubr.msk.bf16.mxu0 %vm753_vm1, %v1033_v6 }
 0x588   : > { %v1018_v9 = vpop.f32.mrf.mxu0  ;;  %4028 = vmatmul.mubr.msk.bf16.vlgmr.msra.gmra.mxu0 %vm753_vm1, %v1034_v7 }
 0x58a   : > { %v3982_v10 = vpop.f32.mrf.mxu0 }
 0x58b   : > { %v1036_v13 = vpack.c.bf16 %v3982_v10, %v3981_v8 }
 0x58c   : > { %v1021_v11 = vpop.f32.mrf.mxu0 }
 0x58d   : > { %v1035_v12 = vpack.c.bf16 %v1021_v11, %v1018_v9 }
 0x58f   : > { %4031 = vmatprep.mubr.msk.bf16.mxu0 %vm753_vm1, %v1035_v12 }
 0x590   : > { %4032 = vmatmul.mubr.msk.bf16.gmra.mxu0 %vm753_vm1, %v1036_v13 }
 0x59e   : > { %v3993_v14 = vpop.f32.mrf.mxu0 }
 0x59f   : > { %v1145_v18 = vmul.f32 0.35355338, %v3993_v14 }
 0x5a0   : > { %v1112_v15 = vpop.f32.mrf.mxu0 }
 0x5a1   : > { %v1143_v16 = vmul.f32 0.35355338, %v1112_v15  ;;  %v1157_v26 = vsel %vm851_vm2, %v1145_v18, -inf }
 0x5a2   : > { %v3994_v17 = vpop.f32.mrf.mxu0 }
 0x5a3   : > { %v1151_v19 = vsel %vm851_vm2, %v1143_v16, -inf  ;;  %v1146_v25 = vmul.f32 0.35355338, %v3994_v17 }
 0x5a4   : > { %1152 = vmax.xlane.f32.xlu0 %v1151_v19  ;;  %v1115_v22 = vpop.f32.mrf.mxu0 }
 0x5a5   : > { %v1144_v23 = vmul.f32 0.35355338, %v1115_v22  ;;  %v1160_v20 = vsel %vm851_vm2, %v1146_v25, -inf }
 0x5a6   : > { %v3997_v24 = vpop.f32.mrf.mxu0 }
 0x5a7   : > { %v1154_v27 = vsel %vm851_vm2, %v1144_v23, -inf  ;;  %v1149_v32 = vmul.f32 0.35355338, %v3997_v24 }
 0x5a8   : > { %1158 = vmax.xlane.f32.xlu0 %v1157_v26  ;;  %1155 = vmax.xlane.f32.xlu1 %v1154_v27  ;;  %v1128_v30 = vpop.f32.mrf.mxu0 }
 0x5a9   : > { %v1147_v37 = vmul.f32 0.35355338, %v1128_v30  ;;  %v1169_v40 = vsel %vm851_vm2, %v1149_v32, -inf }
 0x5aa   : > { %v3998_v31 = vpop.f32.mrf.mxu0 }
 0x5ab   : > { %v1150_v33 = vmul.f32 0.35355338, %v3998_v31  ;;  %v1163_v28 = vsel %vm851_vm2, %v1147_v37, -inf }
 0x5ac   : > { %1161 = vmax.xlane.f32.xlu0 %v1160_v20  ;;  %v1131_v34 = vpop.f32.mrf.mxu0 }
 0x5ad   : > { %v1148_v35 = vmul.f32 0.35355338, %v1131_v34  ;;  %v1172_v36 = vsel %vm851_vm2, %v1150_v33, -inf }
 0x5ae   : > { %1173 = vmax.xlane.f32.xlu1 %v1172_v36 }
 0x5af   : > { %v1166_v41 = vsel %vm851_vm2, %v1148_v35, -inf }
 0x5b0   : > { %1170 = vmax.xlane.f32.xlu0 %v1169_v40 }
 0x5b2   : > { %1167 = vmax.xlane.f32.xlu1 %v1166_v41 }
 0x5b4   : > { %1164 = vmax.xlane.f32.xlu0 %v1163_v28 }
 0x5c3   : > { %1247 = vrot.lane.b32.xlu1 %v4604_v2, %s4407_s16 }
 0x5ca   : > { %1249 = vrot.lane.b32.xlu0 %v4602_v0, %s4407_s16 }
 0x62d   : > { %v1153_v42 = vpop.xlane.xlu0 %1152 }
 0x62e   : > { %v1175_v43 = vsub.f32 %v1143_v16, %v1153_v42  ;;  %v3690_v42 = vld [vmem:[%s5745_s4 + $0x4] sm:$0xf] }
 0x630   : > { %v1183_v46 = vmul.f32 1.442695, %v1175_v43 }
 0x631   : > { %v1159_v44 = vpop.xlane.xlu0 %1158  ;;  %v1156_v21 = vpop.xlane.xlu1 %1155 }
 0x632   : > { %v1177_v45 = vsub.f32 %v1145_v18, %v1159_v44  ;;  %v1176_v50 = vsub.f32 %v1144_v23, %v1156_v21 }
 0x634   : > { %v1187_v47 = vmul.f32 1.442695, %v1177_v45  ;;  %v1185_v52 = vmul.f32 1.442695, %v1176_v50 }
 0x635   : > { %v1162_v51 = vpop.xlane.xlu0 %1161 }
 0x636   : > { %4248 = vpow2.f32 %v1187_v47  ;;  %v1178_v29 = vsub.f32 %v1146_v25, %v1162_v51 }
 0x637   : > { %v1174_v38 = vpop.xlane.xlu1 %1173  ;;  %4250 = vpow2.f32 %v1183_v46  ;;  %v1352_v46 = vsel %vm1350_vm3, %v3690_v42, 0 }
 0x638   : > { %v1189_v53 = vmul.f32 1.442695, %v1178_v29  ;;  %v1182_v59 = vsub.f32 %v1150_v33, %v1174_v38 }
 0x639   : > { %v1171_v54 = vpop.xlane.xlu0 %1170 }
 0x63a   : > { %4252 = vpow2.f32 %v1189_v53  ;;  %v1181_v56 = vsub.f32 %v1149_v32, %v1171_v54  ;;  %v1197_v4 = vmul.f32 1.442695, %v1182_v59 }
 0x63b   : > { %v1168_v55 = vpop.xlane.xlu1 %1167  ;;  %4254 = vpow2.f32 %v1185_v52 }
 0x63c   : > { %v1180_v57 = vsub.f32 %v1148_v35, %v1168_v55  ;;  %v1195_v60 = vmul.f32 1.442695, %v1181_v56 }
 0x63d   : > { %v1165_v39 = vpop.xlane.xlu0 %1164 }
 0x63e   : > { %v1193_v48 = vmul.f32 1.442695, %v1180_v57  ;;  %v1179_v58 = vsub.f32 %v1147_v37, %v1165_v39 }
 0x63f   : > { %v1248_v1 = vpop.permute.xlu1 %1247 }
 0x640   : > { %4256 = vpow2.f32 %v1193_v48  ;;  %v1191_v62 = vmul.f32 1.442695, %v1179_v58 }
 0x641   : > { %v1250_v49 = vpop.permute.xlu0 %1249 }
 0x642   : > { %4258 = vpow2.f32 %v1191_v62  ;;  %3999 = vmatprep.subr.bf16.mxu1 %v1250_v49 }
 0x643   : > { %v4699_v63 = vpop.eup %4248  ;;  %4000 = vmatpush3.bf16.msra.mxu1 %v1250_v49  ;;  %4260 = vpow2.f32 %v1195_v60 }
 0x644   : > { %4001 = vmatprep.subr.bf16.mxu1 %v1248_v1  ;;  %v1205_v5 = vsel %vm851_vm2, %v4699_v63, 0.0  ;;  %v4703_v6 = vpop.eup %4250  ;;  %4262 = vpow2.f32 %v1197_v4 }
 0x645   : > { %1206 = vadd.xlane.f32.xlu0 %v1205_v5  ;;  %v1199_v8 = vsel %vm851_vm2, %v4703_v6, 0.0 }
 0x647   : > { %v4705_v7 = vpop.eup %4252  ;;  %4002 = vmatpush3.bf16.msra.mxu1 %v1248_v1 }
 0x648   : > { %v1208_v9 = vsel %vm851_vm2, %v4705_v7, 0.0  ;;  %v4711_v10 = vpop.eup %4254 }
 0x649   : > { %1200 = vadd.xlane.f32.xlu0 %v1199_v8  ;;  %1209 = vadd.xlane.f32.xlu1 %v1208_v9  ;;  %v1202_v11 = vsel %vm851_vm2, %v4711_v10, 0.0 }
 0x64d   : > { %v4715_v12 = vpop.eup %4256  ;;  %1203 = vadd.xlane.f32.xlu1 %v1202_v11 }
 0x64e   : > { %v1214_v13 = vsel %vm851_vm2, %v4715_v12, 0.0 }
 0x64f   : > { %v4719_v14 = vpop.eup %4258  ;;  %1215 = vadd.xlane.f32.xlu0 %v1214_v13 }
 0x650   : > { %v1211_v15 = vsel %vm851_vm2, %v4719_v14, 0.0  ;;  %v4723_v16 = vpop.eup %4260 }
 0x651   : > { %1212 = vadd.xlane.f32.xlu1 %v1211_v15  ;;  %v1217_v17 = vsel %vm851_vm2, %v4723_v16, 0.0  ;;  %v4727_v18 = vpop.eup %4262 }
 0x652   : > { %v1220_v19 = vsel %vm851_vm2, %v4727_v18, 0.0 }
 0x655   : > { %1218 = vadd.xlane.f32.xlu1 %v1217_v17 }
 0x659   : > { %1221 = vadd.xlane.f32.xlu1 %v1220_v19 }
 0x665   : > { %1245 = vrot.lane.b32.xlu0 %v4608_v3, %s4407_s16 }
 0x669   : > { %1513 = vrot.lane.b32.xlu0 %v4602_v0, %s4408_s17 }
 0x66a   : > { %1243 = vrot.lane.b32.xlu1 %v4598_v61, %s4407_s16 }
 0x66d   : > { %1509 = vrot.lane.b32.xlu0 %v4608_v3, %s4408_s17 }
 0x66e   : > { %1511 = vrot.lane.b32.xlu1 %v4604_v2, %s4408_s17 }
 0x671   : > { %1499 = vrot.lane.b32.xlu0 %v4598_v61, %s4409_s20 }
 0x672   : > { %1507 = vrot.lane.b32.xlu1 %v4598_v61, %s4408_s17 }
 0x675   : > { %1503 = vrot.lane.b32.xlu0 %v4604_v2, %s4409_s20 }
 0x676   : > { %1501 = vrot.lane.b32.xlu1 %v4608_v3, %s4409_s20 }
 0x679   : > { %1901 = vrot.lane.b32.xlu0 %v4602_v0, %s4410_s21 }
 0x67a   : > { %1505 = vrot.lane.b32.xlu1 %v4602_v0, %s4409_s20 }
 0x67d   : > { %1897 = vrot.lane.b32.xlu0 %v4608_v3, %s4410_s21 }
 0x67e   : > { %1899 = vrot.lane.b32.xlu1 %v4604_v2, %s4410_s21 }
 0x681   : > { %1887 = vrot.lane.b32.xlu0 %v4598_v61, %s4411_s22 }
 0x682   : > { %1895 = vrot.lane.b32.xlu1 %v4598_v61, %s4410_s21 }
 0x685   : > { %1891 = vrot.lane.b32.xlu0 %v4604_v2, %s4411_s22 }
 0x686   : > { %1889 = vrot.lane.b32.xlu1 %v4608_v3, %s4411_s22 }
 0x68a   : > { %1893 = vrot.lane.b32.xlu1 %v4602_v0, %s4411_s22 }
 0x6ce   : > { %v1207_v22 = vpop.xlane.xlu0 %1206 }
 0x6d2   : > { %v1201_v23 = vpop.xlane.xlu0 %1200  ;;  %v1210_v24 = vpop.xlane.xlu1 %1209 }
 0x6d3   : > { %4264 = vrcp.f32 %v1201_v23 }
 0x6d4   : > { %4266 = vrcp.f32 %v1210_v24 }
 0x6d5   : > { %4268 = vrcp.f32 %v1207_v22 }
 0x6d6   : > { %v1204_v25 = vpop.xlane.xlu1 %1203 }
 0x6d7   : > { %4270 = vrcp.f32 %v1204_v25 }
 0x6d8   : > { %v1216_v26 = vpop.xlane.xlu0 %1215 }
 0x6d9   : > { %4272 = vrcp.f32 %v1216_v26 }
 0x6da   : > { %v1213_v27 = vpop.xlane.xlu1 %1212 }
 0x6db   : > { %4274 = vrcp.f32 %v1213_v27 }
 0x6dc   : > { %v1246_v30 = vpop.permute.xlu0 %1245 }
 0x6dd   : > { %4003 = vmatprep.subr.bf16.mxu1 %v1246_v30 }
 0x6de   : > { %4004 = vmatpush3.bf16.msra.mxu1 %v1246_v30  ;;  %v1219_v31 = vpop.xlane.xlu1 %1218 }
 0x6df   : > { %4276 = vrcp.f32 %v1219_v31 }
 0x6e0   : > { %v4265_v32 = vpop.eup %4264  ;;  %v1514_v29 = vpop.permute.xlu0 %1513 }
 0x6e1   : > { %v4267_v33 = vpop.eup %4266  ;;  %v1231_v37 = vmul.f32 %v4265_v32, %v4703_v6  ;;  %v1537_v60 = vsel %vm753_vm1, %v1514_v29, 0 }
 0x6e2   : > { %v1222_v20 = vpop.xlane.xlu1 %1221  ;;  %v4269_v34 = vpop.eup %4268  ;;  %v1234_v36 = vmul.f32 %v4267_v33, %v4705_v7 }
 0x6e3   : > { %4278 = vrcp.f32 %v1222_v20  ;;  %v1233_v43 = vmul.f32 %v4269_v34, %v4699_v63 }
 0x6e4   : > { %v4271_v35 = vpop.eup %4270  ;;  %v1510_v1 = vpop.permute.xlu0 %1509 }
 0x6e5   : > { %v1232_v40 = vmul.f32 %v4271_v35, %v4711_v10  ;;  %v1240_v45 = vpack.c.bf16 %v1234_v36, %v1233_v43  ;;  %v1531_v11 = vsel %vm753_vm1, %v1510_v1, 0 }
 0x6e6   : > { %v4273_v41 = vpop.eup %4272  ;;  %v1244_v28 = vpop.permute.xlu1 %1243 }
 0x6e7   : > { %4005 = vmatprep.subr.bf16.mxu1 %v1244_v28  ;;  %v1239_v44 = vpack.c.bf16 %v1232_v40, %v1231_v37  ;;  %v1236_v50 = vmul.f32 %v4273_v41, %v4715_v12 }
 0x6e8   : > { %v4275_v21 = vpop.eup %4274  ;;  %4006 = vmatpush3.bf16.msra.mxu1 %v1244_v28  ;;  %v1500_v9 = vpop.permute.xlu0 %1499 }
 0x6e9   : > { %4007 = vmatprep.mubr.msk.bf16.mxu1 %vm851_vm2, %v1239_v44  ;;  %4163 = vmatprep.subr.msk.bf16.mxu1 %vm1350_vm3, %v3690_v42  ;;  %v1235_v47 = vmul.f32 %v4275_v21, %v4719_v14 }
 0x6ea   : > { %v1512_v49 = vpop.permute.xlu1 %1511 }
 0x6eb   : > { %4008 = vmatmul.mubr.msk.bf16.vlgmr.msra.gmra.mxu1 %vm851_vm2, %v1240_v45  ;;  %v1241_v51 = vpack.c.bf16 %v1236_v50, %v1235_v47  ;;  %v1534_v7 = vsel %vm753_vm1, %v1512_v49, 0 }
 0x6ec   : > { %4016 = vmatpush3.bf16.msra.mxu1 %v1352_v46  ;;  %v4277_v38 = vpop.eup %4276  ;;  %v1504_v12 = vpop.permute.xlu0 %1503 }
 0x6ed   : > { %4011 = vmatprep.mubr.msk.bf16.mxu1 %vm851_vm2, %v1241_v51  ;;  %4165 = vmatprep.subr.msk.bf16.mxu1 %vm753_vm1, %v1514_v29  ;;  %v1237_v53 = vmul.f32 %v4277_v38, %v4723_v16 }
 0x6ee   : > { %v1508_v10 = vpop.permute.xlu1 %1507 }
 0x6ef   : > { %v1528_v14 = vsel %vm753_vm1, %v1508_v10, 0 }
 0x6f0   : > { %v4279_v52 = vpop.eup %4278  ;;  %v1902_v15 = vpop.permute.xlu0 %1901 }
 0x6f1   : > { %v1238_v54 = vmul.f32 %v4279_v52, %v4727_v18  ;;  %v1925_v17 = vsel %vm753_vm1, %v1902_v15, 0 }
 0x6f2   : > { %v1502_v13 = vpop.permute.xlu1 %1501 }
 0x6f3   : > { %v1242_v55 = vpack.c.bf16 %v1238_v54, %v1237_v53 }
 0x6f4   : > { %v1898_v19 = vpop.permute.xlu0 %1897 }
 0x6f5   : > { %4012 = vmatmul.mubr.msk.bf16.gmra.mxu1 %vm851_vm2, %v1242_v55  ;;  %v1919_v24 = vsel %vm753_vm1, %v1898_v19, 0 }
 0x6f6   : > { %v1506_v16 = vpop.permute.xlu1 %1505 }
 0x6f8   : > { %v1888_v22 = vpop.permute.xlu0 %1887 }
 0x6fa   : > { %v1900_v18 = vpop.permute.xlu1 %1899 }
 0x6fb   : > { %v1922_v23 = vsel %vm753_vm1, %v1900_v18, 0 }
 0x6fc   : > { %v1892_v30 = vpop.permute.xlu0 %1891 }
 0x6fe   : > { %v1896_v25 = vpop.permute.xlu1 %1895 }
 0x6ff   : > { %v1916_v26 = vsel %vm753_vm1, %v1896_v25, 0 }
 0x702   : > { %v1890_v27 = vpop.permute.xlu1 %1889 }
 0x706   : > { %v1894_v31 = vpop.permute.xlu1 %1893 }
 0x7ab   : > { %v4009_v56 = vpop.f32.mrf.mxu1 }
 0x7ad   : > { %v1301_v57 = vpop.f32.mrf.mxu1 }
 0x7af   : > { %v4010_v39 = vpop.f32.mrf.mxu1 }
 0x7b0   : > { %v1333_v59 = vpack.c.bf16 %v4010_v39, %v4009_v56 }
 0x7b1   : > { %v1304_v48 = vpop.f32.mrf.mxu1 }
 0x7b2   : > { %v1332_v58 = vpack.c.bf16 %v1304_v48, %v1301_v57 }
 0x7b4   : > { %4017 = vmatprep.mubr.msk.bf16.mxu1 %vm753_vm1, %v1332_v58 }
 0x7b5   : > { %v4013_v62 = vpop.f32.mrf.mxu1  ;;  %4018 = vmatmul.mubr.msk.bf16.vlgmr.msra.gmra.mxu1 %vm753_vm1, %v1333_v59 }
 0x7b6   : > { %4036 = vmatpush3.bf16.xpose.msra.mxu1 %v1537_v60 }
 0x7b7   : > { %4166 = vmatprep.subr.msk.bf16.mxu1 %vm753_vm1, %v1512_v49  ;;  %v1317_v63 = vpop.f32.mrf.mxu1 }
 0x7b9   : > { %v4014_v4 = vpop.f32.mrf.mxu1 }
 0x7ba   : > { %v1335_v8 = vpack.c.bf16 %v4014_v4, %v4013_v62 }
 0x7bb   : > { %v1320_v5 = vpop.f32.mrf.mxu1 }
 0x7bc   : > { %v1334_v6 = vpack.c.bf16 %v1320_v5, %v1317_v63 }
 0x7be   : > { %4038 = vmatpush3.bf16.xpose.msra.mxu1 %v1534_v7  ;;  %4021 = vmatprep.mubr.msk.bf16.mxu1 %vm753_vm1, %v1334_v6 }
 0x7bf   : > { %4167 = vmatprep.subr.msk.bf16.mxu1 %vm753_vm1, %v1510_v1  ;;  %4022 = vmatmul.mubr.msk.bf16.gmra.mxu1 %vm753_vm1, %v1335_v8 }
 0x7c0   : > { %4043 = vmatprep.mubr.msk.bf16.mxu1 %vm753_vm1, %v1500_v9 }
 0x7c6   : > { %4040 = vmatpush3.bf16.xpose.msra.mxu1 %v1531_v11 }
 0x7c7   : > { %4168 = vmatprep.subr.msk.bf16.mxu1 %vm753_vm1, %v1508_v10 }
 0x7ce   : > { %4042 = vmatpush3.bf16.xpose.msra.mxu1 %v1528_v14 }
 0x7cf   : > { %4170 = vmatprep.subr.msk.bf16.mxu1 %vm753_vm1, %v1902_v15 }
 0x7d5   : > { %4044 = vmatmul.mubr.msk.bf16.vlgmr.msra.gmra.mxu1 %vm753_vm1, %v1502_v13 }
 0x7d6   : > { %4047 = vmatprep.mubr.msk.bf16.mxu1 %vm753_vm1, %v1504_v12  ;;  %4078 = vmatpush3.bf16.xpose.msra.mxu1 %v1925_v17 }
 0x7d7   : > { %4171 = vmatprep.subr.msk.bf16.mxu1 %vm753_vm1, %v1900_v18 }
 0x7dd   : > { %4048 = vmatmul.mubr.msk.bf16.gmra.mxu1 %vm753_vm1, %v1506_v16 }
 0x7de   : > { %4080 = vmatpush3.bf16.xpose.msra.mxu1 %v1922_v23  ;;  %4085 = vmatprep.mubr.msk.bf16.mxu1 %vm753_vm1, %v1888_v22 }
 0x7df   : > { %4172 = vmatprep.subr.msk.bf16.mxu1 %vm753_vm1, %v1898_v19 }
 0x7e6   : > { %4082 = vmatpush3.bf16.xpose.msra.mxu1 %v1919_v24 }
 0x7e7   : > { %4173 = vmatprep.subr.msk.bf16.mxu1 %vm753_vm1, %v1896_v25 }
 0x7ee   : > { %4084 = vmatpush3.bf16.xpose.msra.mxu1 %v1916_v26 }
 0x7f5   : > { %4086 = vmatmul.mubr.msk.bf16.vlgmr.msra.gmra.mxu1 %vm753_vm1, %v1890_v27 }
 0x7f6   : > { %4089 = vmatprep.mubr.msk.bf16.mxu1 %vm753_vm1, %v1892_v30 }
 0x7fd   : > { %4090 = vmatmul.mubr.msk.bf16.gmra.mxu1 %vm753_vm1, %v1894_v31 }
 0x875   : > { %v4796_v32 = vpop.f32.mrf.mxu1 }
 0x877   : > { %v4798_v33 = vpop.f32.mrf.mxu1 }
 0x879   : > { %v4800_v20 = vpop.f32.mrf.mxu1 }
 0x87b   : > { %v4802_v34 = vpop.f32.mrf.mxu1 }
 0x87f   : > { %v4804_v35 = vpop.f32.mrf.mxu1 }
 0x881   : > { %v4806_v36 = vpop.f32.mrf.mxu1 }
 0x883   : > { %v4808_v37 = vpop.f32.mrf.mxu1 }
 0x885   : > { %v4810_v40 = vpop.f32.mrf.mxu1 }
 0x895   : > { %v4045_v41 = vpop.f32.mrf.mxu1 }
 0x896   : > { %v1606_v44 = vmul.f32 0.35355338, %v4045_v41 }
 0x897   : > { %v1573_v28 = vpop.f32.mrf.mxu1 }
 0x898   : > { %v1604_v42 = vmul.f32 0.35355338, %v1573_v28  ;;  %v1618_v51 = vsel %vm851_vm2, %v1606_v44, -inf }
 0x899   : > { %v4046_v43 = vpop.f32.mrf.mxu1 }
 0x89a   : > { %v1612_v21 = vsel %vm851_vm2, %v1604_v42, -inf  ;;  %v1607_v50 = vmul.f32 0.35355338, %v4046_v43 }
 0x89b   : > { %1613 = vmax.xlane.f32.xlu0 %v1612_v21  ;;  %v1576_v45 = vpop.f32.mrf.mxu1 }
 0x89c   : > { %v1605_v46 = vmul.f32 0.35355338, %v1576_v45  ;;  %v1621_v54 = vsel %vm851_vm2, %v1607_v50, -inf }
 0x89d   : > { %v4049_v47 = vpop.f32.mrf.mxu1 }
 0x89e   : > { %v1615_v29 = vsel %vm851_vm2, %v1605_v46, -inf  ;;  %v1610_v57 = vmul.f32 0.35355338, %v4049_v47 }
 0x89f   : > { %1619 = vmax.xlane.f32.xlu0 %v1618_v51  ;;  %1616 = vmax.xlane.f32.xlu1 %v1615_v29  ;;  %v1589_v38 = vpop.f32.mrf.mxu1 }
 0x8a0   : > { %v1608_v53 = vmul.f32 0.35355338, %v1589_v38  ;;  %v1630_v59 = vsel %vm851_vm2, %v1610_v57, -inf }
 0x8a1   : > { %v4050_v52 = vpop.f32.mrf.mxu1 }
 0x8a2   : > { %v1611_v39 = vmul.f32 0.35355338, %v4050_v52  ;;  %v1624_v48 = vsel %vm851_vm2, %v1608_v53, -inf }
 0x8a3   : > { %1622 = vmax.xlane.f32.xlu0 %v1621_v54  ;;  %v1592_v55 = vpop.f32.mrf.mxu1 }
 0x8a4   : > { %v1609_v56 = vmul.f32 0.35355338, %v1592_v55  ;;  %v1633_v60 = vsel %vm851_vm2, %v1611_v39, -inf }
 0x8a6   : > { %v1627_v58 = vsel %vm851_vm2, %v1609_v56, -inf }
 0x8a7   : > { %1625 = vmax.xlane.f32.xlu0 %v1624_v48  ;;  %1628 = vmax.xlane.f32.xlu1 %v1627_v58 }
 0x8ab   : > { %1631 = vmax.xlane.f32.xlu0 %v1630_v59  ;;  %1634 = vmax.xlane.f32.xlu1 %v1633_v60 }
 0x8b5   : > { %v4087_v47 = vpop.f32.mrf.mxu1 }
 0x8b6   : > { %v4858_v55 = vmul.f32 0.35355338, %v4087_v47 }
 0x8b8   : > { %v2006_v58 = vsel %vm851_vm2, %v4858_v55, -inf }
 0x924   : > { %v1614_v62 = vpop.xlane.xlu0 %1613 }
 0x925   : > { %v1636_v49 = vsub.f32 %v1604_v42, %v1614_v62 }
 0x927   : > { %v1644_v5 = vmul.f32 1.442695, %v1636_v49 }
 0x928   : > { %v1620_v63 = vpop.xlane.xlu0 %1619  ;;  %v1617_v1 = vpop.xlane.xlu1 %1616 }
 0x929   : > { %v1638_v4 = vsub.f32 %v1606_v44, %v1620_v63  ;;  %v1637_v7 = vsub.f32 %v1605_v46, %v1617_v1 }
 0x92b   : > { %v1648_v6 = vmul.f32 1.442695, %v1638_v4  ;;  %v1646_v10 = vmul.f32 1.442695, %v1637_v7 }
 0x92c   : > { %v1623_v8 = vpop.xlane.xlu0 %1622 }
 0x92d   : > { %4280 = vpow2.f32 %v1648_v6  ;;  %v1639_v9 = vsub.f32 %v1607_v50, %v1623_v8  ;;  %v1961_v50 = vpop.f32.mrf.mxu1 }
 0x92e   : > { %4282 = vpow2.f32 %v1644_v5  ;;  %v4852_v38 = vmul.f32 0.35355338, %v1961_v50 }
 0x92f   : > { %v1650_v11 = vmul.f32 1.442695, %v1639_v9  ;;  %v4088_v29 = vpop.f32.mrf.mxu1 }
 0x930   : > { %v1626_v12 = vpop.xlane.xlu0 %1625  ;;  %v1629_v42 = vpop.xlane.xlu1 %1628  ;;  %v4864_v48 = vmul.f32 0.35355338, %v4088_v29 }
 0x931   : > { %4284 = vpow2.f32 %v1650_v11  ;;  %v1640_v13 = vsub.f32 %v1608_v53, %v1626_v12  ;;  %v1641_v21 = vsub.f32 %v1609_v56, %v1629_v42  ;;  %v1964_v54 = vpop.f32.mrf.mxu1  ;;  %v2000_v56 = vsel %vm851_vm2, %v4852_v38, -inf }
 0x932   : > { %4286 = vpow2.f32 %v1646_v10  ;;  %v2009_v62 = vsel %vm851_vm2, %v4864_v48, -inf  ;;  %v4880_v5 = vmul.f32 0.35355338, %v1964_v54 }
 0x933   : > { %v1652_v16 = vmul.f32 1.442695, %v1640_v13  ;;  %v1654_v46 = vmul.f32 1.442695, %v1641_v21 }
 0x934   : > { %v1632_v14 = vpop.xlane.xlu0 %1631  ;;  %v1635_v43 = vpop.xlane.xlu1 %1634  ;;  %v2003_v8 = vsel %vm851_vm2, %v4880_v5, -inf }
 0x935   : > { %v1642_v15 = vsub.f32 %v1610_v57, %v1632_v14  ;;  %v1643_v44 = vsub.f32 %v1611_v39, %v1635_v43  ;;  %v4091_v39 = vpop.f32.mrf.mxu1 }
 0x936   : > { %v4872_v49 = vmul.f32 0.35355338, %v4091_v39 }
 0x937   : > { %v1656_v17 = vmul.f32 1.442695, %v1642_v15  ;;  %v1658_v45 = vmul.f32 1.442695, %v1643_v44  ;;  %v1977_v59 = vpop.f32.mrf.mxu1 }
 0x938   : > { %v4868_v60 = vmul.f32 0.35355338, %v1977_v59  ;;  %v2018_v1 = vsel %vm851_vm2, %v4872_v49, -inf }
 0x939   : > { %4288 = vpow2.f32 %v1656_v17  ;;  %v4092_v4 = vpop.f32.mrf.mxu1 }
 0x93a   : > { %v4820_v18 = vpop.eup %4280  ;;  %4290 = vpow2.f32 %v1652_v16  ;;  %v2012_v63 = vsel %vm851_vm2, %v4868_v60, -inf  ;;  %v4886_v9 = vmul.f32 0.35355338, %v4092_v4 }
 0x93b   : > { %v1666_v19 = vsel %vm851_vm2, %v4820_v18, 0.0  ;;  %v4824_v22 = vpop.eup %4282  ;;  %4292 = vpow2.f32 %v1658_v45  ;;  %v1980_v6 = vpop.f32.mrf.mxu1 }
 0x93c   : > { %1667 = vadd.xlane.f32.xlu0 %v1666_v19  ;;  %v1660_v24 = vsel %vm851_vm2, %v4824_v22, 0.0  ;;  %4294 = vpow2.f32 %v1654_v46  ;;  %v4882_v7 = vmul.f32 0.35355338, %v1980_v6  ;;  %v2021_v11 = vsel %vm851_vm2, %v4886_v9, -inf }
 0x93e   : > { %v4826_v23 = vpop.eup %4284  ;;  %v2015_v10 = vsel %vm851_vm2, %v4882_v7, -inf }
 0x93f   : > { %v1669_v25 = vsel %vm851_vm2, %v4826_v23, 0.0  ;;  %v4832_v26 = vpop.eup %4286 }
 0x940   : > { %1661 = vadd.xlane.f32.xlu0 %v1660_v24  ;;  %1670 = vadd.xlane.f32.xlu1 %v1669_v25  ;;  %v1663_v27 = vsel %vm851_vm2, %v4832_v26, 0.0 }
 0x944   : > { %1664 = vadd.xlane.f32.xlu1 %v1663_v27 }
 0x946   : > { %v4836_v30 = vpop.eup %4288 }
 0x947   : > { %v1678_v31 = vsel %vm851_vm2, %v4836_v30, 0.0  ;;  %v4840_v41 = vpop.eup %4290 }
 0x948   : > { %1679 = vadd.xlane.f32.xlu0 %v1678_v31  ;;  %v1672_v28 = vsel %vm851_vm2, %v4840_v41, 0.0  ;;  %v4850_v51 = vpop.eup %4292 }
 0x949   : > { %v1681_v52 = vsel %vm851_vm2, %v4850_v51, 0.0  ;;  %v4856_v53 = vpop.eup %4294 }
 0x94a   : > { %v1675_v57 = vsel %vm851_vm2, %v4856_v53, 0.0 }
 0x94c   : > { %1673 = vadd.xlane.f32.xlu0 %v1672_v28 }
 0x955   : > { %1708 = vrot.lane.b32.xlu1 %v4604_v2, %s4412_s26 }
 0x959   : > { %1706 = vrot.lane.b32.xlu1 %v4608_v3, %s4412_s26 }
 0x962   : > { %1710 = vrot.lane.b32.xlu0 %v4602_v0, %s4412_s26 }
 0x97d   : > { %1682 = vadd.xlane.f32.xlu1 %v1681_v52 }
 0x981   : > { %2001 = vmax.xlane.f32.xlu0 %v2000_v56  ;;  %1676 = vadd.xlane.f32.xlu1 %v1675_v57 }
 0x985   : > { %2007 = vmax.xlane.f32.xlu0 %v2006_v58 }
 0x989   : > { %2010 = vmax.xlane.f32.xlu0 %v2009_v62 }
 0x98d   : > { %2013 = vmax.xlane.f32.xlu0 %v2012_v63 }
 0x991   : > { %2019 = vmax.xlane.f32.xlu0 %v2018_v1 }
 0x992   : > { %1704 = vrot.lane.b32.xlu1 %v4598_v61, %s4412_s26 }
 0x9b6   : > { %2004 = vmax.xlane.f32.xlu1 %v2003_v8 }
 0x9ba   : > { %2016 = vmax.xlane.f32.xlu1 %v2015_v10 }
 0x9be   : > { %2022 = vmax.xlane.f32.xlu1 %v2021_v11 }
 0x9c5   : > { %v1668_v12 = vpop.xlane.xlu0 %1667 }
 0x9c9   : > { %v1662_v13 = vpop.xlane.xlu0 %1661  ;;  %v1671_v14 = vpop.xlane.xlu1 %1670 }
 0x9ca   : > { %4296 = vrcp.f32 %v1662_v13 }
 0x9cd   : > { %v1665_v15 = vpop.xlane.xlu1 %1664 }
 0x9ce   : > { %4298 = vrcp.f32 %v1665_v15 }
 0x9cf   : > { %4300 = vrcp.f32 %v1671_v14 }
 0x9d0   : > { %4302 = vrcp.f32 %v1668_v12 }
 0x9d1   : > { %v1680_v16 = vpop.xlane.xlu0 %1679  ;;  %v1709_v24 = vpop.permute.xlu1 %1708 }
 0x9d5   : > { %v1674_v17 = vpop.xlane.xlu0 %1673  ;;  %v1707_v43 = vpop.permute.xlu1 %1706 }
 0x9d7   : > { %v4297_v19 = vpop.eup %4296 }
 0x9d8   : > { %v1692_v31 = vmul.f32 %v4297_v19, %v4824_v22 }
 0x9d9   : > { %v1711_v25 = vpop.permute.xlu0 %1710 }
 0x9da   : > { %4051 = vmatprep.subr.bf16.mxu0 %v1711_v25 }
 0x9db   : > { %v4299_v27 = vpop.eup %4298  ;;  %4052 = vmatpush3.bf16.msra.mxu0 %v1711_v25  ;;  %v3707_v25 = vld [vmem:[%s5745_s4 + $0x8] sm:$0xf] }
 0x9dc   : > { %4053 = vmatprep.subr.bf16.mxu0 %v1709_v24  ;;  %v1693_v28 = vmul.f32 %v4299_v27, %v4832_v26  ;;  %v4301_v21 = vpop.eup %4300 }
 0x9dd   : > { %v4303_v22 = vpop.eup %4302  ;;  %v1695_v26 = vmul.f32 %v4301_v21, %v4826_v23 }
 0x9de   : > { %v1700_v42 = vpack.c.bf16 %v1693_v28, %v1692_v31  ;;  %v1694_v52 = vmul.f32 %v4303_v22, %v4820_v18  ;;  %v1812_v31 = vsel %vm1350_vm3, %v3707_v25, 0 }
 0x9df   : > { %4054 = vmatpush3.bf16.msra.mxu0 %v1709_v24 }
 0x9e0   : > { %4055 = vmatprep.subr.bf16.mxu0 %v1707_v43  ;;  %4059 = vmatprep.mubr.msk.bf16.mxu0 %vm851_vm2, %v1700_v42  ;;  %v1701_v56 = vpack.c.bf16 %v1695_v26, %v1694_v52 }
 0x9e3   : > { %4056 = vmatpush3.bf16.msra.mxu0 %v1707_v43 }
 0xa06   : > { %v1683_v44 = vpop.xlane.xlu1 %1682 }
 0xa07   : > { %4304 = vrcp.f32 %v1683_v44 }
 0xa08   : > { %4306 = vrcp.f32 %v1674_v17 }
 0xa09   : > { %4308 = vrcp.f32 %v1680_v16 }
 0xa0a   : > { %v2002_v45 = vpop.xlane.xlu0 %2001  ;;  %v1677_v46 = vpop.xlane.xlu1 %1676 }
 0xa0b   : > { %4310 = vrcp.f32 %v1677_v46  ;;  %v2024_v47 = vsub.f32 %v4852_v38, %v2002_v45 }
 0xa0d   : > { %v2032_v57 = vmul.f32 1.442695, %v2024_v47 }
 0xa0e   : > { %v2008_v50 = vpop.xlane.xlu0 %2007  ;;  %v1705_v29 = vpop.permute.xlu1 %1704 }
 0xa0f   : > { %v2026_v54 = vsub.f32 %v4858_v55, %v2008_v50  ;;  %4057 = vmatprep.subr.bf16.mxu0 %v1705_v29 }
 0xa10   : > { %4058 = vmatpush3.bf16.msra.mxu0 %v1705_v29 }
 0xa11   : > { %v2036_v39 = vmul.f32 1.442695, %v2026_v54  ;;  %4169 = vmatprep.subr.msk.bf16.mxu0 %vm1350_vm3, %v3707_v25 }
 0xa12   : > { %v2011_v58 = vpop.xlane.xlu0 %2010 }
 0xa13   : > { %4312 = vpow2.f32 %v2036_v39  ;;  %v2027_v59 = vsub.f32 %v4864_v48, %v2011_v58  ;;  %4060 = vmatmul.mubr.msk.bf16.vlgmr.msra.gmra.mxu0 %vm851_vm2, %v1701_v56 }
 0xa14   : > { %v4305_v23 = vpop.eup %4304  ;;  %4314 = vpow2.f32 %v2032_v57  ;;  %4068 = vmatpush3.bf16.msra.mxu0 %v1812_v31 }
 0xa15   : > { %v2038_v38 = vmul.f32 1.442695, %v2027_v59  ;;  %v4307_v62 = vpop.eup %4306  ;;  %v1699_v55 = vmul.f32 %v4305_v23, %v4850_v51 }
 0xa16   : > { %v2014_v63 = vpop.xlane.xlu0 %2013  ;;  %v4309_v1 = vpop.eup %4308  ;;  %v1696_v6 = vmul.f32 %v4307_v62, %v4840_v41 }
 0xa17   : > { %4316 = vpow2.f32 %v2038_v38  ;;  %v2028_v4 = vsub.f32 %v4868_v60, %v2014_v63  ;;  %v1698_v48 = vmul.f32 %v4309_v1, %v4836_v30 }
 0xa18   : > { %v4311_v18 = vpop.eup %4310 }
 0xa19   : > { %v1697_v8 = vmul.f32 %v4311_v18, %v4856_v53  ;;  %v1703_v13 = vpack.c.bf16 %v1699_v55, %v1698_v48  ;;  %v2040_v14 = vmul.f32 1.442695, %v2028_v4 }
 0xa1a   : > { %v2020_v10 = vpop.xlane.xlu0 %2019 }
 0xa1b   : > { %v2030_v11 = vsub.f32 %v4872_v49, %v2020_v10  ;;  %v1702_v12 = vpack.c.bf16 %v1697_v8, %v1696_v6 }
 0xa1d   : > { %v2044_v15 = vmul.f32 1.442695, %v2030_v11  ;;  %4063 = vmatprep.mubr.msk.bf16.mxu0 %vm851_vm2, %v1702_v12 }
 0xa1e   : > { %4064 = vmatmul.mubr.msk.bf16.gmra.mxu0 %vm851_vm2, %v1703_v13 }
 0xa1f   : > { %4318 = vpow2.f32 %v2044_v15 }
 0xa20   : > { %v4909_v51 = vpop.eup %4312  ;;  %4320 = vpow2.f32 %v2040_v14 }
 0xa21   : > { %v2054_v41 = vsel %vm851_vm2, %v4909_v51, 0.0  ;;  %v4913_v53 = vpop.eup %4314 }
 0xa22   : > { %2055 = vadd.xlane.f32.xlu0 %v2054_v41  ;;  %v2048_v60 = vsel %vm851_vm2, %v4913_v53, 0.0 }
 0xa24   : > { %v4915_v30 = vpop.eup %4316 }
 0xa25   : > { %v2057_v49 = vsel %vm851_vm2, %v4915_v30, 0.0 }
 0xa26   : > { %2049 = vadd.xlane.f32.xlu0 %v2048_v60  ;;  %2058 = vadd.xlane.f32.xlu1 %v2057_v49 }
 0xa2c   : > { %v4921_v16 = vpop.eup %4318 }
 0xa2d   : > { %v2066_v17 = vsel %vm851_vm2, %v4921_v16, 0.0  ;;  %v4925_v19 = vpop.eup %4320 }
 0xa2e   : > { %2067 = vadd.xlane.f32.xlu0 %v2066_v17  ;;  %v2060_v24 = vsel %vm851_vm2, %v4925_v19, 0.0 }
 0xa32   : > { %2061 = vadd.xlane.f32.xlu0 %v2060_v24 }
 0xa3f   : > { %v2005_v27 = vpop.xlane.xlu1 %2004 }
 0xa40   : > { %v2025_v28 = vsub.f32 %v4880_v5, %v2005_v27 }
 0xa42   : > { %v2034_v42 = vmul.f32 1.442695, %v2025_v28 }
 0xa43   : > { %v2017_v21 = vpop.xlane.xlu1 %2016 }
 0xa44   : > { %4322 = vpow2.f32 %v2034_v42  ;;  %v2029_v46 = vsub.f32 %v4882_v7, %v2017_v21 }
 0xa46   : > { %v2042_v26 = vmul.f32 1.442695, %v2029_v46 }
 0xa47   : > { %v2023_v45 = vpop.xlane.xlu1 %2022 }
 0xa48   : > { %2098 = vrot.lane.b32.xlu0 %v4602_v0, %s4413_s30  ;;  %v2031_v5 = vsub.f32 %v4886_v9, %v2023_v45  ;;  %v4953_v9 = vpop.f32.mrf.mxu0 }
 0xa4a   : > { %v2046_v22 = vmul.f32 1.442695, %v2031_v5  ;;  %v4955_v52 = vpop.f32.mrf.mxu0 }
 0xa4c   : > { %4324 = vpow2.f32 %v2046_v22  ;;  %v4957_v56 = vpop.f32.mrf.mxu0 }
 0xa4d   : > { %4326 = vpow2.f32 %v2042_v26 }
 0xa4e   : > { %v4959_v39 = vpop.f32.mrf.mxu0 }
 0xa50   : > { %v4961_v58 = vpop.f32.mrf.mxu0 }
 0xa51   : > { %v4936_v43 = vpop.eup %4322 }
 0xa52   : > { %v2051_v44 = vsel %vm851_vm2, %v4936_v43, 0.0  ;;  %v4963_v59 = vpop.f32.mrf.mxu0 }
 0xa53   : > { %2052 = vadd.xlane.f32.xlu1 %v2051_v44 }
 0xa54   : > { %v4965_v23 = vpop.f32.mrf.mxu0 }
 0xa59   : > { %v4944_v0 = vpop.eup %4324 }
 0xa5a   : > { %v2069_v47 = vsel %vm851_vm2, %v4944_v0, 0.0  ;;  %v4948_v50 = vpop.eup %4326 }
 0xa64   : > { %2096 = vrot.lane.b32.xlu1 %v4604_v2, %s4413_s30  ;;  %v2063_v2 = vsel %vm851_vm2, %v4948_v50, 0.0 }
 0xa68   : > { %2094 = vrot.lane.b32.xlu1 %v4608_v3, %s4413_s30 }
 0xa8c   : > { %2070 = vadd.xlane.f32.xlu1 %v2069_v47 }
 0xa90   : > { %2064 = vadd.xlane.f32.xlu1 %v2063_v2 }
 0xaa1   : > { %2092 = vrot.lane.b32.xlu1 %v4598_v61, %s4413_s30  ;;  %v4967_v61 = vpop.f32.mrf.mxu0 }
 0xaab   : > { %v2056_v3 = vpop.xlane.xlu0 %2055 }
 0xaaf   : > { %v2050_v7 = vpop.xlane.xlu0 %2049  ;;  %v2059_v1 = vpop.xlane.xlu1 %2058 }
 0xab0   : > { %4328 = vrcp.f32 %v2050_v7 }
 0xab7   : > { %v2068_v29 = vpop.xlane.xlu0 %2067 }
 0xabb   : > { %v2062_v54 = vpop.xlane.xlu0 %2061 }
 0xabd   : > { %v4329_v41 = vpop.eup %4328 }
 0xabe   : > { %v2080_v49 = vmul.f32 %v4329_v41, %v4913_v53 }
 0xabf   : > { %v2099_v57 = vpop.permute.xlu0 %2098 }
 0xac0   : > { %4093 = vmatprep.subr.bf16.mxu0 %v2099_v57 }
 0xad3   : > { %v4061_v38 = vpop.f32.mrf.mxu0 }
 0xad5   : > { %v1762_v62 = vpop.f32.mrf.mxu0 }
 0xad7   : > { %v4062_v63 = vpop.f32.mrf.mxu0 }
 0xad8   : > { %v1794_v4 = vpack.c.bf16 %v4062_v63, %v4061_v38 }
 0xad9   : > { %v1765_v18 = vpop.f32.mrf.mxu0 }
 0xada   : > { %v1793_v55 = vpack.c.bf16 %v1765_v18, %v1762_v62  ;;  %v1472_v62 = vadd.f32 %v4959_v39, %v4802_v34  ;;  %v1488_v34 = vadd.f32 %v4967_v61, %v4810_v40 }
 0xadc   : > { %4069 = vmatprep.mubr.msk.bf16.mxu0 %vm753_vm1, %v1793_v55  ;;  %v2053_v6 = vpop.xlane.xlu1 %2052 }
 0xadd   : > { %4330 = vrcp.f32 %v2053_v6  ;;  %4070 = vmatmul.mubr.msk.bf16.vlgmr.msra.gmra.mxu0 %vm753_vm1, %v1794_v4 }
 0xade   : > { %4094 = vmatpush3.bf16.msra.mxu0 %v2099_v57  ;;  %v4065_v8 = vpop.f32.mrf.mxu0  ;;  %4332 = vrcp.f32 %v2059_v1 }
 0xadf   : > { %4334 = vrcp.f32 %v2056_v3 }
 0xae0   : > { %v1778_v10 = vpop.f32.mrf.mxu0  ;;  %v2097_v48 = vpop.permute.xlu1 %2096 }
 0xae1   : > { %4095 = vmatprep.subr.bf16.mxu0 %v2097_v48 }
 0xae2   : > { %v4066_v11 = vpop.f32.mrf.mxu0  ;;  %4096 = vmatpush3.bf16.msra.mxu0 %v2097_v48 }
 0xae3   : > { %v1796_v15 = vpack.c.bf16 %v4066_v11, %v4065_v8 }
 0xae4   : > { %v1781_v12 = vpop.f32.mrf.mxu0  ;;  %v2095_v13 = vpop.permute.xlu1 %2094 }
 0xae5   : > { %v1795_v14 = vpack.c.bf16 %v1781_v12, %v1778_v10  ;;  %4097 = vmatprep.subr.bf16.mxu0 %v2095_v13 }
 0xae6   : > { %4098 = vmatpush3.bf16.msra.mxu0 %v2095_v13 }
 0xae7   : > { %4073 = vmatprep.mubr.msk.bf16.mxu0 %vm753_vm1, %v1795_v14 }
 0xae8   : > { %4074 = vmatmul.mubr.msk.bf16.gmra.mxu0 %vm753_vm1, %v1796_v15 }
 0xaea   : > { %v4331_v60 = vpop.eup %4330 }
 0xaeb   : > { %v2081_v17 = vmul.f32 %v4331_v60, %v4936_v43  ;;  %v4333_v27 = vpop.eup %4332 }
 0xaec   : > { %v4335_v28 = vpop.eup %4334  ;;  %v2083_v42 = vmul.f32 %v4333_v27, %v4915_v30 }
 0xaed   : > { %v2088_v24 = vpack.c.bf16 %v2081_v17, %v2080_v49  ;;  %v2082_v53 = vmul.f32 %v4335_v28, %v4909_v51  ;;  %v3720_v51 = vld [vmem:[%s5745_s4 + $0xc] sm:$0xf]  ;;  %v4360_v49 = vld [vmem:[%s4511_s24 + $0x10] sm:$0xff]  ;;  %v3725_v28 = vld [vmem:[%s5746_s5] ss:$0 sm:$0xff] }
 0xaef   : > { %4101 = vmatprep.mubr.msk.bf16.mxu0 %vm851_vm2, %v2088_v24  ;;  %v2089_v43 = vpack.c.bf16 %v2083_v42, %v2082_v53  ;;  %v4361_v24 = vld [vmem:[%s4511_s24] sm:$0xff]  ;;  %v4362_v53 = vld [vmem:[%s4511_s24 + $0x18] sm:$0xff] }
 0xb15   : > { %v2071_v25 = vpop.xlane.xlu1 %2070 }
 0xb16   : > { %4336 = vrcp.f32 %v2071_v25 }
 0xb17   : > { %4338 = vrcp.f32 %v2062_v54  ;;  %v1480_v54 = vadd.f32 %v4957_v56, %v4800_v20  ;;  %v1496_v20 = vadd.f32 %v4965_v23, %v4808_v37 }
 0xb18   : > { %4340 = vrcp.f32 %v2068_v29 }
 0xb19   : > { %v2065_v31 = vpop.xlane.xlu1 %2064 }
 0xb1a   : > { %4342 = vrcp.f32 %v2065_v31 }
 0xb1d   : > { %v2093_v44 = vpop.permute.xlu1 %2092 }
 0xb1e   : > { %4099 = vmatprep.subr.bf16.mxu0 %v2093_v44 }
 0xb1f   : > { %4100 = vmatpush3.bf16.msra.mxu0 %v2093_v44 }
 0xb20   : > { %4174 = vmatprep.subr.msk.bf16.mxu0 %vm1350_vm3, %v3720_v51 }
 0xb22   : > { %4102 = vmatmul.mubr.msk.bf16.vlgmr.msra.gmra.mxu0 %vm851_vm2, %v2089_v43 }
 0xb23   : > { %v4337_v21 = vpop.eup %4336 }
 0xb24   : > { %v4339_v45 = vpop.eup %4338  ;;  %v2087_v22 = vmul.f32 %v4337_v21, %v4944_v0  ;;  %v2200_v0 = vsel %vm1350_vm3, %v3720_v51, 0  ;;  %v4363_v21 = vld [vmem:[%s4511_s24 + $0x8] sm:$0xff] }
 0xb25   : > { %v4341_v5 = vpop.eup %4340  ;;  %v2084_v26 = vmul.f32 %v4339_v45, %v4925_v19  ;;  %4110 = vmatpush3.bf16.msra.mxu0 %v2200_v0  ;;  %v1477_v19 = vadd.f32 %v4953_v9, %v4796_v32  ;;  %v1493_v32 = vadd.f32 %v4961_v58, %v4804_v35 }
 0xb26   : > { %v2086_v30 = vmul.f32 %v4341_v5, %v4921_v16  ;;  %v1469_v16 = vadd.f32 %v4955_v52, %v4798_v33  ;;  %v1485_v33 = vadd.f32 %v4963_v59, %v4806_v36 }
 0xb27   : > { %v4343_v46 = vpop.eup %4342 }
 0xb28   : > { %v2085_v47 = vmul.f32 %v4343_v46, %v4948_v50  ;;  %v2091_v3 = vpack.c.bf16 %v2087_v22, %v2086_v30 }
 0xb2a   : > { %v2090_v2 = vpack.c.bf16 %v2085_v47, %v2084_v26 }
 0xb2c   : > { %4105 = vmatprep.mubr.msk.bf16.mxu0 %vm851_vm2, %v2090_v2 }
 0xb2d   : > { %4106 = vmatmul.mubr.msk.bf16.gmra.mxu0 %vm851_vm2, %v2091_v3 }
 0xb9d   : > { %v4071_v50 = vpop.f32.mrf.mxu0 }
 0xb9e   : > { %v1881_v7 = vadd.f32 %v4071_v50, %v1477_v19  ;;  %v4364_v50 = vld [vmem:[%s4511_s24 + $0x20] sm:$0xff] }
 0xb9f   : > { %v1848_v29 = vpop.f32.mrf.mxu0 }
 0xba0   : > { %v1879_v57 = vadd.f32 %v1848_v29, %v1469_v16  ;;  %v4365_v29 = vld [vmem:[%s4511_s24 + $0x30] sm:$0xff] }
 0xba1   : > { %v4072_v38 = vpop.f32.mrf.mxu0 }
 0xba2   : > { %v1882_v63 = vadd.f32 %v4072_v38, %v1480_v54 }
 0xba3   : > { %v1851_v1 = vpop.f32.mrf.mxu0 }
 0xba4   : > { %v1880_v18 = vadd.f32 %v1851_v1, %v1472_v62  ;;  %v4366_v1 = vld [vmem:[%s4511_s24 + $0x38] sm:$0xff] }
 0xba8   : > { %v4075_v9 = vpop.f32.mrf.mxu0 }
 0xba9   : > { %v1885_v52 = vadd.f32 %v4075_v9, %v1493_v32  ;;  %v4367_v32 = vld [vmem:[%s4511_s24 + $0x28] sm:$0xff] }
 0xbaa   : > { %v1864_v55 = vpop.f32.mrf.mxu0 }
 0xbab   : > { %v1883_v56 = vadd.f32 %v1864_v55, %v1485_v33 }
 0xbac   : > { %v4076_v4 = vpop.f32.mrf.mxu0 }
 0xbad   : > { %v1886_v39 = vadd.f32 %v4076_v4, %v1496_v20 }
 0xbae   : > { %v1867_v6 = vpop.f32.mrf.mxu0 }
 0xbaf   : > { %v1884_v8 = vadd.f32 %v1867_v6, %v1488_v34 }
 0xbe2   : > { %v4103_v10 = vpop.f32.mrf.mxu0 }
 0xbe4   : > { %v2150_v48 = vpop.f32.mrf.mxu0 }
 0xbe6   : > { %v4104_v35 = vpop.f32.mrf.mxu0 }
 0xbe7   : > { %v2182_v12 = vpack.c.bf16 %v4104_v35, %v4103_v10 }
 0xbe8   : > { %v2153_v58 = vpop.f32.mrf.mxu0 }
 0xbe9   : > { %v2181_v11 = vpack.c.bf16 %v2153_v58, %v2150_v48 }
 0xbeb   : > { %4111 = vmatprep.mubr.msk.bf16.mxu0 %vm753_vm1, %v2181_v11 }
 0xbec   : > { %4112 = vmatmul.mubr.msk.bf16.vlgmr.msra.gmra.mxu0 %vm753_vm1, %v2182_v12 }
 0xbed   : > { %v4107_v36 = vpop.f32.mrf.mxu0 }
 0xbef   : > { %v2166_v37 = vpop.f32.mrf.mxu0 }
 0xbf1   : > { %v4108_v59 = vpop.f32.mrf.mxu0 }
 0xbf2   : > { %v2184_v61 = vpack.c.bf16 %v4108_v59, %v4107_v36 }
 0xbf3   : > { %v2169_v23 = vpop.f32.mrf.mxu0 }
 0xbf4   : > { %v2183_v40 = vpack.c.bf16 %v2169_v23, %v2166_v37 }
 0xbf6   : > { %4115 = vmatprep.mubr.msk.bf16.mxu0 %vm753_vm1, %v2183_v40 }
 0xbf7   : > { %4116 = vmatmul.mubr.msk.bf16.gmra.mxu0 %vm753_vm1, %v2184_v61 }
 0xcac   : > { %v4113_v13 = vpop.f32.mrf.mxu0 }
 0xcad   : > { %v2269_v14 = vadd.f32 %v4113_v13, %v1881_v7 }
 0xcae   : > { %v2236_v15 = vpop.f32.mrf.mxu0 }
 0xcaf   : > { %v2267_v41 = vadd.f32 %v2236_v15, %v1879_v57  ;;  %v2277_v17 = vadd.f32 %v4360_v49, %v2269_v14 }
 0xcb0   : > { %v4114_v60 = vpop.f32.mrf.mxu0 }
 0xcb1   : > { %v2275_v25 = vadd.f32 %v4361_v24, %v2267_v41  ;;  %v2270_v27 = vadd.f32 %v4114_v60, %v1882_v63  ;;  %v5021_v46 = vadd.f32 %v3725_v28, %v2277_v17 }
 0xcb2   : > { %v2239_v31 = vpop.f32.mrf.mxu0 }
 0xcb3   : > { %v2268_v42 = vadd.f32 %v2239_v31, %v1880_v18  ;;  %v5015_v44 = vadd.f32 %v3725_v28, %v2275_v25  ;;  %v2278_v43 = vadd.f32 %v4362_v53, %v2270_v27  ;;  %v2306_v2 = vsel %vm506_vm0, %v5021_v46, 0.0 }
 0xcb5   : > { %5764 = vst [vmem:[#allocation3_spill] sm:$0xff] %v5015_v44  ;;  %v2276_v45 = vadd.f32 %v4363_v21, %v2268_v42  ;;  %v2300_v5 = vsel %vm506_vm0, %v5015_v44, 0.0  ;;  %v5029_v51 = vadd.f32 %v3725_v28, %v2278_v43 }
 0xcb6   : > { %2301 = vadd.xlane.f32.xlu0 %v2300_v5 }
 0xcb7   : > { %v4117_v22 = vpop.f32.mrf.mxu0  ;;  %v5023_v26 = vadd.f32 %v3725_v28, %v2276_v45  ;;  %5766 = vst [vmem:[#allocation5_spill] sm:$0xff] %v5029_v51  ;;  %v2309_v38 = vsel %vm506_vm0, %v5029_v51, 0.0 }
 0xcb8   : > { %v2273_v47 = vadd.f32 %v4117_v22, %v1885_v52 }
 0xcb9   : > { %5765 = vst [vmem:[#allocation4_spill] sm:$0xff] %v5023_v26  ;;  %v2252_v30 = vpop.f32.mrf.mxu0  ;;  %v2303_v3 = vsel %vm506_vm0, %v5023_v26, 0.0 }
 0xcba   : > { %v2271_v0 = vadd.f32 %v2252_v30, %v1883_v56  ;;  %2307 = vadd.xlane.f32.xlu0 %v2306_v2  ;;  %2304 = vadd.xlane.f32.xlu1 %v2303_v3  ;;  %v2281_v54 = vadd.f32 %v4365_v29, %v2273_v47 }
 0xcbb   : > { %v4118_v19 = vpop.f32.mrf.mxu0 }
 0xcbc   : > { %v2279_v16 = vadd.f32 %v4364_v50, %v2271_v0  ;;  %v2274_v7 = vadd.f32 %v4118_v19, %v1886_v39  ;;  %v5041_v52 = vadd.f32 %v3725_v28, %v2281_v54  ;;  %v4198_v50 = vld [vmem:[%s5749_s8 + $0x8] sm:$0xff]  }
 0xcbd   : > { %v2255_v57 = vpop.f32.mrf.mxu0  ;;  %4119 = vmatprep.subr.bf16.mxu1 %v4198_v50 }
 0xcbe   : > { %v2272_v62 = vadd.f32 %v2255_v57, %v1884_v8  ;;  %2310 = vadd.xlane.f32.xlu0 %v2309_v38  ;;  %v5035_v63 = vadd.f32 %v3725_v28, %v2279_v16  ;;  %v2282_v18 = vadd.f32 %v4366_v1, %v2274_v7  ;;  %5768 = vst [vmem:[#allocation7_spill] sm:$0xff] %v5041_v52  ;;  %v2318_v4 = vsel %vm506_vm0, %v5041_v52, 0.0  ;;  %v4199_v16 = vld [vmem:[%s5749_s8] sm:$0xff]  }
 0xcbf   : > { %4120 = vmatpush3.bf16.msra.mxu1 %v4198_v50 }
 0xcc0   : > { %5767 = vst [vmem:[#allocation6_spill] sm:$0xff] %v5035_v63  ;;  %v2280_v9 = vadd.f32 %v4367_v32, %v2272_v62  ;;  %v2312_v33 = vsel %vm506_vm0, %v5035_v63, 0.0  ;;  %v5047_v56 = vadd.f32 %v3725_v28, %v2282_v18  ;;  %4121 = vmatprep.subr.bf16.mxu1 %v4199_v16 }
 0xcc2   : > { %2313 = vadd.xlane.f32.xlu0 %v2312_v33  ;;  %v5043_v55 = vadd.f32 %v3725_v28, %v2280_v9  ;;  %5770 = vst [vmem:[#allocation9_spill] sm:$0xff] %v5047_v56  ;;  %v2321_v34 = vsel %vm506_vm0, %v5047_v56, 0.0 }
 0xcc3   : > { %4122 = vmatpush3.bf16.msra.mxu1 %v4199_v16 }
 0xcc4   : > { %5769 = vst [vmem:[#allocation8_spill] sm:$0xff] %v5043_v55  ;;  %v2315_v20 = vsel %vm506_vm0, %v5043_v55, 0.0 }
 0xcc5   : > { %2316 = vadd.xlane.f32.xlu1 %v2315_v20 }
 0xcc6   : > { %2319 = vadd.xlane.f32.xlu0 %v2318_v4 }
 0xcc9   : > { %2322 = vadd.xlane.f32.xlu1 %v2321_v34 }
 0xd3f   : > { %v2302_v39 = vpop.xlane.xlu0 %2301 }
 0xd40   : > { %v2324_v6 = vmul.f32 0.03125, %v2302_v39 }
 0xd42   : > { %v5054_v8 = vsub.f32 %v5015_v44, %v2324_v6 }
 0xd43   : > { %v2308_v10 = vpop.xlane.xlu0 %2307  ;;  %v2305_v48 = vpop.xlane.xlu1 %2304 }
 0xd44   : > { %v2326_v35 = vmul.f32 0.03125, %v2308_v10  ;;  %v2325_v58 = vmul.f32 0.03125, %v2305_v48  ;;  %v2340_v11 = vmul.f32 %v5054_v8, %v5054_v8 }
 0xd46   : > { %v5059_v12 = vsub.f32 %v5021_v46, %v2326_v35  ;;  %v5062_v36 = vsub.f32 %v5023_v26, %v2325_v58  ;;  %v2348_v37 = vsel %vm506_vm0, %v2340_v11, 0.0 }
 0xd47   : > { %v2311_v59 = vpop.xlane.xlu0 %2310  ;;  %2349 = vadd.xlane.f32.xlu0 %v2348_v37 }
 0xd48   : > { %v2327_v23 = vmul.f32 0.03125, %v2311_v59  ;;  %v2342_v40 = vmul.f32 %v5059_v12, %v5059_v12  ;;  %v2341_v61 = vmul.f32 %v5062_v36, %v5062_v36 }
 0xd4a   : > { %v5070_v13 = vsub.f32 %v5029_v51, %v2327_v23  ;;  %v2354_v14 = vsel %vm506_vm0, %v2342_v40, 0.0  ;;  %v2351_v15 = vsel %vm506_vm0, %v2341_v61, 0.0  ;;  %v3726_v61 = vld [vmem:[%s5747_s6] ss:$0 sm:$0xff] }
 0xd4b   : > { %2355 = vadd.xlane.f32.xlu0 %v2354_v14  ;;  %v2314_v41 = vpop.xlane.xlu0 %2313  ;;  %2352 = vadd.xlane.f32.xlu1 %v2351_v15 }
 0xd4c   : > { %v2328_v60 = vmul.f32 0.03125, %v2314_v41  ;;  %v2343_v49 = vmul.f32 %v5070_v13, %v5070_v13 }
 0xd4e   : > { %v5077_v17 = vsub.f32 %v5035_v63, %v2328_v60  ;;  %v2317_v24 = vpop.xlane.xlu1 %2316  ;;  %v2357_v25 = vsel %vm506_vm0, %v2343_v49, 0.0 }
 0xd4f   : > { %v2329_v27 = vmul.f32 0.03125, %v2317_v24  ;;  %v2320_v31 = vpop.xlane.xlu0 %2319  ;;  %2358 = vadd.xlane.f32.xlu1 %v2357_v25  ;;  %v3727_v25 = vld [vmem:[%s5748_s7] ss:$0 sm:$0xff] }
 0xd50   : > { %v2330_v28 = vmul.f32 0.03125, %v2320_v31  ;;  %v2344_v42 = vmul.f32 %v5077_v17, %v5077_v17 }
 0xd51   : > { %v5083_v53 = vsub.f32 %v5043_v55, %v2329_v27 }
 0xd52   : > { %v5086_v43 = vsub.f32 %v5041_v52, %v2330_v28  ;;  %v2323_v21 = vpop.xlane.xlu1 %2322  ;;  %v2360_v45 = vsel %vm506_vm0, %v2344_v42, 0.0 }
 0xd53   : > { %v2331_v5 = vmul.f32 0.03125, %v2323_v21  ;;  %2361 = vadd.xlane.f32.xlu0 %v2360_v45  ;;  %v2345_v22 = vmul.f32 %v5083_v53, %v5083_v53 }
 0xd54   : > { %v2346_v47 = vmul.f32 %v5086_v43, %v5086_v43 }
 0xd55   : > { %v5094_v30 = vsub.f32 %v5047_v56, %v2331_v5  ;;  %v2363_v2 = vsel %vm506_vm0, %v2345_v22, 0.0 }
 0xd56   : > { %2364 = vadd.xlane.f32.xlu1 %v2363_v2  ;;  %v2366_v3 = vsel %vm506_vm0, %v2346_v47, 0.0 }
 0xd57   : > { %2367 = vadd.xlane.f32.xlu0 %v2366_v3  ;;  %v2347_v0 = vmul.f32 %v5094_v30, %v5094_v30 }
 0xd59   : > { %v2369_v19 = vsel %vm506_vm0, %v2347_v0, 0.0 }
 0xd5a   : > { %2370 = vadd.xlane.f32.xlu1 %v2369_v19 }
 0xdd0   : > { %v2350_v7 = vpop.xlane.xlu0 %2349 }
 0xdd1   : > { %v2372_v29 = vmul.f32 0.03125, %v2350_v7 }
 0xdd3   : > { %v2380_v54 = vadd.f32 1e-05, %v2372_v29 }
 0xdd4   : > { %v2356_v57 = vpop.xlane.xlu0 %2355  ;;  %v2353_v38 = vpop.xlane.xlu1 %2352 }
 0xdd5   : > { %4344 = vrsqrt.f32 %v2380_v54  ;;  %v2374_v62 = vmul.f32 0.03125, %v2356_v57  ;;  %v2373_v1 = vmul.f32 0.03125, %v2353_v38 }
 0xdd7   : > { %v2382_v18 = vadd.f32 1e-05, %v2374_v62  ;;  %v2381_v32 = vadd.f32 1e-05, %v2373_v1 }
 0xdd8   : > { %v2359_v9 = vpop.xlane.xlu1 %2358 }
 0xdd9   : > { %4346 = vrsqrt.f32 %v2382_v18  ;;  %v2375_v33 = vmul.f32 0.03125, %v2359_v9 }
 0xdda   : > { %4348 = vrsqrt.f32 %v2381_v32 }
 0xddb   : > { %v2383_v20 = vadd.f32 1e-05, %v2375_v33 }
 0xddc   : > { %v2362_v4 = vpop.xlane.xlu0 %2361 }
 0xddd   : > { %4350 = vrsqrt.f32 %v2383_v20  ;;  %v2376_v34 = vmul.f32 0.03125, %v2362_v4 }
 0xddf   : > { %v2384_v39 = vadd.f32 1e-05, %v2376_v34  ;;  %v2365_v6 = vpop.xlane.xlu1 %2364 }
 0xde0   : > { %v2377_v10 = vmul.f32 0.03125, %v2365_v6  ;;  %v2368_v48 = vpop.xlane.xlu0 %2367 }
 0xde1   : > { %4352 = vrsqrt.f32 %v2384_v39  ;;  %v2378_v35 = vmul.f32 0.03125, %v2368_v48 }
 0xde2   : > { %v4345_v58 = vpop.eup %4344  ;;  %v2385_v11 = vadd.f32 1e-05, %v2377_v10 }
 0xde3   : > { %v2386_v37 = vadd.f32 1e-05, %v2378_v35  ;;  %v2371_v59 = vpop.xlane.xlu1 %2370  ;;  %v2396_v40 = vmul.f32 %v4345_v58, %v5054_v8 }
 0xde4   : > { %4354 = vrsqrt.f32 %v2385_v11  ;;  %v2379_v23 = vmul.f32 0.03125, %v2371_v59 }
 0xde5   : > { %4356 = vrsqrt.f32 %v2386_v37  ;;  %v2410_v24 = vmul.f32 %v3726_v61, %v2396_v40 }
 0xde6   : > { %v4347_v14 = vpop.eup %4346  ;;  %v2387_v15 = vadd.f32 1e-05, %v2379_v23 }
 0xde7   : > { %v4349_v41 = vpop.eup %4348  ;;  %v2398_v60 = vmul.f32 %v4347_v14, %v5059_v12  ;;  %v2424_v42 = vadd.f32 %v3727_v25, %v2410_v24 }
 0xde8   : > { %4358 = vrsqrt.f32 %v2387_v15  ;;  %v2397_v49 = vmul.f32 %v4349_v41, %v5062_v36 }
 0xde9   : > { %v2412_v31 = vmul.f32 %v3726_v61, %v2398_v60 }
 0xdea   : > { %v4351_v27 = vpop.eup %4350  ;;  %v2411_v8 = vmul.f32 %v3726_v61, %v2397_v49 }
 0xdeb   : > { %v2399_v28 = vmul.f32 %v4351_v27, %v5070_v13  ;;  %v2426_v47 = vadd.f32 %v3727_v25, %v2412_v31 }
 0xdec   : > { %v2425_v21 = vadd.f32 %v3727_v25, %v2411_v8 }
 0xded   : > { %v2413_v45 = vmul.f32 %v3726_v61, %v2399_v28 }
 0xdee   : > { %v4353_v5 = vpop.eup %4352  ;;  %v2432_v22 = vpack.c.bf16 %v2425_v21, %v2424_v42 }
 0xdef   : > { %v2427_v12 = vadd.f32 %v3727_v25, %v2413_v45  ;;  %v2400_v2 = vmul.f32 %v4353_v5, %v5077_v17 }
 0xdf0   : > { %4123 = vmatprep.mubr.msk.bf16.mxu1 %vm506_vm0, %v2432_v22 }
 0xdf1   : > { %v4355_v36 = vpop.eup %4354  ;;  %v2433_v3 = vpack.c.bf16 %v2427_v12, %v2426_v47  ;;  %v2414_v50 = vmul.f32 %v3726_v61, %v2400_v2 }
 0xdf2   : > { %v4357_v0 = vpop.eup %4356  ;;  %v2401_v19 = vmul.f32 %v4355_v36, %v5083_v53  ;;  %v3728_v53 = vld [vmem:[%s5750_s9] ss:$0 sm:$0xff] }
 0xdf3   : > { %4124 = vmatmul.mubr.msk.bf16.vlgmr.msra.gmra.mxu1 %vm506_vm0, %v2433_v3  ;;  %v2402_v13 = vmul.f32 %v4357_v0, %v5086_v43  ;;  %v2428_v29 = vadd.f32 %v3727_v25, %v2414_v50 }
 0xdf4   : > { %v2415_v16 = vmul.f32 %v3726_v61, %v2401_v19 }
 0xdf5   : > { %v4359_v7 = vpop.eup %4358  ;;  %v2416_v38 = vmul.f32 %v3726_v61, %v2402_v13 }
 0xdf6   : > { %v2429_v54 = vadd.f32 %v3727_v25, %v2415_v16  ;;  %v2403_v57 = vmul.f32 %v4359_v7, %v5094_v30 }
 0xdf7   : > { %v2430_v1 = vadd.f32 %v3727_v25, %v2416_v38 }
 0xdf8   : > { %v2434_v17 = vpack.c.bf16 %v2429_v54, %v2428_v29  ;;  %v2417_v62 = vmul.f32 %v3726_v61, %v2403_v57 }
 0xdfa   : > { %4127 = vmatprep.mubr.msk.bf16.mxu1 %vm506_vm0, %v2434_v17  ;;  %v2431_v18 = vadd.f32 %v3727_v25, %v2417_v62 }
 0xdfc   : > { %v2435_v32 = vpack.c.bf16 %v2431_v18, %v2430_v1 }
 0xdfe   : > { %4128 = vmatmul.mubr.msk.bf16.gmra.mxu1 %vm506_vm0, %v2435_v32 }
 0xeb3   : > { %v4125_v43 = vpop.f32.mrf.mxu1 }
 0xeb4   : > { %v5128_v9 = vadd.f32 %v4125_v43, %v3728_v53 }
 0xeb5   : > { %v2505_v33 = vpop.f32.mrf.mxu1 }
 0xeb6   : > { %v5130_v20 = vadd.f32 %v3728_v53, %v2505_v33 }
 0xeb7   : > { %v4126_v30 = vpop.f32.mrf.mxu1 }
 0xeb8   : > { %v5132_v4 = vadd.f32 %v4126_v30, %v3728_v53 }
 0xeb9   : > { %v2508_v34 = vpop.f32.mrf.mxu1 }
 0xeba   : > { %v5134_v39 = vadd.f32 %v3728_v53, %v2508_v34 }
 0xebe   : > { %v4129_v6 = vpop.f32.mrf.mxu1 }
 0xebf   : > { %v5136_v10 = vadd.f32 %v4129_v6, %v3728_v53 }
 0xec0   : > { %v2521_v48 = vpop.f32.mrf.mxu1 }
 0xec1   : > { %v5138_v35 = vadd.f32 %v3728_v53, %v2521_v48  ;;  %2539 = sbr.rel (%p3735_p4) target bundleno = 3789 (0xecd), region = 84 }
 0xec2   : > { %v4130_v58 = vpop.f32.mrf.mxu1 }
 0xec3   : > { %v5140_v11 = vadd.f32 %v4130_v58, %v3728_v53 }
 0xec4   : > { %v2524_v37 = vpop.f32.mrf.mxu1 }
 0xec5   : > { %v5142_v59 = vadd.f32 %v3728_v53, %v2524_v37 }
 0xec6   : > { %v4414_v23 = vmov 0.0  }
 0xec7   : > { %2540 = vst [vmem:[#allocation2] sm:$0xff] %v4414_v23  ;;  %2541 = vst [vmem:[#allocation2 + $0x8] sm:$0xff] %v4414_v23 }
 0xec8   : > { %2542 = vst [vmem:[#allocation2 + $0x10] sm:$0xff] %v4414_v23  ;;  %2543 = vst [vmem:[#allocation2 + $0x18] sm:$0xff] %v4414_v23 }
 0xec9   : > { %2544 = vst [vmem:[#allocation2 + $0x20] sm:$0xff] %v4414_v23  ;;  %2545 = vst [vmem:[#allocation2 + $0x28] sm:$0xff] %v4414_v23 }
 0xeca   : > { %2546 = vst [vmem:[#allocation2 + $0x30] sm:$0xff] %v4414_v23  ;;  %2547 = vst [vmem:[#allocation2 + $0x38] sm:$0xff] %v4414_v23 }
 0xecb   : > { %2548 = vst [vmem:[#allocation2 + $0x40] sm:$0xff] %v4414_v23  ;;  %2549 = vst [vmem:[#allocation2 + $0x48] sm:$0xff] %v4414_v23 }
 0xecc   : > { %2550 = vst [vmem:[#allocation2 + $0x50] sm:$0xff] %v4414_v23  ;;  %2551 = vst [vmem:[#allocation2 + $0x58] sm:$0xff] %v4414_v23 }
 0xecd PF: > { %v3737_v40 = vld [vmem:[%s5753_s12 + $0x40] sm:$0xff]  ;;  %2552 = vst [vmem:[#allocation2 + $0x10] sm:$0xff] %v5130_v20  ;;  %2553 = vst [vmem:[#allocation2 + $0x18] sm:$0xff] %v5134_v39  ;;  %v4415_v14 = vmov 0   ;;  %v3738_v15 = vld [vmem:[%s5753_s12 + $0x48] sm:$0xff] }
 0xece   : > { %v2568_v61 = vld [vmem:[%s5753_s12] sm:$0xff]  ;;  %2554 = vst [vmem:[#allocation2 + $0x20] sm:$0xff] %v5128_v9  ;;  %2555 = vst [vmem:[#allocation2 + $0x28] sm:$0xff] %v5132_v4  ;;  %4369 = vset.pattern.permute.xlu1 %v4415_v14  ;;  %4368 = vset.pattern.permute.xlu0 %v4415_v14  ;;  %v2569_v41 = vld [vmem:[%s5753_s12 + $0x8] sm:$0xff] }
 0xecf   : > { %2556 = vst [vmem:[#allocation2 + $0x30] sm:$0xff] %v5138_v35  ;;  %2557 = vst [vmem:[#allocation2 + $0x38] sm:$0xff] %v5142_v59  ;;  %2668 = vperm.xlu1 %4369, %v3737_v40   ;;  %2579 = vperm.xlu0 %4368, %v2568_v61   ;;  %v2571_v60 = vld [vmem:[%s5753_s12 + $0x18] sm:$0xff]  ;;  %v2570_v49 = vld [vmem:[%s5753_s12 + $0x10] sm:$0xff] }
 0xed0   : > { %2558 = vst [vmem:[#allocation2 + $0x40] sm:$0xff] %v5136_v10  ;;  %2559 = vst [vmem:[#allocation2 + $0x48] sm:$0xff] %v5140_v11  ;;  %v3740_v24 = vld [vmem:[%s5753_s12 + $0x58] sm:$0xff]  ;;  %v3739_v25 = vld [vmem:[%s5753_s12 + $0x50] sm:$0xff] }
 0xed1   : > { %v3748_v27 = vld [vmem:[%s5753_s12 + $0x88] sm:$0xff]  ;;  %v3747_v8 = vld [vmem:[%s5753_s12 + $0x80] sm:$0xff]  ;;  %v3750_v31 = vld [vmem:[%s5753_s12 + $0x98] sm:$0xff] }
 0xed2   : > { %v3749_v28 = vld [vmem:[%s5753_s12 + $0x90] sm:$0xff]  ;;  %v3758_v42 = vld [vmem:[%s5753_s12 + $0xc8] sm:$0xff]  ;;  %v3757_v21 = vld [vmem:[%s5753_s12 + $0xc0] sm:$0xff] }
 0xed3   : > { %2673 = vperm.xlu1 %4369, %v3738_v15   ;;  %2584 = vperm.xlu0 %4368, %v2569_v41   ;;  %v3760_v45 = vld [vmem:[%s5753_s12 + $0xd8] sm:$0xff]  ;;  %v3759_v5 = vld [vmem:[%s5753_s12 + $0xd0] sm:$0xff]  ;;  %v3768_v22 = vld [vmem:[%s5753_s12 + $0x108] sm:$0xff] }
 0xed4   : > { %v3767_v47 = vld [vmem:[%s5753_s12 + $0x100] sm:$0xff]  ;;  %v3770_v12 = vld [vmem:[%s5753_s12 + $0x118] sm:$0xff]  ;;  %v3769_v2 = vld [vmem:[%s5753_s12 + $0x110] sm:$0xff] }
 0xed5   : > { %v2573_v36 = vld [vmem:[%s5753_s12 + $0x28] sm:$0xff]  ;;  %v2572_v3 = vld [vmem:[%s5753_s12 + $0x20] sm:$0xff]  ;;  %v2575_v16 = vld [vmem:[%s5753_s12 + $0x38] sm:$0xff] }
 0xed6   : > { %v3742_v0 = vld [vmem:[%s5753_s12 + $0x68] sm:$0xff]  ;;  %v3741_v19 = vld [vmem:[%s5753_s12 + $0x60] sm:$0xff]  ;;  %v2574_v7 = vld [vmem:[%s5753_s12 + $0x30] sm:$0xff] }
 0xed7   : > { %2594 = vperm.xlu1 %4369, %v2571_v60   ;;  %2589 = vperm.xlu0 %4368, %v2570_v49   ;;  %v3778_v50 = vld [vmem:[%s5753_s12 + $0x148] sm:$0xff]  ;;  %v3777_v13 = vld [vmem:[%s5753_s12 + $0x140] sm:$0xff]  ;;  %v3744_v29 = vld [vmem:[%s5753_s12 + $0x78] sm:$0xff] }
 0xed8   : > { %v3743_v54 = vld [vmem:[%s5753_s12 + $0x70] sm:$0xff]  ;;  %v3780_v57 = vld [vmem:[%s5753_s12 + $0x158] sm:$0xff]  ;;  %v3752_v17 = vld [vmem:[%s5753_s12 + $0xa8] sm:$0xff] }
 0xed9   : > { %v3779_v38 = vld [vmem:[%s5753_s12 + $0x150] sm:$0xff]  ;;  %v3751_v62 = vld [vmem:[%s5753_s12 + $0xa0] sm:$0xff]  ;;  %v3788_v1 = vld [vmem:[%s5753_s12 + $0x188] sm:$0xff] }
 0xeda   : > { %v3787_v18 = vld [vmem:[%s5753_s12 + $0x180] sm:$0xff]  ;;  %v3754_v32 = vld [vmem:[%s5753_s12 + $0xb8] sm:$0xff]  ;;  %v3753_v53 = vld [vmem:[%s5753_s12 + $0xb0] sm:$0xff] }
 0xedb   : > { %2683 = vperm.xlu1 %4369, %v3740_v24   ;;  %2678 = vperm.xlu0 %4368, %v3739_v25   ;;  %v3790_v43 = vld [vmem:[%s5753_s12 + $0x198] sm:$0xff]  ;;  %v3789_v33 = vld [vmem:[%s5753_s12 + $0x190] sm:$0xff]  ;;  %v3762_v30 = vld [vmem:[%s5753_s12 + $0xe8] sm:$0xff] }
 0xedc   : > { %v3761_v34 = vld [vmem:[%s5753_s12 + $0xe0] sm:$0xff]  ;;  %v3798_v6 = vld [vmem:[%s5753_s12 + $0x1c8] sm:$0xff]  ;;  %v3764_v58 = vld [vmem:[%s5753_s12 + $0xf8] sm:$0xff] }
 0xedd   : > { %v3797_v48 = vld [vmem:[%s5753_s12 + $0x1c0] sm:$0xff]  ;;  %v3763_v37 = vld [vmem:[%s5753_s12 + $0xf0] sm:$0xff]  ;;  %v3800_v23 = vld [vmem:[%s5753_s12 + $0x1d8] sm:$0xff] }
 0xede   : > { %v3799_v40 = vld [vmem:[%s5753_s12 + $0x1d0] sm:$0xff]  ;;  %v3772_v61 = vld [vmem:[%s5753_s12 + $0x128] sm:$0xff]  ;;  %v3771_v14 = vld [vmem:[%s5753_s12 + $0x120] sm:$0xff] }
 0xedf   : > { %2762 = vperm.xlu1 %4369, %v3748_v27   ;;  %2757 = vperm.xlu0 %4368, %v3747_v8   ;;  %v3808_v15 = vld [vmem:[%s5753_s12 + $0x208] sm:$0xff]  ;;  %v3807_v41 = vld [vmem:[%s5753_s12 + $0x200] sm:$0xff]  ;;  %v3774_v60 = vld [vmem:[%s5753_s12 + $0x138] sm:$0xff] }
 0xee0   : > { %v3773_v49 = vld [vmem:[%s5753_s12 + $0x130] sm:$0xff]  ;;  %v3810_v24 = vld [vmem:[%s5753_s12 + $0x218] sm:$0xff]  ;;  %v3782_v27 = vld [vmem:[%s5753_s12 + $0x168] sm:$0xff] }
 0xee1   : > { %v3809_v25 = vld [vmem:[%s5753_s12 + $0x210] sm:$0xff]  ;;  %v3781_v8 = vld [vmem:[%s5753_s12 + $0x160] sm:$0xff] }
 0xee3   : > { %2772 = vperm.xlu1 %4369, %v3750_v31   ;;  %2767 = vperm.xlu0 %4368, %v3749_v28   ;;  %v4370_v31 = vld [vmem:[%s5754_s13 + $0x38] sm:$0xff]  }
 0xee4   : > { %4131 = vmatprep.subr.bf16.mxu0 %v4370_v31  ;;  %v3784_v28 = vld [vmem:[%s5753_s12 + $0x178] sm:$0xff] }
 0xee5   : > { %4132 = vmatpush3.bf16.msra.mxu0 %v4370_v31  ;;  %v5413_v31 = vld [vmem:[%s5751_s10 + $0x2] ss:$0 sm:$0xff] }
 0xee7   : > { %2851 = vperm.xlu1 %4369, %v3758_v42   ;;  %2846 = vperm.xlu0 %4368, %v3757_v21   ;;  %v3783_v42 = vld [vmem:[%s5753_s12 + $0x170] sm:$0xff] }
 0xee8   : > { %v4371_v21 = vld [vmem:[%s5754_s13 + $0x30] sm:$0xff]  }
 0xee9   : > { %4133 = vmatprep.subr.bf16.mxu0 %v4371_v21 }
 0xeea   : > { %4134 = vmatpush3.bf16.msra.mxu0 %v4371_v21 }
 0xeeb   : > { %2861 = vperm.xlu1 %4369, %v3760_v45   ;;  %2856 = vperm.xlu0 %4368, %v3759_v5   ;;  %v3792_v45 = vld [vmem:[%s5753_s12 + $0x1a8] sm:$0xff]  ;;  %v3791_v5 = vld [vmem:[%s5753_s12 + $0x1a0] sm:$0xff] }
 0xeef   : > { %2940 = vperm.xlu1 %4369, %v3768_v22   ;;  %2935 = vperm.xlu0 %4368, %v3767_v47   ;;  %v4372_v22 = vld [vmem:[%s5754_s13 + $0x28] sm:$0xff]   ;;  %v5351_v47 = vld [vmem:[%s5751_s10 + $0x1] ss:$0 sm:$0xff] }
 0xef0   : > { %4135 = vmatprep.subr.bf16.mxu0 %v4372_v22 }
 0xef1   : > { %4136 = vmatpush3.bf16.msra.mxu0 %v4372_v22  ;;  %v3813_v22 = vld [vmem:[%s5753_s12 + $0x230] sm:$0xff] }
 0xef3   : > { %2950 = vperm.xlu1 %4369, %v3770_v12   ;;  %2945 = vperm.xlu0 %4368, %v3769_v2   ;;  %v5356_v12 = vld [vmem:[%s5751_s10] ss:$0 sm:$0xff]  ;;  %v3794_v2 = vld [vmem:[%s5753_s12 + $0x1b8] sm:$0xff] }
 0xef7   : > { %2604 = vperm.xlu1 %4369, %v2573_v36   ;;  %2599 = vperm.xlu0 %4368, %v2572_v3   ;;  %v3793_v36 = vld [vmem:[%s5753_s12 + $0x1b0] sm:$0xff]  ;;  %v4373_v3 = vld [vmem:[%s5754_s13 + $0x20] sm:$0xff]  }
 0xef8   : > { %4137 = vmatprep.subr.bf16.mxu0 %v4373_v3 }
 0xef9   : > { %4138 = vmatpush3.bf16.msra.mxu0 %v4373_v3 }
 0xefb   : > { %2693 = vperm.xlu1 %4369, %v3742_v0   ;;  %2688 = vperm.xlu0 %4368, %v3741_v19   ;;  %v2647_v0 = vld [vmem:[#allocation2 + $0x8] sm:$0xff] }
 0xeff   : > { %3029 = vperm.xlu1 %4369, %v3778_v50   ;;  %3024 = vperm.xlu0 %4368, %v3777_v13   ;;  %v2560_v13 = vld [vmem:[#allocation2 + $0x7] sm:$0xff] }
 0xf03   : > { %2614 = vperm.xlu1 %4369, %v2575_v16   ;;  %2609 = vperm.xlu0 %4368, %v2574_v7  }
 0xf07   : > { %2703 = vperm.xlu1 %4369, %v3744_v29   ;;  %2698 = vperm.xlu0 %4368, %v3743_v54   ;;  %v3802_v29 = vld [vmem:[%s5753_s12 + $0x1e8] sm:$0xff]  ;;  %v3801_v54 = vld [vmem:[%s5753_s12 + $0x1e0] sm:$0xff] }
 0xf0b   : > { %3039 = vperm.xlu1 %4369, %v3780_v57   ;;  %3034 = vperm.xlu0 %4368, %v3779_v38   ;;  %v4374_v57 = vld [vmem:[%s5754_s13 + $0x18] sm:$0xff]  }
 0xf0c   : > { %4139 = vmatprep.subr.bf16.mxu0 %v4374_v57 }
 0xf0d   : > { %4140 = vmatpush3.bf16.msra.mxu0 %v4374_v57 }
 0xf0f   : > { %2782 = vperm.xlu1 %4369, %v3752_v17   ;;  %2777 = vperm.xlu0 %4368, %v3751_v62  }
 0xf13   : > { %3118 = vperm.xlu1 %4369, %v3788_v1   ;;  %3113 = vperm.xlu0 %4368, %v3787_v18   ;;  %v5378_v18 = vld [vmem:[#allocation2 + $0xf] sm:$0xff] }
 0xf17   : > { %2792 = vperm.xlu1 %4369, %v3754_v32   ;;  %2787 = vperm.xlu0 %4368, %v3753_v53  }
 0xf1b   : > { %3128 = vperm.xlu1 %4369, %v3790_v43   ;;  %3123 = vperm.xlu0 %4368, %v3789_v33   ;;  %v3804_v33 = vld [vmem:[%s5753_s12 + $0x1f8] sm:$0xff] }
 0xf1f   : > { %2871 = vperm.xlu1 %4369, %v3762_v30   ;;  %2866 = vperm.xlu0 %4368, %v3761_v34   ;;  %v3803_v30 = vld [vmem:[%s5753_s12 + $0x1f0] sm:$0xff] }
 0xf20   : > { %v4375_v34 = vld [vmem:[%s5754_s13 + $0x10] sm:$0xff]  }
 0xf21   : > { %4141 = vmatprep.subr.bf16.mxu0 %v4375_v34 }
 0xf22   : > { %4142 = vmatpush3.bf16.msra.mxu0 %v4375_v34 }
 0xf23   : > { %3207 = vperm.xlu1 %4369, %v3798_v6   ;;  %3202 = vperm.xlu0 %4368, %v3797_v48  }
 0xf27   : > { %2881 = vperm.xlu1 %4369, %v3764_v58   ;;  %2876 = vperm.xlu0 %4368, %v3763_v37  }
 0xf2b   : > { %3217 = vperm.xlu1 %4369, %v3800_v23   ;;  %3212 = vperm.xlu0 %4368, %v3799_v40   ;;  %v3812_v40 = vld [vmem:[%s5753_s12 + $0x228] sm:$0xff] }
 0xf2f   : > { %2960 = vperm.xlu1 %4369, %v3772_v61   ;;  %2955 = vperm.xlu0 %4368, %v3771_v14   ;;  %v3811_v61 = vld [vmem:[%s5753_s12 + $0x220] sm:$0xff]  ;;  %v4376_v14 = vld [vmem:[%s5754_s13 + $0x8] sm:$0xff]  }
 0xf30   : > { %4143 = vmatprep.subr.bf16.mxu0 %v4376_v14 }
 0xf31   : > { %4144 = vmatpush3.bf16.msra.mxu0 %v4376_v14 }
 0xf33   : > { %3296 = vperm.xlu1 %4369, %v3808_v15   ;;  %3291 = vperm.xlu0 %4368, %v3807_v41  }
 0xf37   : > { %2970 = vperm.xlu1 %4369, %v3774_v60   ;;  %2965 = vperm.xlu0 %4368, %v3773_v49   ;;  %v5404_v60 = vld [vmem:[#allocation2 + $0x1f] sm:$0xff]  ;;  %v5406_v49 = vld [vmem:[#allocation2 + $0x17] sm:$0xff] }
 0xf3b   : > { %3306 = vperm.xlu1 %4369, %v3810_v24   ;;  %3301 = vperm.xlu0 %4368, %v3809_v25  }
 0xf3f   : > { %3049 = vperm.xlu1 %4369, %v3782_v27   ;;  %3044 = vperm.xlu0 %4368, %v3781_v8  }
 0xf43   : > { %3059 = vperm.xlu1 %4369, %v3784_v28   ;;  %3054 = vperm.xlu0 %4368, %v3783_v42   ;;  %v3814_v28 = vld [vmem:[%s5753_s12 + $0x238] sm:$0xff] }
 0xf47   : > { %3138 = vperm.xlu1 %4369, %v3792_v45   ;;  %3133 = vperm.xlu0 %4368, %v3791_v5  }
 0xf4a   : > { %v2669_v19 = vpop.permute.xlu1 %2668  ;;  %v2580_v50 = vpop.permute.xlu0 %2579 }
 0xf4b   : > { %v2712_v16 = vmul.f32 %v5351_v47, %v2669_v19  ;;  %v2623_v7 = vmul.f32 %v5356_v12, %v2580_v50  ;;  %3148 = vperm.xlu1 %4369, %v3794_v2   ;;  %3143 = vperm.xlu0 %4368, %v3793_v36   ;;  %v5425_v36 = vld [vmem:[#allocation2 + $0x11] sm:$0xff]  ;;  %v4377_v19 = vld [vmem:[%s5754_s13] sm:$0xff]  }
 0xf4c   : > { %4145 = vmatprep.subr.bf16.mxu0 %v4377_v19 }
 0xf4d   : > { %v2720_v38 = vmul.f32 %v2712_v16, %v2647_v0  ;;  %v2631_v17 = vmul.f32 %v2623_v7, %v2560_v13  ;;  %v2736_v0 = vld [vmem:[#allocation2 + $0x9] sm:$0xff]  ;;  %4146 = vmatpush3.bf16.msra.mxu0 %v4377_v19 }
 0xf4e   : > { %v2674_v62 = vpop.permute.xlu1 %2673  ;;  %v2585_v1 = vpop.permute.xlu0 %2584 }
 0xf4f   : > { %v2728_v32 = vadd.f32 %v2720_v38, %v2631_v17  ;;  %v2713_v53 = vmul.f32 %v5351_v47, %v2674_v62  ;;  %v2624_v43 = vmul.f32 %v5356_v12, %v2585_v1  ;;  %3227 = vperm.xlu1 %4369, %v3802_v29   ;;  %3222 = vperm.xlu0 %4368, %v3801_v54   ;;  %v5433_v38 = vld [vmem:[#allocation2 + $0x21] sm:$0xff]  ;;  %v5435_v62 = vld [vmem:[#allocation2 + $0x19] sm:$0xff] }
 0xf51   : > { %v2721_v6 = vmul.f32 %v2713_v53, %v5130_v20  ;;  %v2632_v48 = vmul.f32 %v2624_v43, %v5378_v18 }
 0xf52   : > { %v2595_v58 = vpop.permute.xlu1 %2594  ;;  %v2590_v37 = vpop.permute.xlu0 %2589 }
 0xf53   : > { %v2729_v23 = vadd.f32 %v2721_v6, %v2632_v48  ;;  %3237 = vperm.xlu1 %4369, %v3804_v33   ;;  %3232 = vperm.xlu0 %4368, %v3803_v30   ;;  %v2626_v15 = vmul.f32 %v5356_v12, %v2595_v58  ;;  %v2625_v41 = vmul.f32 %v5356_v12, %v2590_v37  ;;  %v5442_v30 = vld [vmem:[%s5751_s10 + $0x3] ss:$0 sm:$0xff] }
 0xf55   : > { %v2634_v42 = vmul.f32 %v2626_v15, %v5404_v60  ;;  %v2633_v21 = vmul.f32 %v2625_v41, %v5406_v49  ;;  %v5450_v41 = vld [vmem:[#allocation2 + $0x27] sm:$0xff] }
 0xf56   : > { %v2684_v24 = vpop.permute.xlu1 %2683  ;;  %v2679_v25 = vpop.permute.xlu0 %2678 }
 0xf57   : > { %v2715_v27 = vmul.f32 %v5351_v47, %v2684_v24  ;;  %v2714_v8 = vmul.f32 %v5351_v47, %v2679_v25  ;;  %3316 = vperm.xlu1 %4369, %v3812_v40   ;;  %3311 = vperm.xlu0 %4368, %v3811_v61  }
 0xf59   : > { %v2723_v45 = vmul.f32 %v2715_v27, %v5128_v9  ;;  %v2722_v5 = vmul.f32 %v2714_v8, %v5134_v39 }
 0xf5a   : > { %v2763_v2 = vpop.permute.xlu1 %2762  ;;  %v2758_v3 = vpop.permute.xlu0 %2757 }
 0xf5b   : > { %v2731_v50 = vadd.f32 %v2723_v45, %v2634_v42  ;;  %v2730_v13 = vadd.f32 %v2722_v5, %v2633_v21  ;;  %v2802_v16 = vmul.f32 %v5413_v31, %v2763_v2  ;;  %v2801_v7 = vmul.f32 %v5413_v31, %v2758_v3  ;;  %3326 = vperm.xlu1 %4369, %v3814_v28   ;;  %v5463_v2 = vld [vmem:[%s5751_s10 + $0x4] ss:$0 sm:$0xff] }
 0xf5c   : > { %3321 = vperm.xlu0 %4368, %v3813_v22  }
 0xf5d   : > { %v2810_v29 = vmul.f32 %v2802_v16, %v5425_v36  ;;  %v2809_v54 = vmul.f32 %v2801_v7, %v2736_v0 }
 0xf5e   : > { %v2773_v57 = vpop.permute.xlu1 %2772  ;;  %v2768_v17 = vpop.permute.xlu0 %2767 }
 0xf5f   : > { %v2818_v1 = vadd.f32 %v2810_v29, %v2729_v23  ;;  %v2817_v53 = vadd.f32 %v2809_v54, %v2728_v32  ;;  %v2804_v43 = vmul.f32 %v5413_v31, %v2773_v57  ;;  %v2803_v33 = vmul.f32 %v5413_v31, %v2768_v17 }
 0xf61   : > { %v2812_v34 = vmul.f32 %v2804_v43, %v5433_v38  ;;  %v2811_v6 = vmul.f32 %v2803_v33, %v5435_v62 }
 0xf62   : > { %v2852_v48 = vpop.permute.xlu1 %2851  ;;  %v2847_v58 = vpop.permute.xlu0 %2846 }
 0xf63   : > { %v2820_v37 = vadd.f32 %v2812_v34, %v2731_v50  ;;  %v2819_v40 = vadd.f32 %v2811_v6, %v2730_v13  ;;  %v2891_v23 = vmul.f32 %v5442_v30, %v2852_v48  ;;  %v2890_v32 = vmul.f32 %v5442_v30, %v2847_v58 }
 0xf65   : > { %v2899_v61 = vmul.f32 %v2891_v23, %v5406_v49  ;;  %v2898_v14 = vmul.f32 %v2890_v32, %v5378_v18 }
 0xf66   : > { %v2862_v15 = vpop.permute.xlu1 %2861  ;;  %v2857_v24 = vpop.permute.xlu0 %2856 }
 0xf67   : > { %v5452_v25 = vadd.f32 %v2899_v61, %v2818_v1  ;;  %v5454_v27 = vadd.f32 %v2898_v14, %v2817_v53  ;;  %v2893_v8 = vmul.f32 %v5442_v30, %v2862_v15  ;;  %v2892_v28 = vmul.f32 %v5442_v30, %v2857_v24  ;;  %v5475_v53 = vld [vmem:[#allocation2 + $0x2f] sm:$0xff] }
 0xf69   : > { %v2901_v42 = vmul.f32 %v2893_v8, %v5450_v41  ;;  %v2900_v21 = vmul.f32 %v2892_v28, %v5404_v60 }
 0xf6a   : > { %v2941_v45 = vpop.permute.xlu1 %2940  ;;  %v2936_v5 = vpop.permute.xlu0 %2935 }
 0xf6b   : > { %v2909_v22 = vadd.f32 %v2901_v42, %v2820_v37  ;;  %v2908_v18 = vadd.f32 %v2900_v21, %v2819_v40  ;;  %v5489_v42 = vld [vmem:[#allocation2 + $0x3f] sm:$0xff]  ;;  %v5491_v21 = vld [vmem:[#allocation2 + $0x37] sm:$0xff] }
 0xf6e   : > { %v2951_v3 = vpop.permute.xlu1 %2950  ;;  %v2946_v0 = vpop.permute.xlu0 %2945 }
 0xf6f   : > { %v2982_v19 = vmul.f32 %v5463_v2, %v2951_v3  ;;  %v2981_v50 = vmul.f32 %v5463_v2, %v2946_v0 }
 0xf71   : > { %v2990_v13 = vmul.f32 %v2982_v19, %v5132_v4  ;;  %v2989_v16 = vmul.f32 %v2981_v50, %v5128_v9 }
 0xf72   : > { %v2605_v7 = vpop.permute.xlu1 %2604  ;;  %v2600_v29 = vpop.permute.xlu0 %2599 }
 0xf73   : > { %v5469_v54 = vadd.f32 %v2990_v13, %v2909_v22  ;;  %v5471_v57 = vadd.f32 %v2989_v16, %v2908_v18  ;;  %v2628_v17 = vmul.f32 %v5356_v12, %v2605_v7  ;;  %v2627_v1 = vmul.f32 %v5356_v12, %v2600_v29 }
 0xf75   : > { %v2636_v48 = vmul.f32 %v2628_v17, %v5475_v53  ;;  %v2635_v58 = vmul.f32 %v5450_v41, %v2627_v1 }
 0xf76   : > { %v2694_v43 = vpop.permute.xlu1 %2693  ;;  %v2689_v33 = vpop.permute.xlu0 %2688 }
 0xf77   : > { %v2717_v34 = vmul.f32 %v5351_v47, %v2694_v43  ;;  %v2716_v6 = vmul.f32 %v5351_v47, %v2689_v33 }
 0xf79   : > { %v2725_v37 = vmul.f32 %v2717_v34, %v5138_v35  ;;  %v2724_v40 = vmul.f32 %v2716_v6, %v5132_v4 }
 0xf7a   : > { %v3030_v23 = vpop.permute.xlu1 %3029  ;;  %v3025_v32 = vpop.permute.xlu0 %3024 }
 0xf7b   : > { %v5483_v61 = vadd.f32 %v2725_v37, %v2636_v48  ;;  %v5485_v14 = vadd.f32 %v2724_v40, %v2635_v58 }
 0xf7e   : > { %v2615_v15 = vpop.permute.xlu1 %2614  ;;  %v2610_v24 = vpop.permute.xlu0 %2609 }
 0xf7f   : > { %v2630_v8 = vmul.f32 %v5356_v12, %v2615_v15  ;;  %v2629_v28 = vmul.f32 %v5356_v12, %v2610_v24 }
 0xf81   : > { %v2638_v19 = vmul.f32 %v2630_v8, %v5489_v42  ;;  %v2637_v50 = vmul.f32 %v2629_v28, %v5491_v21  ;;  %v5518_v8 = vld [vmem:[%s5751_s10 + $0x5] ss:$0 sm:$0xff]  ;;  %v2980_v28 = vmul.f32 %v5463_v2, %v2941_v45  ;;  %v5538_v45 = vld [vmem:[%s5751_s10 + $0x7] ss:$0 sm:$0xff] }
 0xf82   : > { %v2704_v22 = vpop.permute.xlu1 %2703  ;;  %v2699_v18 = vpop.permute.xlu0 %2698 }
 0xf83   : > { %v2719_v3 = vmul.f32 %v5351_v47, %v2704_v22  ;;  %v2718_v0 = vmul.f32 %v5351_v47, %v2699_v18  ;;  %v2979_v22 = vmul.f32 %v5463_v2, %v2936_v5 }
 0xf85   : > { %v2727_v13 = vmul.f32 %v2719_v3, %v5136_v10  ;;  %v2726_v16 = vmul.f32 %v2718_v0, %v5142_v59  ;;  %v3069_v0 = vmul.f32 %v5518_v8, %v3030_v23 }
 0xf86   : > { %v3040_v7 = vpop.permute.xlu1 %3039  ;;  %v3035_v12 = vpop.permute.xlu0 %3034 }
 0xf87   : > { %v5499_v29 = vadd.f32 %v2727_v13, %v2638_v19  ;;  %v5501_v17 = vadd.f32 %v2726_v16, %v2637_v50  ;;  %v3068_v19 = vmul.f32 %v5518_v8, %v3025_v32  ;;  %v5531_v50 = vld [vmem:[%s5751_s10 + $0x6] ss:$0 sm:$0xff]  ;;  %v2988_v13 = vmul.f32 %v2980_v28, %v5134_v39 }
 0xf88   : > { %v2987_v16 = vmul.f32 %v2979_v22, %v5130_v20  ;;  %v3077_v56 = vmul.f32 %v3069_v0, %v5435_v62 }
 0xf89   : > { %v3076_v63 = vmul.f32 %v3068_v19, %v5425_v36  ;;  %v2996_v20 = vadd.f32 %v2988_v13, %v5452_v25  ;;  %v3071_v36 = vmul.f32 %v5518_v8, %v3040_v7 }
 0xf8a   : > { %v5503_v1 = vpop.permute.xlu1 %2782  ;;  %v5505_v43 = vpop.permute.xlu0 %2777  ;;  %v2995_v22 = vadd.f32 %v2987_v16, %v5454_v27 }
 0xf8b   : > { %v3085_v44 = vadd.f32 %v3077_v56, %v2996_v20 }
 0xf8c   : > { %v3084_v0 = vadd.f32 %v3076_v63, %v2995_v22 }
 0xf8e   : > { %v3119_v33 = vpop.permute.xlu1 %3118  ;;  %v3114_v47 = vpop.permute.xlu0 %3113 }
 0xf8f   : > { %v3158_v5 = vmul.f32 %v5531_v50, %v3119_v33  ;;  %v3157_v23 = vmul.f32 %v5531_v50, %v3114_v47 }
 0xf91   : > { %v3166_v26 = vmul.f32 %v3158_v5, %v5404_v60  ;;  %v3165_v33 = vmul.f32 %v3157_v23, %v5406_v49  ;;  %v5561_v60 = vld [vmem:[%s5751_s10 + $0x8] ss:$0 sm:$0xff]  ;;  %v5563_v49 = vld [vmem:[#allocation2 + $0x29] sm:$0xff] }
 0xf92   : > { %v5507_v34 = vpop.permute.xlu1 %2792  ;;  %v5509_v6 = vpop.permute.xlu0 %2787 }
 0xf93   : > { %v3174_v27 = vadd.f32 %v3166_v26, %v3085_v44  ;;  %v3173_v19 = vadd.f32 %v3165_v33, %v3084_v0 }
 0xf96   : > { %v3129_v48 = vpop.permute.xlu1 %3128  ;;  %v3124_v58 = vpop.permute.xlu0 %3123 }
 0xf97   : > { %v3160_v63 = vmul.f32 %v5531_v50, %v3129_v48  ;;  %v3159_v7 = vmul.f32 %v5531_v50, %v3124_v58  ;;  %v5578_v58 = vld [vmem:[%s5752_s11] ss:$0 sm:$0xff] }
 0xf99   : > { %v3168_v22 = vmul.f32 %v3160_v63, %v5475_v53  ;;  %v3167_v33 = vmul.f32 %v3159_v7, %v5450_v41 }
 0xf9a   : > { %v5511_v37 = vpop.permute.xlu1 %2871  ;;  %v5513_v40 = vpop.permute.xlu0 %2866 }
 0xf9e   : > { %v3208_v15 = vpop.permute.xlu1 %3207  ;;  %v3203_v24 = vpop.permute.xlu0 %3202 }
 0xf9f   : > { %v3247_v52 = vmul.f32 %v5538_v45, %v3208_v15  ;;  %v3246_v28 = vmul.f32 %v5538_v45, %v3203_v24  ;;  %v3070_v15 = vmul.f32 %v5518_v8, %v3035_v12 }
 0xfa1   : > { %v3255_v24 = vmul.f32 %v3247_v52, %v5128_v9  ;;  %v3254_v25 = vmul.f32 %v3246_v28, %v5134_v39  ;;  %v3079_v9 = vmul.f32 %v3071_v36, %v5563_v49  ;;  %v3078_v39 = vmul.f32 %v3070_v15, %v5433_v38 }
 0xfa2   : > { %v5522_v18 = vpop.permute.xlu1 %2881  ;;  %v5524_v3 = vpop.permute.xlu0 %2876 }
 0xfa3   : > { %v3263_v16 = vadd.f32 %v3255_v24, %v3174_v27  ;;  %v3262_v5 = vadd.f32 %v3254_v25, %v3173_v19 }
 0xfa6   : > { %v3218_v55 = vpop.permute.xlu1 %3217  ;;  %v3213_v32 = vpop.permute.xlu0 %3212 }
 0xfa7   : > { %v3249_v23 = vmul.f32 %v5538_v45, %v3218_v55  ;;  %v3248_v44 = vmul.f32 %v5538_v45, %v3213_v32  ;;  %v3087_v32 = vadd.f32 %v3079_v9, %v5469_v54  ;;  %v2806_v9 = vmul.f32 %v5413_v31, %v5503_v1 }
 0xfa9   : > { %v3256_v36 = vmul.f32 %v3248_v44, %v5132_v4  ;;  %v3176_v19 = vadd.f32 %v3168_v22, %v3087_v32  ;;  %v2808_v32 = vmul.f32 %v5413_v31, %v5507_v34 }
 0xfaa   : > { %v5550_v51 = vpop.permute.xlu1 %2960  ;;  %v5552_v47 = vpop.permute.xlu0 %2955 }
 0xfae   : > { %v3297_v13 = vpop.permute.xlu1 %3296  ;;  %v3292_v56 = vpop.permute.xlu0 %3291 }
 0xfaf   : > { %v3336_v12 = vmul.f32 %v5561_v60, %v3297_v13  ;;  %v3335_v52 = vmul.f32 %v5561_v60, %v3292_v56  ;;  %v5598_v56 = vld [vmem:[#allocation2 + $0x31] sm:$0xff] }
 0xfb1   : > { %v3344_v26 = vmul.f32 %v3336_v12, %v5433_v38  ;;  %v3343_v48 = vmul.f32 %v3335_v52, %v5435_v62  ;;  %v3086_v38 = vadd.f32 %v3078_v39, %v5471_v57  ;;  %v3257_v62 = vmul.f32 %v3249_v23, %v5138_v35 }
 0xfb2   : > { %v5580_v28 = vpop.permute.xlu1 %2970  ;;  %v5582_v20 = vpop.permute.xlu0 %2965 }
 0xfb3   : > { %v3352_v55 = vadd.f32 %v3344_v26, %v3263_v16  ;;  %v3351_v0 = vadd.f32 %v3343_v48, %v3262_v5  ;;  %v3175_v41 = vadd.f32 %v3167_v33, %v3086_v38  ;;  %v3265_v63 = vadd.f32 %v3257_v62, %v3176_v19 }
 0xfb4   : > { %v2805_v48 = vmul.f32 %v5413_v31, %v5505_v43  ;;  %v2895_v19 = vmul.f32 %v5442_v30, %v5511_v37  ;;  %v5642_v37 = vld [vmem:[#allocation2 + $0x47] sm:$0xff] }
 0xfb5   : > { %v5591_v15 = vadd.f32 %v5578_v58, %v3352_v55  ;;  %v5594_v24 = vadd.f32 %v5578_v58, %v3351_v0  ;;  %v3264_v7 = vadd.f32 %v3256_v36, %v3175_v41  ;;  %v2814_v0 = vmul.f32 %v2806_v9, %v5598_v56 }
 0xfb6   : > { %v3307_v25 = vpop.permute.xlu1 %3306  ;;  %v3302_v27 = vpop.permute.xlu0 %3301  ;;  %v2813_v41 = vmul.f32 %v5563_v49, %v2805_v48  ;;  %v2984_v9 = vmul.f32 %v5463_v2, %v5550_v51  ;;  %v2985_v51 = vmul.f32 %v5463_v2, %v5582_v20 }
 0xfb7   : > { %v3338_v13 = vmul.f32 %v5561_v60, %v3307_v25  ;;  %v3337_v54 = vmul.f32 %v5561_v60, %v3302_v27  ;;  %v3382_v57 = vmul.f32 0.044715, %v5594_v24  ;;  %v3383_v4 = vmul.f32 0.044715, %v5591_v15  ;;  %v5625_v25 = vld [vmem:[#allocation2 + $0x41] sm:$0xff] }
 0xfb8   : > { %v2807_v27 = vmul.f32 %v5413_v31, %v5509_v6  ;;  %v2822_v31 = vadd.f32 %v2814_v0, %v5483_v61  ;;  %v2816_v6 = vmul.f32 %v2808_v32, %v5625_v25  ;;  %v2983_v61 = vmul.f32 %v5463_v2, %v5552_v47 }
 0xfb9   : > { %v3346_v12 = vmul.f32 %v3338_v13, %v5598_v56  ;;  %v3345_v52 = vmul.f32 %v3337_v54, %v5563_v49  ;;  %v3390_v5 = vmul.f32 %v3382_v57, %v5594_v24  ;;  %v3391_v23 = vmul.f32 %v3383_v4, %v5591_v15  ;;  %v5632_v13 = vld [vmem:[#allocation2 + $0x39] sm:$0xff] }
 0xfba   : > { %v3050_v39 = vpop.permute.xlu1 %3049  ;;  %v3045_v16 = vpop.permute.xlu0 %3044  ;;  %v2894_v57 = vmul.f32 %v5442_v30, %v5513_v40  ;;  %v2897_v4 = vmul.f32 %v5442_v30, %v5522_v18  ;;  %v2903_v40 = vmul.f32 %v2895_v19, %v5491_v21  ;;  %v2896_v18 = vmul.f32 %v5442_v30, %v5524_v3 }
 0xfbb   : > { %v3354_v44 = vadd.f32 %v3346_v12, %v3265_v63  ;;  %v3353_v26 = vadd.f32 %v3345_v52, %v3264_v7  ;;  %v3398_v22 = vmul.f32 %v3390_v5, %v5594_v24  ;;  %v3399_v33 = vmul.f32 %v3391_v23, %v5591_v15 }
 0xfbc   : > { %v2815_v52 = vmul.f32 %v2807_v27, %v5632_v13  ;;  %v2905_v48 = vmul.f32 %v2897_v4, %v5642_v37  ;;  %v2986_v30 = vmul.f32 %v5463_v2, %v5580_v28  ;;  %v2824_v3 = vadd.f32 %v2816_v6, %v5499_v29 }
 0xfbd   : > { %v5613_v55 = vadd.f32 %v5578_v58, %v3354_v44  ;;  %v5616_v1 = vadd.f32 %v5578_v58, %v3353_v26  ;;  %v3406_v43 = vadd.f32 %v3398_v22, %v5594_v24  ;;  %v3407_v36 = vadd.f32 %v3399_v33, %v5591_v15 }
 0xfbe   : > { %v3060_v38 = vpop.permute.xlu1 %3059  ;;  %v5621_v62 = vpop.permute.xlu0 %3054  ;;  %v2821_v44 = vadd.f32 %v2813_v41, %v5485_v14  ;;  %v2902_v26 = vmul.f32 %v2894_v57, %v5475_v53  ;;  %v2823_v14 = vadd.f32 %v2815_v52, %v5501_v17  ;;  %v2904_v53 = vmul.f32 %v2896_v18, %v5489_v42 }
 0xfbf   : > { %v3414_v34 = vmul.f32 0.7978846, %v3406_v43  ;;  %v3415_v54 = vmul.f32 0.7978846, %v3407_v36  ;;  %v3384_v63 = vmul.f32 0.044715, %v5616_v1  ;;  %v2992_v32 = vmul.f32 %v2984_v9, %v5142_v59 }
 0xfc0   : > { %v3385_v7 = vmul.f32 0.044715, %v5613_v55  ;;  %v3073_v43 = vmul.f32 %v5518_v8, %v3050_v39  ;;  %v2911_v28 = vadd.f32 %v2903_v40, %v2822_v31  ;;  %v2991_v29 = vmul.f32 %v2983_v61, %v5138_v35  ;;  %v5680_v40 = vld [vmem:[#allocation2 + $0x49] sm:$0xff] }
 0xfc1   : > { %4378 = vtanh.f32 %v3414_v34  ;;  %v3392_v5 = vmul.f32 %v3384_v63, %v5616_v1  ;;  %v2910_v20 = vadd.f32 %v2902_v26, %v2821_v44  ;;  %v2913_v27 = vadd.f32 %v2905_v48, %v2824_v3 }
 0xfc2   : > { %v3139_v49 = vpop.permute.xlu1 %3138  ;;  %v3134_v12 = vpop.permute.xlu0 %3133  ;;  %4380 = vtanh.f32 %v3415_v54  ;;  %v3393_v23 = vmul.f32 %v3385_v7, %v5613_v55  ;;  %v2994_v19 = vmul.f32 %v2986_v30, %v5140_v11  ;;  %v3072_v41 = vmul.f32 %v5518_v8, %v3045_v16 }
 0xfc3   : > { %v3400_v33 = vmul.f32 %v3392_v5, %v5616_v1  ;;  %v2993_v17 = vmul.f32 %v2985_v51, %v5136_v10  ;;  %v3162_v34 = vmul.f32 %v5531_v50, %v3139_v49  ;;  %v2912_v63 = vadd.f32 %v2904_v53, %v2823_v14 }
 0xfc4   : > { %v3401_v0 = vmul.f32 %v3393_v23, %v5613_v55  ;;  %v3000_v35 = vadd.f32 %v2992_v32, %v2911_v28  ;;  %v3081_v7 = vmul.f32 %v3073_v43, %v5632_v13  ;;  %v3161_v31 = vmul.f32 %v5531_v50, %v3134_v12 }
 0xfc5   : > { %v3408_v36 = vadd.f32 %v3400_v33, %v5616_v1  ;;  %v2999_v6 = vadd.f32 %v2991_v29, %v2910_v20  ;;  %v3075_v52 = vmul.f32 %v5518_v8, %v3060_v38  ;;  %v3080_v16 = vmul.f32 %v3072_v41, %v5598_v56 }
 0xfc6   : > { %v3149_v47 = vpop.permute.xlu1 %3148  ;;  %v3144_v22 = vpop.permute.xlu0 %3143  ;;  %v3409_v2 = vadd.f32 %v3401_v0, %v5613_v55  ;;  %v3074_v49 = vmul.f32 %v5518_v8, %v5621_v62  ;;  %v3002_v9 = vadd.f32 %v2994_v19, %v2913_v27  ;;  %v3001_v61 = vadd.f32 %v2993_v17, %v2912_v63  ;;  %v3099_v62 = vld [vmem:[#allocation2 + $0x4f] sm:$0xff] }
 0xfc7   : > { %v3416_v39 = vmul.f32 0.7978846, %v3408_v36  ;;  %v3170_v12 = vmul.f32 %v3162_v34, %v5489_v42  ;;  %v3374_v38 = vmul.f32 0.5, %v5594_v24  ;;  %v3089_v26 = vadd.f32 %v3081_v7, %v3000_v35 }
 0xfc8   : > { %v3417_v4 = vmul.f32 0.7978846, %v3409_v2  ;;  %v3169_v56 = vmul.f32 %v3161_v31, %v5491_v21  ;;  %v3164_v48 = vmul.f32 %v5531_v50, %v3149_v47  ;;  %v3375_v30 = vmul.f32 0.5, %v5591_v15  ;;  %v3188_v47 = vld [vmem:[#allocation2 + $0x50] sm:$0xff] }
 0xfc9   : > { %4382 = vtanh.f32 %v3416_v39  ;;  %v3083_v8 = vmul.f32 %v3075_v52, %v5680_v40  ;;  %v3163_v3 = vmul.f32 %v5531_v50, %v3144_v22  ;;  %v3088_v0 = vadd.f32 %v3080_v16, %v2999_v6 }
 0xfca   : > { %v3228_v54 = vpop.permute.xlu1 %3227  ;;  %v3223_v57 = vpop.permute.xlu0 %3222  ;;  %4384 = vtanh.f32 %v3417_v4  ;;  %v3082_v24 = vmul.f32 %v3074_v49, %v5625_v25  ;;  %v3178_v53 = vadd.f32 %v3170_v12, %v3089_v26  ;;  %v3172_v22 = vmul.f32 %v3164_v48, %v3099_v62  ;;  %v3277_v4 = vld [vmem:[#allocation2 + $0x51] sm:$0xff] }
 0xfcb   : > { %v3251_v11 = vmul.f32 %v5538_v45, %v3228_v54  ;;  %v3250_v18 = vmul.f32 %v5538_v45, %v3223_v57  ;;  %v3177_v50 = vadd.f32 %v3169_v56, %v3088_v0  ;;  %v3091_v2 = vadd.f32 %v3083_v8, %v3002_v9  ;;  %v4394_v54 = vld [vmem:[#allocation2 + $0x48] sm:$0xff] }
 0xfcc   : > { %v3171_v20 = vmul.f32 %v3163_v3, %v5642_v37  ;;  %v3090_v34 = vadd.f32 %v3082_v24, %v3001_v61 }
 0xfcd   : > { %v3259_v51 = vmul.f32 %v3251_v11, %v5136_v10  ;;  %v3258_v14 = vmul.f32 %v3250_v18, %v5142_v59  ;;  %v3180_v35 = vadd.f32 %v3172_v22, %v3091_v2 }
 0xfce   : > { %v3238_v5 = vpop.permute.xlu1 %3237  ;;  %v3233_v23 = vpop.permute.xlu0 %3232  ;;  %v3179_v52 = vadd.f32 %v3171_v20, %v3090_v34 }
 0xfcf   : > { %v4379_v44 = vpop.eup %4378  ;;  %v3253_v21 = vmul.f32 %v5538_v45, %v3238_v5  ;;  %v3252_v15 = vmul.f32 %v5538_v45, %v3233_v23  ;;  %v3267_v59 = vadd.f32 %v3259_v51, %v3178_v53  ;;  %v3266_v19 = vadd.f32 %v3258_v14, %v3177_v50 }
 0xfd0   : > { %v3430_v42 = vadd.f32 1.0, %v4379_v44  ;;  %v4381_v33 = vpop.eup %4380  ;;  %v3376_v5 = vmul.f32 0.5, %v5616_v1  ;;  %v3377_v44 = vmul.f32 0.5, %v5613_v55 }
 0xfd1   : > { %v3431_v28 = vadd.f32 1.0, %v4381_v33  ;;  %v3261_v41 = vmul.f32 %v3253_v21, %v3188_v47  ;;  %v3260_v57 = vmul.f32 %v4394_v54, %v3252_v15 }
 0xfd2   : > { %v3317_v32 = vpop.permute.xlu1 %3316  ;;  %v3312_v43 = vpop.permute.xlu0 %3311  ;;  %v3438_v29 = vmul.f32 %v3430_v42, %v3374_v38 }
 0xfd3   : > { %v3340_v10 = vmul.f32 %v5561_v60, %v3317_v32  ;;  %v3339_v36 = vmul.f32 %v5561_v60, %v3312_v43  ;;  %v3439_v27 = vmul.f32 %v3431_v28, %v3375_v30  ;;  %v3268_v61 = vadd.f32 %v3260_v57, %v3179_v52 }
 0xfd5   : > { %v3348_v17 = vmul.f32 %v3340_v10, %v5625_v25  ;;  %v3347_v45 = vmul.f32 %v3339_v36, %v5632_v13  ;;  %v3446_v39 = vpack.c.bf16 %v3439_v27, %v3438_v29  ;;  %v3269_v25 = vadd.f32 %v3261_v41, %v3180_v35 }
 0xfd6   : > { %v3327_v63 = vpop.permute.xlu1 %3326  ;;  %v4383_v16 = vpop.eup %4382 }
 0xfd7   : > { %v3356_v7 = vadd.f32 %v3348_v17, %v3267_v59  ;;  %v3355_v31 = vadd.f32 %v3347_v45, %v3266_v19  ;;  %v3342_v6 = vmul.f32 %v5561_v60, %v3327_v63  ;;  %v3322_v37 = vpop.permute.xlu0 %3321  ;;  %4147 = vmatprep.mubr.bf16.mxu0 %v3446_v39  ;;  %v4385_v9 = vpop.eup %4384  ;;  %v3432_v23 = vadd.f32 1.0, %v4383_v16 }
 0xfd8   : > { %v3341_v11 = vmul.f32 %v5561_v60, %v3322_v37  ;;  %v3433_v26 = vadd.f32 1.0, %v4385_v9  ;;  %v5772_v9 = vld [vmem:[#allocation5_spill] sm:$0xff] }
 0xfd9   : > { %v3371_v13 = vadd.f32 %v5578_v58, %v3356_v7  ;;  %v3370_v49 = vadd.f32 %v5578_v58, %v3355_v31  ;;  %v3350_v18 = vmul.f32 %v3342_v6, %v3277_v4  ;;  %v3440_v60 = vmul.f32 %v3432_v23, %v3376_v5  ;;  %v3818_v7 = vld [vmem:[%s5755_s14] ss:$0 sm:$0xff]  ;;  %v5773_v5 = vld [vmem:[#allocation4_spill] sm:$0xff] }
 0xfda   : > { %v3349_v12 = vmul.f32 %v3341_v11, %v5680_v40  ;;  %v3441_v62 = vmul.f32 %v3433_v26, %v3377_v44  ;;  %v5774_v26 = vld [vmem:[#allocation7_spill] sm:$0xff] }
 0xfdb   : > { %v3358_v38 = vadd.f32 %v3350_v18, %v3269_v25  ;;  %v3386_v48 = vmul.f32 0.044715, %v3370_v49  ;;  %v3387_v30 = vmul.f32 0.044715, %v3371_v13  ;;  %v3378_v36 = vmul.f32 0.5, %v3370_v49  ;;  %v5771_v25 = vld [vmem:[#allocation3_spill] sm:$0xff] }
 0xfdc   : > { %v3357_v56 = vadd.f32 %v3349_v12, %v3268_v61  ;;  %v3447_v33 = vpack.c.bf16 %v3441_v62, %v3440_v60  ;;  %v3379_v20 = vmul.f32 0.5, %v3371_v13 }
 0xfdd   : > { %v3373_v8 = vadd.f32 %v5578_v58, %v3358_v38  ;;  %v3394_v51 = vmul.f32 %v3386_v48, %v3370_v49  ;;  %v3395_v42 = vmul.f32 %v3387_v30, %v3371_v13  ;;  %v5775_v30 = vld [vmem:[#allocation6_spill] sm:$0xff] }
 0xfde   : > { %v3372_v3 = vadd.f32 %v5578_v58, %v3357_v56  ;;  %4148 = vmatmul.mubr.bf16.vlgmr.msra.gmra.mxu0 %v3447_v33 }
 0xfdf   : > { %v3389_v40 = vmul.f32 0.044715, %v3373_v8  ;;  %v3402_v0 = vmul.f32 %v3394_v51, %v3370_v49  ;;  %v3403_v1 = vmul.f32 %v3395_v42, %v3371_v13  ;;  %v3381_v45 = vmul.f32 0.5, %v3373_v8  ;;  %v5776_v51 = vld [vmem:[#allocation9_spill] sm:$0xff] }
 0xfe0   : > { %v3388_v24 = vmul.f32 0.044715, %v3372_v3  ;;  %v3380_v54 = vmul.f32 0.5, %v3372_v3 }
 0xfe1   : > { %v3397_v14 = vmul.f32 %v3389_v40, %v3373_v8  ;;  %v3410_v55 = vadd.f32 %v3402_v0, %v3370_v49  ;;  %v3411_v21 = vadd.f32 %v3403_v1, %v3371_v13  ;;  %v5777_v40 = vld [vmem:[#allocation8_spill] sm:$0xff] }
 0xfe2   : > { %v3396_v53 = vmul.f32 %v3388_v24, %v3372_v3 }
 0xfe3   : > { %v3405_v47 = vmul.f32 %v3397_v14, %v3373_v8  ;;  %v3418_v15 = vmul.f32 0.7978846, %v3410_v55  ;;  %v3419_v32 = vmul.f32 0.7978846, %v3411_v21 }
 0xfe4   : > { %v3404_v43 = vmul.f32 %v3396_v53, %v3372_v3 }
 0xfe5   : > { %v3413_v28 = vadd.f32 %v3405_v47, %v3373_v8  ;;  %4386 = vtanh.f32 %v3418_v15 }
 0xfe6   : > { %v3412_v29 = vadd.f32 %v3404_v43, %v3372_v3  ;;  %4388 = vtanh.f32 %v3419_v32 }
 0xfe7   : > { %v3421_v58 = vmul.f32 0.7978846, %v3413_v28 }
 0xfe8   : > { %v3420_v50 = vmul.f32 0.7978846, %v3412_v29 }
 0xfe9   : > { %4390 = vtanh.f32 %v3421_v58 }
 0xfea   : > { %4392 = vtanh.f32 %v3420_v50 }
 0xff2   : > { %v4387_v22 = vpop.eup %4386 }
 0xff3   : > { %v4389_v10 = vpop.eup %4388  ;;  %v3434_v2 = vadd.f32 1.0, %v4387_v22 }
 0xff4   : > { %v3435_v59 = vadd.f32 1.0, %v4389_v10 }
 0xff5   : > { %v3442_v19 = vmul.f32 %v3434_v2, %v3378_v36 }
 0xff6   : > { %v4391_v27 = vpop.eup %4390  ;;  %v3443_v17 = vmul.f32 %v3435_v59, %v3379_v20 }
 0xff7   : > { %v4393_v41 = vpop.eup %4392  ;;  %v3437_v34 = vadd.f32 1.0, %v4391_v27 }
 0xff8   : > { %v3436_v57 = vadd.f32 1.0, %v4393_v41  ;;  %v3448_v39 = vpack.c.bf16 %v3443_v17, %v3442_v19 }
 0xff9   : > { %v3445_v4 = vmul.f32 %v3437_v34, %v3381_v45 }
 0xffa   : > { %v3444_v63 = vmul.f32 %v3436_v57, %v3380_v54  ;;  %4151 = vmatprep.mubr.bf16.mxu0 %v3448_v39 }
 0xffc   : > { %v3449_v35 = vpack.c.bf16 %v3445_v4, %v3444_v63 }
 0xffe   : > { %4152 = vmatmul.mubr.bf16.gmra.mxu0 %v3449_v35 }
0x109e   : > { %v4149_v31 = vpop.f32.mrf.mxu0 }
0x109f   : > { %v3564_v6 = vadd.f32 %v4149_v31, %v3818_v7 }
0x10a0   : > { %v3555_v37 = vpop.f32.mrf.mxu0 }
0x10a1   : > { %v3588_v52 = vadd.f32 %v3564_v6, %v5021_v46  ;;  %v3556_v11 = vadd.f32 %v3818_v7, %v3555_v37 }
0x10a2   : > { %v4150_v16 = vpop.f32.mrf.mxu0 }
0x10a3   : > { %3596 = vst.msk [vmem:[%s4516_s27 + $0x10] sm:$0xff] %vm506_vm0, %v3588_v52  ;;  %v3586_v13 = vadd.f32 %v3556_v11, %v5771_v25  ;;  %v3567_v49 = vadd.f32 %v4150_v16, %v3818_v7 }
0x10a4   : > { %v3558_v18 = vpop.f32.mrf.mxu0 }
0x10a5   : > { %3594 = vst.msk [vmem:[%s4516_s27] sm:$0xff] %vm506_vm0, %v3586_v13  ;;  %v3589_v61 = vadd.f32 %v3567_v49, %v5772_v9  ;;  %v3559_v12 = vadd.f32 %v3818_v7, %v3558_v18 }
0x10a7   : > { %3597 = vst.msk [vmem:[%s4516_s27 + $0x18] sm:$0xff] %vm506_vm0, %v3589_v61  ;;  %v3587_v46 = vadd.f32 %v3559_v12, %v5773_v5 }
0x10a9   : > { %3595 = vst.msk [vmem:[%s4516_s27 + $0x8] sm:$0xff] %vm506_vm0, %v3587_v46 }
0x10be   : > { %v4153_v23 = vpop.f32.mrf.mxu0 }
0x10bf   : > { %v3580_v38 = vadd.f32 %v4153_v23, %v3818_v7 }
0x10c0   : > { %v3571_v44 = vpop.f32.mrf.mxu0 }
0x10c1   : > { %v3592_v56 = vadd.f32 %v3580_v38, %v5774_v26  ;;  %v3572_v60 = vadd.f32 %v3818_v7, %v3571_v44 }
0x10c2   : > { %v4154_v48 = vpop.f32.mrf.mxu0 }
0x10c3   : > { %3600 = vst.msk [vmem:[%s4516_s27 + $0x30] sm:$0xff] %vm506_vm0, %v3592_v56  ;;  %v3590_v8 = vadd.f32 %v3572_v60, %v5775_v30  ;;  %v3583_v62 = vadd.f32 %v4154_v48, %v3818_v7 }
0x10c4   : > { %v3574_v3 = vpop.f32.mrf.mxu0 }
0x10c5   : > { %3598 = vst.msk [vmem:[%s4516_s27 + $0x20] sm:$0xff] %vm506_vm0, %v3590_v8  ;;  %v3593_v42 = vadd.f32 %v3583_v62, %v5776_v51  ;;  %v3575_v33 = vadd.f32 %v3818_v7, %v3574_v3 }
0x10c7   : > { %3601 = vst.msk [vmem:[%s4516_s27 + $0x38] sm:$0xff] %vm506_vm0, %v3593_v42  ;;  %v3591_v0 = vadd.f32 %v3575_v33, %v5777_v40 }
0x10c9   : > { %3599 = vst.msk [vmem:[%s4516_s27 + $0x28] sm:$0xff] %vm506_vm0, %v3591_v0 }
0x10ca PF: > { %s25_s18 = sadd.s32 1, %s4401_s18  }
0x10cb   : > { %p22_p5 = scmp.ge.s32.totalorder %s25_s18, 4  }
0x10cd   :  { %24 = sbr.rel (!%p22_p5) target bundleno = 1 (0x1), region = 133 }

</bundles_post_ra>
